<compile_context>
chip_gen: v7x
topology: tpu7x:2x2x1
jax: 0.10.0
libtpu: 0.0.40
codegen_flags: <defaults>
</compile_context>

<pallas_src>
import jax
import jax.numpy as jnp
import numpy as np
from jax import lax
from jax.experimental import pallas as pl
from jax.experimental.pallas import tpu as pltpu

EPS = 1e-5
GROUPS = 32
VMEM_LIMIT = 48 * 1024 * 1024   # keep a 2-deep pipeline resident on v7x (64 MiB VMEM)


# --------------------------------------------------------------------------
# small helpers
# --------------------------------------------------------------------------
def _round_up(x, m):
    return ((x + m - 1) // m) * m


def _channel_tile(c, target=256):
    """Largest divisor of c that is a multiple of 128 and <= target, else c."""
    if c <= target:
        return c
    d = (target // 128) * 128
    while d >= 128:
        if c % d == 0:
            return d
        d -= 128
    return c


def _hw_tile(hw, target=2048):
    if hw <= target:
        return hw
    d = (target // 8) * 8
    while d >= 8:
        if hw % d == 0:
            return d
        d -= 8
    return hw


# --------------------------------------------------------------------------
# Kernel 1: GroupNorm statistics of the raw input (per-channel sum / sumsq),
# tiled over HW with an accumulating output block (P3 pattern).
# --------------------------------------------------------------------------
def _gn_stats_kernel(x_ref, o_ref):
    @pl.when(pl.program_id(1) == 0)
    def _():
        o_ref[...] = jnp.zeros_like(o_ref)

    x = x_ref[0].astype(jnp.float32)                       # (tm, C)
    s = jnp.sum(x, axis=0, keepdims=True)                  # (1, C)
    ss = jnp.sum(x * x, axis=0, keepdims=True)             # (1, C)
    o_ref[0] = o_ref[0] + jnp.concatenate([s, ss], axis=0)


def gn_stats(x_flat):
    N, HW, C = x_flat.shape
    tm = _hw_tile(HW)
    return pl.pallas_call(
        _gn_stats_kernel,
        out_shape=jax.ShapeDtypeStruct((N, 2, C), jnp.float32),
        grid=(N, HW // tm),
        in_specs=[pl.BlockSpec((1, tm, C), lambda n, k: (n, k, 0))],
        out_specs=pl.BlockSpec((1, 2, C), lambda n, k: (n, 0, 0)),
        compiler_params=pltpu.CompilerParams(
            dimension_semantics=("parallel", "arbitrary"),
            vmem_limit_bytes=VMEM_LIMIT),
    )(x_flat)


def _gn_affine(stats, gamma, beta, HW):
    """Turn per-channel (sum, sumsq) into per-(batch, channel) scale/shift (tiny JAX)."""
    N, _, C = stats.shape
    cpg = C // GROUPS
    s = stats[:, 0, :].reshape(N, GROUPS, cpg).sum(-1)     # (N, G)
    ss = stats[:, 1, :].reshape(N, GROUPS, cpg).sum(-1)
    cnt = HW * cpg
    mean = s / cnt
    var = jnp.maximum(ss / cnt - mean * mean, 0.0)         # clamp cancellation noise
    inv = lax.rsqrt(var + EPS)
    mean_c = jnp.repeat(mean, cpg, axis=1)                 # (N, C)
    inv_c = jnp.repeat(inv, cpg, axis=1)
    scale = inv_c * gamma[None, :]
    shift = beta[None, :] - mean_c * scale
    return (scale.reshape(N, 1, C).astype(jnp.float32),
            shift.reshape(N, 1, C).astype(jnp.float32))


# --------------------------------------------------------------------------
# Kernel 2: fused GroupNorm-apply + SiLU + 3x3 conv (9-tap MXU matmuls)
#           + bias + addend  [+ optional fused 1x1 residual projection]
#           [+ optional per-channel stats of the conv output for the next GN].
# Grid: (N, Cout tiles, Cin tiles); reduction (Cin) axis last / "arbitrary".
# --------------------------------------------------------------------------
def _make_fused_conv_kernel(H, W, PAD, emit_stats, compute_res):
    HW = H * W
    HWp = HW + 2 * PAD
    taps = [(dy, dx) for dy in (-1, 0, 1) for dx in (-1, 0, 1)]

    def _body(x_ref, scale_ref, shift_ref, w_ref, b_ref, add_ref, wr_ref, br_ref,
              o_ref, stats_ref, res_ref, act_ref, acc_ref, accr_ref):
        k = pl.program_id(2)
        nk = pl.num_programs(2)

        # GroupNorm affine + SiLU on this input-channel tile (f32 math),
        # cast to bf16 and write into the zero-padded scratch; the pad rows
        # emulate the conv's zero padding for the dy = +/-1 taps.
        x = x_ref[0].astype(jnp.float32)                   # (HW, tck)
        y = x * scale_ref[0] + shift_ref[0]
        a = (y * jax.nn.sigmoid(y)).astype(jnp.bfloat16)
        tc = a.shape[1]
        zeros_pad = jnp.zeros((PAD, tc), jnp.bfloat16)
        act_ref[0:PAD, :] = zeros_pad
        act_ref[PAD + HW:HWp, :] = zeros_pad
        act_ref[PAD:PAD + HW, :] = a

        @pl.when(k == 0)
        def _():
            acc_ref[...] = jnp.zeros_like(acc_ref)
            if compute_res:
                accr_ref[...] = jnp.zeros_like(accr_ref)

        # column masks for the dx = +/-1 taps (zero the row-wrap positions)
        wcoord = lax.broadcasted_iota(jnp.int32, (HW, 1), 0) % W
        not_left = wcoord != 0
        not_right = wcoord != (W - 1)

        # 9-tap conv: bf16 MXU matmuls, f32 accumulation in VMEM scratch.
        for t, (dy, dx) in enumerate(taps):
            s = dy * W + dx
            tap = act_ref[PAD + s:PAD + s + HW, :]          # (HW, tck) bf16
            if dx == -1:
                tap = jnp.where(not_left, tap, 0)
            elif dx == 1:
                tap = jnp.where(not_right, tap, 0)
            acc_ref[...] += jnp.dot(tap, w_ref[t],
                                    preferred_element_type=jnp.float32)

        if compute_res:
            # fused 1x1 residual projection on the *raw* (un-normalized) input
            accr_ref[...] += jnp.dot(x.astype(jnp.bfloat16), wr_ref[...],
                                     preferred_element_type=jnp.float32)

        @pl.when(k == nk - 1)
        def _():
            out = acc_ref[...] + b_ref[0] + add_ref[0].astype(jnp.float32)
            o_ref[0] = out.astype(o_ref.dtype)
            if emit_stats:
                # per-channel sum/sumsq of the conv output -> next GroupNorm,
                # computed from the f32 accumulator (no extra HBM pass).
                s1 = jnp.sum(out, axis=0, keepdims=True)
                s2 = jnp.sum(out * out, axis=0, keepdims=True)
                stats_ref[0] = jnp.concatenate([s1, s2], axis=0)
            if compute_res:
                res_ref[0] = (accr_ref[...] + br_ref[0]).astype(res_ref.dtype)

    if compute_res:
        def kernel(x_ref, scale_ref, shift_ref, w_ref, b_ref, add_ref, wr_ref, br_ref,
                   o_ref, stats_ref, res_ref, act_ref, acc_ref, accr_ref):
            _body(x_ref, scale_ref, shift_ref, w_ref, b_ref, add_ref, wr_ref, br_ref,
                  o_ref, stats_ref, res_ref, act_ref, acc_ref, accr_ref)
    elif emit_stats:
        def kernel(x_ref, scale_ref, shift_ref, w_ref, b_ref, add_ref,
                   o_ref, stats_ref, act_ref, acc_ref):
            _body(x_ref, scale_ref, shift_ref, w_ref, b_ref, add_ref, None, None,
                  o_ref, stats_ref, None, act_ref, acc_ref, None)
    else:
        def kernel(x_ref, scale_ref, shift_ref, w_ref, b_ref, add_ref,
                   o_ref, act_ref, acc_ref):
            _body(x_ref, scale_ref, shift_ref, w_ref, b_ref, add_ref, None, None,
                  o_ref, None, None, act_ref, acc_ref, None)
    return kernel


def fused_gn_silu_conv(x, scale, shift, w9, bias, addend, H, W, *,
                       emit_stats, wr=None, br=None, out_dtype=jnp.float32):
    """y = conv3x3(silu(GN_affine(x))) + bias + addend  [+ optional x@wr + br]."""
    N, HW, Ck = x.shape
    Cout = w9.shape[2]
    A = addend.shape[1]                                    # 1 (broadcast) or HW
    compute_res = wr is not None
    assert (not compute_res) or emit_stats

    tck = _channel_tile(Ck)                                # reduction (K) tile
    tco = _channel_tile(Cout)                              # output-channel tile
    nk = Ck // tck
    nj = Cout // tco
    PAD = _round_up(W + 1, 16)                             # halo rows for dy = +/-1
    HWp = HW + 2 * PAD

    kernel = _make_fused_conv_kernel(H, W, PAD, emit_stats, compute_res)

    in_specs = [
        pl.BlockSpec((1, HW, tck), lambda n, j, k: (n, 0, k)),   # x (raw / merged)
        pl.BlockSpec((1, 1, tck), lambda n, j, k: (n, 0, k)),    # GN scale
        pl.BlockSpec((1, 1, tck), lambda n, j, k: (n, 0, k)),    # GN shift
        pl.BlockSpec((9, tck, tco), lambda n, j, k: (0, k, j)),  # conv weights
        pl.BlockSpec((1, 1, tco), lambda n, j, k: (0, 0, j)),    # conv bias
        pl.BlockSpec((1, A, tco), lambda n, j, k: (n, 0, j)),    # addend (time / residual)
    ]
    inputs = [x, scale, shift, w9,
              bias.reshape(1, 1, Cout).astype(jnp.float32), addend]

    out_shapes = [jax.ShapeDtypeStruct((N, HW, Cout), out_dtype)]
    out_specs = [pl.BlockSpec((1, HW, tco), lambda n, j, k: (n, 0, j))]
    scratch = [pltpu.VMEM((HWp, tck), jnp.bfloat16),       # padded activated tile
               pltpu.VMEM((HW, tco), jnp.float32)]         # conv accumulator

    if emit_stats:
        out_shapes.append(jax.ShapeDtypeStruct((N, 2, Cout), jnp.float32))
        out_specs.append(pl.BlockSpec((1, 2, tco), lambda n, j, k: (n, 0, j)))
    if compute_res:
        in_specs.append(pl.BlockSpec((tck, tco), lambda n, j, k: (k, j)))
        in_specs.append(pl.BlockSpec((1, 1, tco), lambda n, j, k: (0, 0, j)))
        inputs.append(wr)
        inputs.append(br.reshape(1, 1, Cout).astype(jnp.float32))
        out_shapes.append(jax.ShapeDtypeStruct((N, HW, Cout), jnp.bfloat16))
        out_specs.append(pl.BlockSpec((1, HW, tco), lambda n, j, k: (n, 0, j)))
        scratch.append(pltpu.VMEM((HW, tco), jnp.float32))

    results = pl.pallas_call(
        kernel,
        out_shape=out_shapes,
        grid=(N, nj, nk),
        in_specs=in_specs,
        out_specs=out_specs,
        scratch_shapes=scratch,
        compiler_params=pltpu.CompilerParams(
            dimension_semantics=("parallel", "parallel", "arbitrary"),
            vmem_limit_bytes=VMEM_LIMIT),
    )(*inputs)
    if not isinstance(results, (list, tuple)):
        results = (results,)
    return tuple(results)


# --------------------------------------------------------------------------
# Full forward pass.
# --------------------------------------------------------------------------
def unet_residual_block(feature_nchw, time, params):
    N, Cin, H, W = feature_nchw.shape
    Cout = params["conv_feature_w"].shape[0]
    HW = H * W

    # TODO(synk): NCHW<->NHWC transposes stay in plain JAX (pure layout plumbing).
    x_flat = jnp.transpose(feature_nchw, (0, 2, 3, 1)).reshape(N, HW, Cin)

    # GroupNorm(32) statistics of the input -> per-(batch, channel) affine
    stats1 = gn_stats(x_flat)
    scale1, shift1 = _gn_affine(stats1, params["gn1_gamma"], params["gn1_beta"], HW)

    # Time embedding: tiny (N, n_time) x (n_time, Cout) matmul in plain JAX;
    # its result is fused as a broadcast add inside the first conv kernel.
    t = time * jax.nn.sigmoid(time)
    tvec = (t @ params["linear_time_w"].T + params["linear_time_b"]).reshape(N, 1, Cout)

    # conv_feature weights -> (9, Cin, Cout) bf16 (tap-major)
    w1 = jnp.transpose(params["conv_feature_w"], (2, 3, 1, 0)).reshape(9, Cin, Cout)
    w1 = w1.astype(jnp.bfloat16)

    if Cin != Cout:
        wr = params["residual_w"].reshape(Cout, Cin).T.astype(jnp.bfloat16)
        merged, stats2, res_add = fused_gn_silu_conv(
            x_flat, scale1, shift1, w1, params["conv_feature_b"], tvec, H, W,
            emit_stats=True, wr=wr, br=params["residual_b"], out_dtype=jnp.bfloat16)
    else:
        merged, stats2 = fused_gn_silu_conv(
            x_flat, scale1, shift1, w1, params["conv_feature_b"], tvec, H, W,
            emit_stats=True, out_dtype=jnp.bfloat16)
        res_add = x_flat        # identity residual, added inside the second conv

    # GroupNorm 2 affine from the stats emitted by the first conv kernel
    scale2, shift2 = _gn_affine(stats2, params["gn2_gamma"], params["gn2_beta"], HW)

    w2 = jnp.transpose(params["conv_merged_w"], (2, 3, 1, 0)).reshape(9, Cout, Cout)
    w2 = w2.astype(jnp.bfloat16)

    (out_flat,) = fused_gn_silu_conv(
        merged, scale2, shift2, w2, params["conv_merged_b"], res_add, H, W,
        emit_stats=False, out_dtype=jnp.float32)

    return jnp.transpose(out_flat.reshape(N, H, W, Cout), (0, 3, 1, 2))


# --------------------------------------------------------------------------
# Pure-JAX f32 reference (correctness check only).
# --------------------------------------------------------------------------
def _silu(x):
    return x * jax.nn.sigmoid(x)


def reference(feature, time, params, Cin, Cout):
    def group_norm(x, gamma, beta):
        n, c, h, w = x.shape
        xr = x.reshape(n, GROUPS, (c // GROUPS) * h * w)
        mean = xr.mean(-1, keepdims=True)
        var = xr.var(-1, keepdims=True)
        xn = ((xr - mean) / jnp.sqrt(var + EPS)).reshape(n, c, h, w)
        return xn * gamma[None, :, None, None] + beta[None, :, None, None]

    def conv2d(x, w, b, pad):
        y = lax.conv_general_dilated(x, w, (1, 1), [(pad, pad), (pad, pad)],
                                     dimension_numbers=("NCHW", "OIHW", "NCHW"))
        return y + b[None, :, None, None]

    h = _silu(group_norm(feature, params["gn1_gamma"], params["gn1_beta"]))
    h = conv2d(h, params["conv_feature_w"], params["conv_feature_b"], 1)
    t = _silu(time) @ params["linear_time_w"].T + params["linear_time_b"]
    m = h + t[:, :, None, None]
    m = _silu(group_norm(m, params["gn2_gamma"], params["gn2_beta"]))
    m = conv2d(m, params["conv_merged_w"], params["conv_merged_b"], 1)
    if Cin == Cout:
        r = feature
    else:
        r = conv2d(feature, params["residual_w"], params["residual_b"], 0)
    return m + r


def _make_params(key, Cin, Cout, NT):
    ks = jax.random.split(key, 12)
    f32 = jnp.float32
    return {
        "gn1_gamma": 1.0 + 0.1 * jax.random.normal(ks[0], (Cin,), f32),
        "gn1_beta": 0.1 * jax.random.normal(ks[1], (Cin,), f32),
        "conv_feature_w": 0.05 * jax.random.normal(ks[2], (Cout, Cin, 3, 3), f32),
        "conv_feature_b": 0.05 * jax.random.normal(ks[3], (Cout,), f32),
        "linear_time_w": 0.05 * jax.random.normal(ks[4], (Cout, NT), f32),
        "linear_time_b": 0.05 * jax.random.normal(ks[5], (Cout,), f32),
        "gn2_gamma": 1.0 + 0.1 * jax.random.normal(ks[6], (Cout,), f32),
        "gn2_beta": 0.1 * jax.random.normal(ks[7], (Cout,), f32),
        "conv_merged_w": 0.05 * jax.random.normal(ks[8], (Cout, Cout, 3, 3), f32),
        "conv_merged_b": 0.05 * jax.random.normal(ks[9], (Cout,), f32),
        "residual_w": 0.05 * jax.random.normal(ks[10], (Cout, Cin, 1, 1), f32),
        "residual_b": 0.05 * jax.random.normal(ks[11], (Cout,), f32),
    }


if __name__ == "__main__":
    N, H, W, NT = 2, 8, 8, 128
    block = jax.jit(unet_residual_block)

    # exercise both the 1x1-residual path (Cin != Cout) and the identity path
    for Cin, Cout in [(64, 128), (64, 64)]:
        kp, kf, kt = jax.random.split(jax.random.PRNGKey(0), 3)
        params = _make_params(kp, Cin, Cout, NT)
        feature = jax.random.normal(kf, (N, Cin, H, W), jnp.float32)
        time = jax.random.normal(kt, (N, NT), jnp.float32)

        out = jax.block_until_ready(block(feature, time, params))
        ref = jax.block_until_ready(reference(feature, time, params, Cin, Cout))

        assert out.shape == (N, Cout, H, W)
        # tolerance sized for bf16 MXU inputs with f32 accumulation
        np.testing.assert_allclose(np.asarray(out), np.asarray(ref),
                                   rtol=3e-2, atol=3e-2)

    print("KERNEL_OK")
</pallas_src>

<mosaic_0001>
module attributes {stable_mosaic.version = 11 : i64} {
  func.func @_gn_stats_kernel(%arg0: i32, %arg1: i32, %arg2: memref<1x64x64xf32, #tpu.memory_space<vmem>>, %arg3: memref<1x2x64xf32, #tpu.memory_space<vmem>>) attributes {dimension_semantics = [#tpu.dimension_semantics<parallel>, #tpu.dimension_semantics<arbitrary>], iteration_bounds = array<i64: 2, 1>, scalar_prefetch = 0 : i64, scratch_operands = 0 : i64, tpu.core_type = #tpu.core_type<tc>, window_params = [{transform_indices = @transform_0, window_bounds = array<i64: 1, 64, 64>}, {transform_indices = @transform_1, window_bounds = array<i64: 1, 2, 64>}]} {
    %c0_i32 = arith.constant 0 : i32
    %0 = arith.cmpi eq, %arg1, %c0_i32 : i32
    %1 = arith.extui %0 : i1 to i32
    %c0_i32_0 = arith.constant 0 : i32
    %2 = arith.cmpi ne, %1, %c0_i32_0 : i32
    scf.if %2 {
      %cst_10 = arith.constant 0.000000e+00 : f32
      %17 = vector.broadcast %cst_10 : f32 to vector<1x2x64xf32>
      %c0_11 = arith.constant 0 : index
      %c0_12 = arith.constant 0 : index
      %c0_13 = arith.constant 0 : index
      %18 = vector.load %arg3[%c0_11, %c0_12, %c0_13] : memref<1x2x64xf32, #tpu.memory_space<vmem>>, vector<1x2x64xf32>
      tpu.vector_store %arg3[%c0_11, %c0_12, %c0_13], %17 {strides = array<i32>} : memref<1x2x64xf32, #tpu.memory_space<vmem>>, vector<1x2x64xf32>,
    } else {
    }
    %c0 = arith.constant 0 : index
    %c0_1 = arith.constant 0 : index
    %c0_2 = arith.constant 0 : index
    %3 = vector.load %arg2[%c0, %c0_1, %c0_2] : memref<1x64x64xf32, #tpu.memory_space<vmem>>, vector<1x64x64xf32>
    %4 = vector.shape_cast %3 : vector<1x64x64xf32> to vector<64x64xf32>
    %cst = arith.constant dense<0.000000e+00> : vector<64xf32>
    %5 = vector.multi_reduction <add>, %4, %cst [0] : vector<64x64xf32> to vector<64xf32>
    %6 = vector.shape_cast %5 : vector<64xf32> to vector<1x64xf32>
    %7 = arith.mulf %4, %4 : vector<64x64xf32>
    %cst_3 = arith.constant dense<0.000000e+00> : vector<64xf32>
    %8 = vector.multi_reduction <add>, %7, %cst_3 [0] : vector<64x64xf32> to vector<64xf32>
    %9 = vector.shape_cast %8 : vector<64xf32> to vector<1x64xf32>
    %c0_4 = arith.constant 0 : index
    %c0_5 = arith.constant 0 : index
    %c0_6 = arith.constant 0 : index
    %10 = vector.load %arg3[%c0_4, %c0_5, %c0_6] : memref<1x2x64xf32, #tpu.memory_space<vmem>>, vector<1x2x64xf32>
    %11 = vector.shape_cast %10 : vector<1x2x64xf32> to vector<2x64xf32>
    %12 = tpu.concatenate %6, %9 in 0 : vector<1x64xf32>, vector<1x64xf32> -> vector<2x64xf32>
    %13 = arith.addf %11, %12 : vector<2x64xf32>
    %c0_7 = arith.constant 0 : index
    %c0_8 = arith.constant 0 : index
    %c0_9 = arith.constant 0 : index
    %14 = vector.load %arg3[%c0_7, %c0_8, %c0_9] : memref<1x2x64xf32, #tpu.memory_space<vmem>>, vector<1x2x64xf32>
    %15 = vector.shape_cast %14 : vector<1x2x64xf32> to vector<2x64xf32>
    %16 = vector.shape_cast %13 : vector<2x64xf32> to vector<1x2x64xf32>
    tpu.vector_store %arg3[%c0_7, %c0_8, %c0_9], %16 {strides = array<i32>} : memref<1x2x64xf32, #tpu.memory_space<vmem>>, vector<1x2x64xf32>,
    return
  }
  func.func @transform_0(%arg0: i32, %arg1: i32) -> (i32, i32, i32) {
    %c0_i32 = arith.constant 0 : i32
    %c0_i32_0 = arith.constant 0 : i32
    return %arg0, %arg1, %c0_i32 : i32, i32, i32
  }
  func.func @transform_1(%arg0: i32, %arg1: i32) -> (i32, i32, i32) {
    %c0_i32 = arith.constant 0 : i32
    %c0_i32_0 = arith.constant 0 : i32
    %c0_i32_1 = arith.constant 0 : i32
    return %arg0, %c0_i32, %c0_i32_0 : i32, i32, i32
  }
}

module attributes {stable_mosaic.version = 11 : i64} {
  func.func @kernel(%arg0: i32, %arg1: i32, %arg2: i32, %arg3: memref<1x64x64xf32, #tpu.memory_space<vmem>>, %arg4: memref<1x1x64xf32, #tpu.memory_space<vmem>>, %arg5: memref<1x1x64xf32, #tpu.memory_space<vmem>>, %arg6: memref<9x64x128xbf16, #tpu.memory_space<vmem>>, %arg7: memref<1x1x128xf32, #tpu.memory_space<vmem>>, %arg8: memref<1x1x128xf32, #tpu.memory_space<vmem>>, %arg9: memref<64x128xbf16, #tpu.memory_space<vmem>>, %arg10: memref<1x1x128xf32, #tpu.memory_space<vmem>>, %arg11: memref<1x64x128xbf16, #tpu.memory_space<vmem>>, %arg12: memref<1x2x128xf32, #tpu.memory_space<vmem>>, %arg13: memref<1x64x128xbf16, #tpu.memory_space<vmem>>, %arg14: memref<96x64xbf16, #tpu.memory_space<vmem>>, %arg15: memref<64x128xf32, #tpu.memory_space<vmem>>, %arg16: memref<64x128xf32, #tpu.memory_space<vmem>>) attributes {dimension_semantics = [#tpu.dimension_semantics<parallel>, #tpu.dimension_semantics<parallel>, #tpu.dimension_semantics<arbitrary>], iteration_bounds = array<i64: 2, 1, 1>, scalar_prefetch = 0 : i64, scratch_operands = 3 : i64, tpu.core_type = #tpu.core_type<tc>, window_params = [{transform_indices = @transform_0, window_bounds = array<i64: 1, 64, 64>}, {transform_indices = @transform_1, window_bounds = array<i64: 1, 1, 64>}, {transform_indices = @transform_2, window_bounds = array<i64: 1, 1, 64>}, {transform_indices = @transform_3, window_bounds = array<i64: 9, 64, 128>}, {transform_indices = @transform_4, window_bounds = array<i64: 1, 1, 128>}, {transform_indices = @transform_5, window_bounds = array<i64: 1, 1, 128>}, {transform_indices = @transform_6, window_bounds = array<i64: 64, 128>}, {transform_indices = @transform_7, window_bounds = array<i64: 1, 1, 128>}, {transform_indices = @transform_8, window_bounds = array<i64: 1, 64, 128>}, {transform_indices = @transform_9, window_bounds = array<i64: 1, 2, 128>}, {transform_indices = @transform_10, window_bounds = array<i64: 1, 64, 128>}]} {
    %c0 = arith.constant 0 : index
    %c0_0 = arith.constant 0 : index
    %c0_1 = arith.constant 0 : index
    %0 = vector.load %arg3[%c0, %c0_0, %c0_1] : memref<1x64x64xf32, #tpu.memory_space<vmem>>, vector<1x64x64xf32>
    %1 = vector.shape_cast %0 : vector<1x64x64xf32> to vector<64x64xf32>
    %c0_2 = arith.constant 0 : index
    %c0_3 = arith.constant 0 : index
    %c0_4 = arith.constant 0 : index
    %2 = vector.load %arg4[%c0_2, %c0_3, %c0_4] : memref<1x1x64xf32, #tpu.memory_space<vmem>>, vector<1x1x64xf32>
    %3 = vector.shape_cast %2 : vector<1x1x64xf32> to vector<1x64xf32>
    %4 = vector.broadcast %3 : vector<1x64xf32> to vector<64x64xf32>
    %5 = arith.mulf %1, %4 : vector<64x64xf32>
    %c0_5 = arith.constant 0 : index
    %c0_6 = arith.constant 0 : index
    %c0_7 = arith.constant 0 : index
    %6 = vector.load %arg5[%c0_5, %c0_6, %c0_7] : memref<1x1x64xf32, #tpu.memory_space<vmem>>, vector<1x1x64xf32>
    %7 = vector.shape_cast %6 : vector<1x1x64xf32> to vector<1x64xf32>
    %8 = vector.broadcast %7 : vector<1x64xf32> to vector<64x64xf32>
    %9 = arith.addf %5, %8 : vector<64x64xf32>
    %10 = arith.negf %9 : vector<64x64xf32>
    %11 = math.exp %10 : vector<64x64xf32>
    %cst = arith.constant 1.000000e+00 : f32
    %12 = vector.broadcast %cst : f32 to vector<64x64xf32>
    %13 = arith.addf %12, %11 : vector<64x64xf32>
    %14 = arith.divf %12, %13 : vector<64x64xf32>
    %15 = arith.mulf %9, %14 : vector<64x64xf32>
    %16 = arith.truncf %15 : vector<64x64xf32> to vector<64x64xbf16>
    %cst_8 = arith.constant 0.000000e+00 : bf16
    %17 = vector.broadcast %cst_8 : bf16 to vector<16x64xbf16>
    %c0_9 = arith.constant 0 : index
    %c0_10 = arith.constant 0 : index
    %18 = vector.load %arg14[%c0_9, %c0_10] : memref<96x64xbf16, #tpu.memory_space<vmem>>, vector<16x64xbf16>
    tpu.vector_store %arg14[%c0_9, %c0_10], %17 {strides = array<i32>} : memref<96x64xbf16, #tpu.memory_space<vmem>>, vector<16x64xbf16>,
    %c80 = arith.constant 80 : index
    %c0_11 = arith.constant 0 : index
    %19 = vector.load %arg14[%c80, %c0_11] : memref<96x64xbf16, #tpu.memory_space<vmem>>, vector<16x64xbf16>
    tpu.vector_store %arg14[%c80, %c0_11], %17 {strides = array<i32>} : memref<96x64xbf16, #tpu.memory_space<vmem>>, vector<16x64xbf16>,
    %c16 = arith.constant 16 : index
    %c0_12 = arith.constant 0 : index
    %20 = vector.load %arg14[%c16, %c0_12] : memref<96x64xbf16, #tpu.memory_space<vmem>>, vector<64x64xbf16>
    tpu.vector_store %arg14[%c16, %c0_12], %16 {strides = array<i32>} : memref<96x64xbf16, #tpu.memory_space<vmem>>, vector<64x64xbf16>,
    %c0_i32 = arith.constant 0 : i32
    %21 = arith.cmpi eq, %arg2, %c0_i32 : i32
    %22 = arith.extui %21 : i1 to i32
    %c0_i32_13 = arith.constant 0 : i32
    %23 = arith.cmpi ne, %22, %c0_i32_13 : i32
    scf.if %23 {
      %cst_110 = arith.constant 0.000000e+00 : f32
      %147 = vector.broadcast %cst_110 : f32 to vector<64x128xf32>
      %c0_111 = arith.constant 0 : index
      %c0_112 = arith.constant 0 : index
      %148 = vector.load %arg15[%c0_111, %c0_112] : memref<64x128xf32, #tpu.memory_space<vmem>>, vector<64x128xf32>
      tpu.vector_store %arg15[%c0_111, %c0_112], %147 {strides = array<i32>} : memref<64x128xf32, #tpu.memory_space<vmem>>, vector<64x128xf32>,
      %cst_113 = arith.constant 0.000000e+00 : f32
      %149 = vector.broadcast %cst_113 : f32 to vector<64x128xf32>
      %c0_114 = arith.constant 0 : index
      %c0_115 = arith.constant 0 : index
      %150 = vector.load %arg16[%c0_114, %c0_115] : memref<64x128xf32, #tpu.memory_space<vmem>>, vector<64x128xf32>
      tpu.vector_store %arg16[%c0_114, %c0_115], %149 {strides = array<i32>} : memref<64x128xf32, #tpu.memory_space<vmem>>, vector<64x128xf32>,
    } else {
    }
    %24 = tpu.iota {dimensions = array<i32: 0>} : vector<64x1xi32>
    %c8_i32 = arith.constant 8 : i32
    %c0_i32_14 = arith.constant 0 : i32
    %25 = arith.cmpi eq, %c8_i32, %c0_i32_14 : i32
    %c1_i32 = arith.constant 1 : i32
    %26 = arith.select %25, %c1_i32, %c8_i32 : i32
    %27 = vector.broadcast %26 : i32 to vector<64x1xi32>
    %28 = arith.remsi %24, %27 : vector<64x1xi32>
    %c0_i32_15 = arith.constant 0 : i32
    %29 = vector.broadcast %c0_i32_15 : i32 to vector<64x1xi32>
    %30 = arith.cmpi ne, %28, %29 : vector<64x1xi32>
    %c0_i32_16 = arith.constant 0 : i32
    %31 = vector.broadcast %c0_i32_16 : i32 to vector<64x1xi32>
    %32 = arith.cmpi slt, %28, %31 : vector<64x1xi32>
    %c0_i32_17 = arith.constant 0 : i32
    %33 = arith.cmpi slt, %26, %c0_i32_17 : i32
    %34 = vector.broadcast %33 : i1 to vector<64x1xi1>
    %35 = vector.broadcast %34 : vector<64x1xi1> to vector<64x1xi1>
    %36 = arith.xori %32, %35 : vector<64x1xi1>
    %37 = arith.andi %36, %30 : vector<64x1xi1>
    %38 = vector.broadcast %26 : i32 to vector<64x1xi32>
    %39 = arith.addi %28, %38 : vector<64x1xi32>
    %40 = arith.select %37, %39, %28 : vector<64x1xi1>, vector<64x1xi32>
    %c0_i32_18 = arith.constant 0 : i32
    %41 = vector.broadcast %c0_i32_18 : i32 to vector<64x1xi32>
    %42 = arith.cmpi ne, %40, %41 : vector<64x1xi32>
    %c7_i32 = arith.constant 7 : i32
    %43 = vector.broadcast %c7_i32 : i32 to vector<64x1xi32>
    %44 = arith.cmpi ne, %40, %43 : vector<64x1xi32>
    %c7 = arith.constant 7 : index
    %c0_19 = arith.constant 0 : index
    %45 = vector.load %arg14[%c7, %c0_19] : memref<96x64xbf16, #tpu.memory_space<vmem>>, vector<64x64xbf16>
    %c0_i32_20 = arith.constant 0 : i32
    %46 = arith.sitofp %c0_i32_20 : i32 to bf16
    %47 = vector.shape_cast %42 : vector<64x1xi1> to vector<64x1xi1>
    %48 = vector.broadcast %47 : vector<64x1xi1> to vector<64x64xi1>
    %49 = vector.broadcast %46 : bf16 to vector<64x64xbf16>
    %50 = arith.select %48, %45, %49 : vector<64x64xi1>, vector<64x64xbf16>
    %c0_21 = arith.constant 0 : index
    %c0_22 = arith.constant 0 : index
    %51 = vector.load %arg15[%c0_21, %c0_22] : memref<64x128xf32, #tpu.memory_space<vmem>>, vector<64x128xf32>
    %c0_23 = arith.constant 0 : index
    %c0_24 = arith.constant 0 : index
    %c0_25 = arith.constant 0 : index
    %52 = vector.load %arg6[%c0_23, %c0_24, %c0_25] : memref<9x64x128xbf16, #tpu.memory_space<vmem>>, vector<1x64x128xbf16>
    %53 = vector.shape_cast %52 : vector<1x64x128xbf16> to vector<64x128xbf16>
    %cst_26 = arith.constant dense<0.000000e+00> : vector<64x128xf32>
    %54 = tpu.matmul %50, %53, %cst_26 {dimension_numbers = #tpu.dot_dimension_numbers<[1], [0], [0], [1], [0, 0, 1, 1], [], []>} : vector<64x64xbf16>, vector<64x128xbf16>, vector<64x128xf32> -> vector<64x128xf32>
    %55 = arith.addf %51, %54 : vector<64x128xf32>
    %c0_27 = arith.constant 0 : index
    %c0_28 = arith.constant 0 : index
    %56 = vector.load %arg15[%c0_27, %c0_28] : memref<64x128xf32, #tpu.memory_space<vmem>>, vector<64x128xf32>
    tpu.vector_store %arg15[%c0_27, %c0_28], %55 {strides = array<i32>} : memref<64x128xf32, #tpu.memory_space<vmem>>, vector<64x128xf32>,
    %c8 = arith.constant 8 : index
    %c0_29 = arith.constant 0 : index
    %57 = vector.load %arg14[%c8, %c0_29] : memref<96x64xbf16, #tpu.memory_space<vmem>>, vector<64x64xbf16>
    %c0_30 = arith.constant 0 : index
    %c0_31 = arith.constant 0 : index
    %58 = vector.load %arg15[%c0_30, %c0_31] : memref<64x128xf32, #tpu.memory_space<vmem>>, vector<64x128xf32>
    %c1 = arith.constant 1 : index
    %c0_32 = arith.constant 0 : index
    %c0_33 = arith.constant 0 : index
    %59 = vector.load %arg6[%c1, %c0_32, %c0_33] : memref<9x64x128xbf16, #tpu.memory_space<vmem>>, vector<1x64x128xbf16>
    %60 = vector.shape_cast %59 : vector<1x64x128xbf16> to vector<64x128xbf16>
    %cst_34 = arith.constant dense<0.000000e+00> : vector<64x128xf32>
    %61 = tpu.matmul %57, %60, %cst_34 {dimension_numbers = #tpu.dot_dimension_numbers<[1], [0], [0], [1], [0, 0, 1, 1], [], []>} : vector<64x64xbf16>, vector<64x128xbf16>, vector<64x128xf32> -> vector<64x128xf32>
    %62 = arith.addf %58, %61 : vector<64x128xf32>
    %c0_35 = arith.constant 0 : index
    %c0_36 = arith.constant 0 : index
    %63 = vector.load %arg15[%c0_35, %c0_36] : memref<64x128xf32, #tpu.memory_space<vmem>>, vector<64x128xf32>
    tpu.vector_store %arg15[%c0_35, %c0_36], %62 {strides = array<i32>} : memref<64x128xf32, #tpu.memory_space<vmem>>, vector<64x128xf32>,
    %c9 = arith.constant 9 : index
    %c0_37 = arith.constant 0 : index
    %64 = vector.load %arg14[%c9, %c0_37] : memref<96x64xbf16, #tpu.memory_space<vmem>>, vector<64x64xbf16>
    %c0_i32_38 = arith.constant 0 : i32
    %65 = arith.sitofp %c0_i32_38 : i32 to bf16
    %66 = vector.shape_cast %44 : vector<64x1xi1> to vector<64x1xi1>
    %67 = vector.broadcast %66 : vector<64x1xi1> to vector<64x64xi1>
    %68 = vector.broadcast %65 : bf16 to vector<64x64xbf16>
    %69 = arith.select %67, %64, %68 : vector<64x64xi1>, vector<64x64xbf16>
    %c0_39 = arith.constant 0 : index
    %c0_40 = arith.constant 0 : index
    %70 = vector.load %arg15[%c0_39, %c0_40] : memref<64x128xf32, #tpu.memory_space<vmem>>, vector<64x128xf32>
    %c2 = arith.constant 2 : index
    %c0_41 = arith.constant 0 : index
    %c0_42 = arith.constant 0 : index
    %71 = vector.load %arg6[%c2, %c0_41, %c0_42] : memref<9x64x128xbf16, #tpu.memory_space<vmem>>, vector<1x64x128xbf16>
    %72 = vector.shape_cast %71 : vector<1x64x128xbf16> to vector<64x128xbf16>
    %cst_43 = arith.constant dense<0.000000e+00> : vector<64x128xf32>
    %73 = tpu.matmul %69, %72, %cst_43 {dimension_numbers = #tpu.dot_dimension_numbers<[1], [0], [0], [1], [0, 0, 1, 1], [], []>} : vector<64x64xbf16>, vector<64x128xbf16>, vector<64x128xf32> -> vector<64x128xf32>
    %74 = arith.addf %70, %73 : vector<64x128xf32>
    %c0_44 = arith.constant 0 : index
    %c0_45 = arith.constant 0 : index
    %75 = vector.load %arg15[%c0_44, %c0_45] : memref<64x128xf32, #tpu.memory_space<vmem>>, vector<64x128xf32>
    tpu.vector_store %arg15[%c0_44, %c0_45], %74 {strides = array<i32>} : memref<64x128xf32, #tpu.memory_space<vmem>>, vector<64x128xf32>,
    %c15 = arith.constant 15 : index
    %c0_46 = arith.constant 0 : index
    %76 = vector.load %arg14[%c15, %c0_46] : memref<96x64xbf16, #tpu.memory_space<vmem>>, vector<64x64xbf16>
    %c0_i32_47 = arith.constant 0 : i32
    %77 = arith.sitofp %c0_i32_47 : i32 to bf16
    %78 = vector.shape_cast %42 : vector<64x1xi1> to vector<64x1xi1>
    %79 = vector.broadcast %78 : vector<64x1xi1> to vector<64x64xi1>
    %80 = vector.broadcast %77 : bf16 to vector<64x64xbf16>
    %81 = arith.select %79, %76, %80 : vector<64x64xi1>, vector<64x64xbf16>
    %c0_48 = arith.constant 0 : index
    %c0_49 = arith.constant 0 : index
    %82 = vector.load %arg15[%c0_48, %c0_49] : memref<64x128xf32, #tpu.memory_space<vmem>>, vector<64x128xf32>
    %c3 = arith.constant 3 : index
    %c0_50 = arith.constant 0 : index
    %c0_51 = arith.constant 0 : index
    %83 = vector.load %arg6[%c3, %c0_50, %c0_51] : memref<9x64x128xbf16, #tpu.memory_space<vmem>>, vector<1x64x128xbf16>
    %84 = vector.shape_cast %83 : vector<1x64x128xbf16> to vector<64x128xbf16>
    %cst_52 = arith.constant dense<0.000000e+00> : vector<64x128xf32>
    %85 = tpu.matmul %81, %84, %cst_52 {dimension_numbers = #tpu.dot_dimension_numbers<[1], [0], [0], [1], [0, 0, 1, 1], [], []>} : vector<64x64xbf16>, vector<64x128xbf16>, vector<64x128xf32> -> vector<64x128xf32>
    %86 = arith.addf %82, %85 : vector<64x128xf32>
    %c0_53 = arith.constant 0 : index
    %c0_54 = arith.constant 0 : index
    %87 = vector.load %arg15[%c0_53, %c0_54] : memref<64x128xf32, #tpu.memory_space<vmem>>, vector<64x128xf32>
    tpu.vector_store %arg15[%c0_53, %c0_54], %86 {strides = array<i32>} : memref<64x128xf32, #tpu.memory_space<vmem>>, vector<64x128xf32>,
    %c16_55 = arith.constant 16 : index
    %c0_56 = arith.constant 0 : index
    %88 = vector.load %arg14[%c16_55, %c0_56] : memref<96x64xbf16, #tpu.memory_space<vmem>>, vector<64x64xbf16>
    %c0_57 = arith.constant 0 : index
    %c0_58 = arith.constant 0 : index
    %89 = vector.load %arg15[%c0_57, %c0_58] : memref<64x128xf32, #tpu.memory_space<vmem>>, vector<64x128xf32>
    %c4 = arith.constant 4 : index
    %c0_59 = arith.constant 0 : index
    %c0_60 = arith.constant 0 : index
    %90 = vector.load %arg6[%c4, %c0_59, %c0_60] : memref<9x64x128xbf16, #tpu.memory_space<vmem>>, vector<1x64x128xbf16>
    %91 = vector.shape_cast %90 : vector<1x64x128xbf16> to vector<64x128xbf16>
    %cst_61 = arith.constant dense<0.000000e+00> : vector<64x128xf32>
    %92 = tpu.matmul %88, %91, %cst_61 {dimension_numbers = #tpu.dot_dimension_numbers<[1], [0], [0], [1], [0, 0, 1, 1], [], []>} : vector<64x64xbf16>, vector<64x128xbf16>, vector<64x128xf32> -> vector<64x128xf32>
    %93 = arith.addf %89, %92 : vector<64x128xf32>
    %c0_62 = arith.constant 0 : index
    %c0_63 = arith.constant 0 : index
    %94 = vector.load %arg15[%c0_62, %c0_63] : memref<64x128xf32, #tpu.memory_space<vmem>>, vector<64x128xf32>
    tpu.vector_store %arg15[%c0_62, %c0_63], %93 {strides = array<i32>} : memref<64x128xf32, #tpu.memory_space<vmem>>, vector<64x128xf32>,
    %c17 = arith.constant 17 : index
    %c0_64 = arith.constant 0 : index
    %95 = vector.load %arg14[%c17, %c0_64] : memref<96x64xbf16, #tpu.memory_space<vmem>>, vector<64x64xbf16>
    %c0_i32_65 = arith.constant 0 : i32
    %96 = arith.sitofp %c0_i32_65 : i32 to bf16
    %97 = vector.shape_cast %44 : vector<64x1xi1> to vector<64x1xi1>
    %98 = vector.broadcast %97 : vector<64x1xi1> to vector<64x64xi1>
    %99 = vector.broadcast %96 : bf16 to vector<64x64xbf16>
    %100 = arith.select %98, %95, %99 : vector<64x64xi1>, vector<64x64xbf16>
    %c0_66 = arith.constant 0 : index
    %c0_67 = arith.constant 0 : index
    %101 = vector.load %arg15[%c0_66, %c0_67] : memref<64x128xf32, #tpu.memory_space<vmem>>, vector<64x128xf32>
    %c5 = arith.constant 5 : index
    %c0_68 = arith.constant 0 : index
    %c0_69 = arith.constant 0 : index
    %102 = vector.load %arg6[%c5, %c0_68, %c0_69] : memref<9x64x128xbf16, #tpu.memory_space<vmem>>, vector<1x64x128xbf16>
    %103 = vector.shape_cast %102 : vector<1x64x128xbf16> to vector<64x128xbf16>
    %cst_70 = arith.constant dense<0.000000e+00> : vector<64x128xf32>
    %104 = tpu.matmul %100, %103, %cst_70 {dimension_numbers = #tpu.dot_dimension_numbers<[1], [0], [0], [1], [0, 0, 1, 1], [], []>} : vector<64x64xbf16>, vector<64x128xbf16>, vector<64x128xf32> -> vector<64x128xf32>
    %105 = arith.addf %101, %104 : vector<64x128xf32>
    %c0_71 = arith.constant 0 : index
    %c0_72 = arith.constant 0 : index
    %106 = vector.load %arg15[%c0_71, %c0_72] : memref<64x128xf32, #tpu.memory_space<vmem>>, vector<64x128xf32>
    tpu.vector_store %arg15[%c0_71, %c0_72], %105 {strides = array<i32>} : memref<64x128xf32, #tpu.memory_space<vmem>>, vector<64x128xf32>,
    %c23 = arith.constant 23 : index
    %c0_73 = arith.constant 0 : index
    %107 = vector.load %arg14[%c23, %c0_73] : memref<96x64xbf16, #tpu.memory_space<vmem>>, vector<64x64xbf16>
    %c0_i32_74 = arith.constant 0 : i32
    %108 = arith.sitofp %c0_i32_74 : i32 to bf16
    %109 = vector.shape_cast %42 : vector<64x1xi1> to vector<64x1xi1>
    %110 = vector.broadcast %109 : vector<64x1xi1> to vector<64x64xi1>
    %111 = vector.broadcast %108 : bf16 to vector<64x64xbf16>
    %112 = arith.select %110, %107, %111 : vector<64x64xi1>, vector<64x64xbf16>
    %c0_75 = arith.constant 0 : index
    %c0_76 = arith.constant 0 : index
    %113 = vector.load %arg15[%c0_75, %c0_76] : memref<64x128xf32, #tpu.memory_space<vmem>>, vector<64x128xf32>
    %c6 = arith.constant 6 : index
    %c0_77 = arith.constant 0 : index
    %c0_78 = arith.constant 0 : index
    %114 = vector.load %arg6[%c6, %c0_77, %c0_78] : memref<9x64x128xbf16, #tpu.memory_space<vmem>>, vector<1x64x128xbf16>
    %115 = vector.shape_cast %114 : vector<1x64x128xbf16> to vector<64x128xbf16>
    %cst_79 = arith.constant dense<0.000000e+00> : vector<64x128xf32>
    %116 = tpu.matmul %112, %115, %cst_79 {dimension_numbers = #tpu.dot_dimension_numbers<[1], [0], [0], [1], [0, 0, 1, 1], [], []>} : vector<64x64xbf16>, vector<64x128xbf16>, vector<64x128xf32> -> vector<64x128xf32>
    %117 = arith.addf %113, %116 : vector<64x128xf32>
    %c0_80 = arith.constant 0 : index
    %c0_81 = arith.constant 0 : index
    %118 = vector.load %arg15[%c0_80, %c0_81] : memref<64x128xf32, #tpu.memory_space<vmem>>, vector<64x128xf32>
    tpu.vector_store %arg15[%c0_80, %c0_81], %117 {strides = array<i32>} : memref<64x128xf32, #tpu.memory_space<vmem>>, vector<64x128xf32>,
    %c24 = arith.constant 24 : index
    %c0_82 = arith.constant 0 : index
    %119 = vector.load %arg14[%c24, %c0_82] : memref<96x64xbf16, #tpu.memory_space<vmem>>, vector<64x64xbf16>
    %c0_83 = arith.constant 0 : index
    %c0_84 = arith.constant 0 : index
    %120 = vector.load %arg15[%c0_83, %c0_84] : memref<64x128xf32, #tpu.memory_space<vmem>>, vector<64x128xf32>
    %c7_85 = arith.constant 7 : index
    %c0_86 = arith.constant 0 : index
    %c0_87 = arith.constant 0 : index
    %121 = vector.load %arg6[%c7_85, %c0_86, %c0_87] : memref<9x64x128xbf16, #tpu.memory_space<vmem>>, vector<1x64x128xbf16>
    %122 = vector.shape_cast %121 : vector<1x64x128xbf16> to vector<64x128xbf16>
    %cst_88 = arith.constant dense<0.000000e+00> : vector<64x128xf32>
    %123 = tpu.matmul %119, %122, %cst_88 {dimension_numbers = #tpu.dot_dimension_numbers<[1], [0], [0], [1], [0, 0, 1, 1], [], []>} : vector<64x64xbf16>, vector<64x128xbf16>, vector<64x128xf32> -> vector<64x128xf32>
    %124 = arith.addf %120, %123 : vector<64x128xf32>
    %c0_89 = arith.constant 0 : index
    %c0_90 = arith.constant 0 : index
    %125 = vector.load %arg15[%c0_89, %c0_90] : memref<64x128xf32, #tpu.memory_space<vmem>>, vector<64x128xf32>
    tpu.vector_store %arg15[%c0_89, %c0_90], %124 {strides = array<i32>} : memref<64x128xf32, #tpu.memory_space<vmem>>, vector<64x128xf32>,
    %c25 = arith.constant 25 : index
    %c0_91 = arith.constant 0 : index
    %126 = vector.load %arg14[%c25, %c0_91] : memref<96x64xbf16, #tpu.memory_space<vmem>>, vector<64x64xbf16>
    %c0_i32_92 = arith.constant 0 : i32
    %127 = arith.sitofp %c0_i32_92 : i32 to bf16
    %128 = vector.shape_cast %44 : vector<64x1xi1> to vector<64x1xi1>
    %129 = vector.broadcast %128 : vector<64x1xi1> to vector<64x64xi1>
    %130 = vector.broadcast %127 : bf16 to vector<64x64xbf16>
    %131 = arith.select %129, %126, %130 : vector<64x64xi1>, vector<64x64xbf16>
    %c0_93 = arith.constant 0 : index
    %c0_94 = arith.constant 0 : index
    %132 = vector.load %arg15[%c0_93, %c0_94] : memref<64x128xf32, #tpu.memory_space<vmem>>, vector<64x128xf32>
    %c8_95 = arith.constant 8 : index
    %c0_96 = arith.constant 0 : index
    %c0_97 = arith.constant 0 : index
    %133 = vector.load %arg6[%c8_95, %c0_96, %c0_97] : memref<9x64x128xbf16, #tpu.memory_space<vmem>>, vector<1x64x128xbf16>
    %134 = vector.shape_cast %133 : vector<1x64x128xbf16> to vector<64x128xbf16>
    %cst_98 = arith.constant dense<0.000000e+00> : vector<64x128xf32>
    %135 = tpu.matmul %131, %134, %cst_98 {dimension_numbers = #tpu.dot_dimension_numbers<[1], [0], [0], [1], [0, 0, 1, 1], [], []>} : vector<64x64xbf16>, vector<64x128xbf16>, vector<64x128xf32> -> vector<64x128xf32>
    %136 = arith.addf %132, %135 : vector<64x128xf32>
    %c0_99 = arith.constant 0 : index
    %c0_100 = arith.constant 0 : index
    %137 = vector.load %arg15[%c0_99, %c0_100] : memref<64x128xf32, #tpu.memory_space<vmem>>, vector<64x128xf32>
    tpu.vector_store %arg15[%c0_99, %c0_100], %136 {strides = array<i32>} : memref<64x128xf32, #tpu.memory_space<vmem>>, vector<64x128xf32>,
    %c0_101 = arith.constant 0 : index
    %c0_102 = arith.constant 0 : index
    %138 = vector.load %arg16[%c0_101, %c0_102] : memref<64x128xf32, #tpu.memory_space<vmem>>, vector<64x128xf32>
    %139 = arith.truncf %1 : vector<64x64xf32> to vector<64x64xbf16>
    %c0_103 = arith.constant 0 : index
    %c0_104 = arith.constant 0 : index
    %140 = vector.load %arg9[%c0_103, %c0_104] : memref<64x128xbf16, #tpu.memory_space<vmem>>, vector<64x128xbf16>
    %cst_105 = arith.constant dense<0.000000e+00> : vector<64x128xf32>
    %141 = tpu.matmul %139, %140, %cst_105 {dimension_numbers = #tpu.dot_dimension_numbers<[1], [0], [0], [1], [0, 0, 1, 1], [], []>} : vector<64x64xbf16>, vector<64x128xbf16>, vector<64x128xf32> -> vector<64x128xf32>
    %142 = arith.addf %138, %141 : vector<64x128xf32>
    %c0_106 = arith.constant 0 : index
    %c0_107 = arith.constant 0 : index
    %143 = vector.load %arg16[%c0_106, %c0_107] : memref<64x128xf32, #tpu.memory_space<vmem>>, vector<64x128xf32>
    tpu.vector_store %arg16[%c0_106, %c0_107], %142 {strides = array<i32>} : memref<64x128xf32, #tpu.memory_space<vmem>>, vector<64x128xf32>,
    %c0_i32_108 = arith.constant 0 : i32
    %144 = arith.cmpi eq, %arg2, %c0_i32_108 : i32
    %145 = arith.extui %144 : i1 to i32
    %c0_i32_109 = arith.constant 0 : i32
    %146 = arith.cmpi ne, %145, %c0_i32_109 : i32
    scf.if %146 {
      %c0_110 = arith.constant 0 : index
      %c0_111 = arith.constant 0 : index
      %147 = vector.load %arg15[%c0_110, %c0_111] : memref<64x128xf32, #tpu.memory_space<vmem>>, vector<64x128xf32>
      %c0_112 = arith.constant 0 : index
      %c0_113 = arith.constant 0 : index
      %c0_114 = arith.constant 0 : index
      %148 = vector.load %arg7[%c0_112, %c0_113, %c0_114] : memref<1x1x128xf32, #tpu.memory_space<vmem>>, vector<1x1x128xf32>
      %149 = vector.shape_cast %148 : vector<1x1x128xf32> to vector<1x128xf32>
      %150 = vector.broadcast %149 : vector<1x128xf32> to vector<64x128xf32>
      %151 = arith.addf %147, %150 : vector<64x128xf32>
      %c0_115 = arith.constant 0 : index
      %c0_116 = arith.constant 0 : index
      %c0_117 = arith.constant 0 : index
      %152 = vector.load %arg8[%c0_115, %c0_116, %c0_117] : memref<1x1x128xf32, #tpu.memory_space<vmem>>, vector<1x1x128xf32>
      %153 = vector.shape_cast %152 : vector<1x1x128xf32> to vector<1x128xf32>
      %154 = vector.broadcast %153 : vector<1x128xf32> to vector<64x128xf32>
      %155 = arith.addf %151, %154 : vector<64x128xf32>
      %156 = arith.truncf %155 : vector<64x128xf32> to vector<64x128xbf16>
      %c0_118 = arith.constant 0 : index
      %c0_119 = arith.constant 0 : index
      %c0_120 = arith.constant 0 : index
      %157 = vector.load %arg11[%c0_118, %c0_119, %c0_120] : memref<1x64x128xbf16, #tpu.memory_space<vmem>>, vector<1x64x128xbf16>
      %158 = vector.shape_cast %157 : vector<1x64x128xbf16> to vector<64x128xbf16>
      %159 = vector.shape_cast %156 : vector<64x128xbf16> to vector<1x64x128xbf16>
      tpu.vector_store %arg11[%c0_118, %c0_119, %c0_120], %159 {strides = array<i32>} : memref<1x64x128xbf16, #tpu.memory_space<vmem>>, vector<1x64x128xbf16>,
      %cst_121 = arith.constant dense<0.000000e+00> : vector<128xf32>
      %160 = vector.multi_reduction <add>, %155, %cst_121 [0] : vector<64x128xf32> to vector<128xf32>
      %161 = vector.shape_cast %160 : vector<128xf32> to vector<1x128xf32>
      %162 = arith.mulf %155, %155 : vector<64x128xf32>
      %cst_122 = arith.constant dense<0.000000e+00> : vector<128xf32>
      %163 = vector.multi_reduction <add>, %162, %cst_122 [0] : vector<64x128xf32> to vector<128xf32>
      %164 = vector.shape_cast %163 : vector<128xf32> to vector<1x128xf32>
      %165 = tpu.concatenate %161, %164 in 0 : vector<1x128xf32>, vector<1x128xf32> -> vector<2x128xf32>
      %c0_123 = arith.constant 0 : index
      %c0_124 = arith.constant 0 : index
      %c0_125 = arith.constant 0 : index
      %166 = vector.load %arg12[%c0_123, %c0_124, %c0_125] : memref<1x2x128xf32, #tpu.memory_space<vmem>>, vector<1x2x128xf32>
      %167 = vector.shape_cast %166 : vector<1x2x128xf32> to vector<2x128xf32>
      %168 = vector.shape_cast %165 : vector<2x128xf32> to vector<1x2x128xf32>
      tpu.vector_store %arg12[%c0_123, %c0_124, %c0_125], %168 {strides = array<i32>} : memref<1x2x128xf32, #tpu.memory_space<vmem>>, vector<1x2x128xf32>,
      %c0_126 = arith.constant 0 : index
      %c0_127 = arith.constant 0 : index
      %169 = vector.load %arg16[%c0_126, %c0_127] : memref<64x128xf32, #tpu.memory_space<vmem>>, vector<64x128xf32>
      %c0_128 = arith.constant 0 : index
      %c0_129 = arith.constant 0 : index
      %c0_130 = arith.constant 0 : index
      %170 = vector.load %arg10[%c0_128, %c0_129, %c0_130] : memref<1x1x128xf32, #tpu.memory_space<vmem>>, vector<1x1x128xf32>
      %171 = vector.shape_cast %170 : vector<1x1x128xf32> to vector<1x128xf32>
      %172 = vector.broadcast %171 : vector<1x128xf32> to vector<64x128xf32>
      %173 = arith.addf %169, %172 : vector<64x128xf32>
      %174 = arith.truncf %173 : vector<64x128xf32> to vector<64x128xbf16>
      %c0_131 = arith.constant 0 : index
      %c0_132 = arith.constant 0 : index
      %c0_133 = arith.constant 0 : index
      %175 = vector.load %arg13[%c0_131, %c0_132, %c0_133] : memref<1x64x128xbf16, #tpu.memory_space<vmem>>, vector<1x64x128xbf16>
      %176 = vector.shape_cast %175 : vector<1x64x128xbf16> to vector<64x128xbf16>
      %177 = vector.shape_cast %174 : vector<64x128xbf16> to vector<1x64x128xbf16>
      tpu.vector_store %arg13[%c0_131, %c0_132, %c0_133], %177 {strides = array<i32>} : memref<1x64x128xbf16, #tpu.memory_space<vmem>>, vector<1x64x128xbf16>,
    } else {
    }
    return
  }
  func.func @transform_0(%arg0: i32, %arg1: i32, %arg2: i32) -> (i32, i32, i32) {
    %c0_i32 = arith.constant 0 : i32
    %c0_i32_0 = arith.constant 0 : i32
    return %arg0, %c0_i32, %arg2 : i32, i32, i32
  }
  func.func @transform_1(%arg0: i32, %arg1: i32, %arg2: i32) -> (i32, i32, i32) {
    %c0_i32 = arith.constant 0 : i32
    %c0_i32_0 = arith.constant 0 : i32
    return %arg0, %c0_i32, %arg2 : i32, i32, i32
  }
  func.func @transform_2(%arg0: i32, %arg1: i32, %arg2: i32) -> (i32, i32, i32) {
    %c0_i32 = arith.constant 0 : i32
    %c0_i32_0 = arith.constant 0 : i32
    return %arg0, %c0_i32, %arg2 : i32, i32, i32
  }
  func.func @transform_3(%arg0: i32, %arg1: i32, %arg2: i32) -> (i32, i32, i32) {
    %c0_i32 = arith.constant 0 : i32
    %c0_i32_0 = arith.constant 0 : i32
    return %c0_i32, %arg2, %arg1 : i32, i32, i32
  }
  func.func @transform_4(%arg0: i32, %arg1: i32, %arg2: i32) -> (i32, i32, i32) {
    %c0_i32 = arith.constant 0 : i32
    %c0_i32_0 = arith.constant 0 : i32
    %c0_i32_1 = arith.constant 0 : i32
    return %c0_i32, %c0_i32_0, %arg1 : i32, i32, i32
  }
  func.func @transform_5(%arg0: i32, %arg1: i32, %arg2: i32) -> (i32, i32, i32) {
    %c0_i32 = arith.constant 0 : i32
    %c0_i32_0 = arith.constant 0 : i32
    return %arg0, %c0_i32, %arg1 : i32, i32, i32
  }
  func.func @transform_6(%arg0: i32, %arg1: i32, %arg2: i32) -> (i32, i32) {
    %c0_i32 = arith.constant 0 : i32
    return %arg2, %arg1 : i32, i32
  }
  func.func @transform_7(%arg0: i32, %arg1: i32, %arg2: i32) -> (i32, i32, i32) {
    %c0_i32 = arith.constant 0 : i32
    %c0_i32_0 = arith.constant 0 : i32
    %c0_i32_1 = arith.constant 0 : i32
    return %c0_i32, %c0_i32_0, %arg1 : i32, i32, i32
  }
  func.func @transform_8(%arg0: i32, %arg1: i32, %arg2: i32) -> (i32, i32, i32) {
    %c0_i32 = arith.constant 0 : i32
    %c0_i32_0 = arith.constant 0 : i32
    return %arg0, %c0_i32, %arg1 : i32, i32, i32
  }
  func.func @transform_9(%arg0: i32, %arg1: i32, %arg2: i32) -> (i32, i32, i32) {
    %c0_i32 = arith.constant 0 : i32
    %c0_i32_0 = arith.constant 0 : i32
    return %arg0, %c0_i32, %arg1 : i32, i32, i32
  }
  func.func @transform_10(%arg0: i32, %arg1: i32, %arg2: i32) -> (i32, i32, i32) {
    %c0_i32 = arith.constant 0 : i32
    %c0_i32_0 = arith.constant 0 : i32
    return %arg0, %c0_i32, %arg1 : i32, i32, i32
  }
}

module attributes {stable_mosaic.version = 11 : i64} {
  func.func @kernel(%arg0: i32, %arg1: i32, %arg2: i32, %arg3: memref<1x64x128xbf16, #tpu.memory_space<vmem>>, %arg4: memref<1x1x128xf32, #tpu.memory_space<vmem>>, %arg5: memref<1x1x128xf32, #tpu.memory_space<vmem>>, %arg6: memref<9x128x128xbf16, #tpu.memory_space<vmem>>, %arg7: memref<1x1x128xf32, #tpu.memory_space<vmem>>, %arg8: memref<1x64x128xbf16, #tpu.memory_space<vmem>>, %arg9: memref<1x64x128xf32, #tpu.memory_space<vmem>>, %arg10: memref<96x128xbf16, #tpu.memory_space<vmem>>, %arg11: memref<64x128xf32, #tpu.memory_space<vmem>>) attributes {dimension_semantics = [#tpu.dimension_semantics<parallel>, #tpu.dimension_semantics<parallel>, #tpu.dimension_semantics<arbitrary>], iteration_bounds = array<i64: 2, 1, 1>, scalar_prefetch = 0 : i64, scratch_operands = 2 : i64, tpu.core_type = #tpu.core_type<tc>, window_params = [{transform_indices = @transform_0, window_bounds = array<i64: 1, 64, 128>}, {transform_indices = @transform_1, window_bounds = array<i64: 1, 1, 128>}, {transform_indices = @transform_2, window_bounds = array<i64: 1, 1, 128>}, {transform_indices = @transform_3, window_bounds = array<i64: 9, 128, 128>}, {transform_indices = @transform_4, window_bounds = array<i64: 1, 1, 128>}, {transform_indices = @transform_5, window_bounds = array<i64: 1, 64, 128>}, {transform_indices = @transform_6, window_bounds = array<i64: 1, 64, 128>}]} {
    %c0 = arith.constant 0 : index
    %c0_0 = arith.constant 0 : index
    %c0_1 = arith.constant 0 : index
    %0 = vector.load %arg3[%c0, %c0_0, %c0_1] : memref<1x64x128xbf16, #tpu.memory_space<vmem>>, vector<1x64x128xbf16>
    %1 = vector.shape_cast %0 : vector<1x64x128xbf16> to vector<64x128xbf16>
    %2 = arith.extf %1 : vector<64x128xbf16> to vector<64x128xf32>
    %c0_2 = arith.constant 0 : index
    %c0_3 = arith.constant 0 : index
    %c0_4 = arith.constant 0 : index
    %3 = vector.load %arg4[%c0_2, %c0_3, %c0_4] : memref<1x1x128xf32, #tpu.memory_space<vmem>>, vector<1x1x128xf32>
    %4 = vector.shape_cast %3 : vector<1x1x128xf32> to vector<1x128xf32>
    %5 = vector.broadcast %4 : vector<1x128xf32> to vector<64x128xf32>
    %6 = arith.mulf %2, %5 : vector<64x128xf32>
    %c0_5 = arith.constant 0 : index
    %c0_6 = arith.constant 0 : index
    %c0_7 = arith.constant 0 : index
    %7 = vector.load %arg5[%c0_5, %c0_6, %c0_7] : memref<1x1x128xf32, #tpu.memory_space<vmem>>, vector<1x1x128xf32>
    %8 = vector.shape_cast %7 : vector<1x1x128xf32> to vector<1x128xf32>
    %9 = vector.broadcast %8 : vector<1x128xf32> to vector<64x128xf32>
    %10 = arith.addf %6, %9 : vector<64x128xf32>
    %11 = arith.negf %10 : vector<64x128xf32>
    %12 = math.exp %11 : vector<64x128xf32>
    %cst = arith.constant 1.000000e+00 : f32
    %13 = vector.broadcast %cst : f32 to vector<64x128xf32>
    %14 = arith.addf %13, %12 : vector<64x128xf32>
    %15 = arith.divf %13, %14 : vector<64x128xf32>
    %16 = arith.mulf %10, %15 : vector<64x128xf32>
    %17 = arith.truncf %16 : vector<64x128xf32> to vector<64x128xbf16>
    %cst_8 = arith.constant 0.000000e+00 : bf16
    %18 = vector.broadcast %cst_8 : bf16 to vector<16x128xbf16>
    %c0_9 = arith.constant 0 : index
    %c0_10 = arith.constant 0 : index
    %19 = vector.load %arg10[%c0_9, %c0_10] : memref<96x128xbf16, #tpu.memory_space<vmem>>, vector<16x128xbf16>
    tpu.vector_store %arg10[%c0_9, %c0_10], %18 {strides = array<i32>} : memref<96x128xbf16, #tpu.memory_space<vmem>>, vector<16x128xbf16>,
    %c80 = arith.constant 80 : index
    %c0_11 = arith.constant 0 : index
    %20 = vector.load %arg10[%c80, %c0_11] : memref<96x128xbf16, #tpu.memory_space<vmem>>, vector<16x128xbf16>
    tpu.vector_store %arg10[%c80, %c0_11], %18 {strides = array<i32>} : memref<96x128xbf16, #tpu.memory_space<vmem>>, vector<16x128xbf16>,
    %c16 = arith.constant 16 : index
    %c0_12 = arith.constant 0 : index
    %21 = vector.load %arg10[%c16, %c0_12] : memref<96x128xbf16, #tpu.memory_space<vmem>>, vector<64x128xbf16>
    tpu.vector_store %arg10[%c16, %c0_12], %17 {strides = array<i32>} : memref<96x128xbf16, #tpu.memory_space<vmem>>, vector<64x128xbf16>,
    %c0_i32 = arith.constant 0 : i32
    %22 = arith.cmpi eq, %arg2, %c0_i32 : i32
    %23 = arith.extui %22 : i1 to i32
    %c0_i32_13 = arith.constant 0 : i32
    %24 = arith.cmpi ne, %23, %c0_i32_13 : i32
    scf.if %24 {
      %cst_103 = arith.constant 0.000000e+00 : f32
      %142 = vector.broadcast %cst_103 : f32 to vector<64x128xf32>
      %c0_104 = arith.constant 0 : index
      %c0_105 = arith.constant 0 : index
      %143 = vector.load %arg11[%c0_104, %c0_105] : memref<64x128xf32, #tpu.memory_space<vmem>>, vector<64x128xf32>
      tpu.vector_store %arg11[%c0_104, %c0_105], %142 {strides = array<i32>} : memref<64x128xf32, #tpu.memory_space<vmem>>, vector<64x128xf32>,
    } else {
    }
    %25 = tpu.iota {dimensions = array<i32: 0>} : vector<64x1xi32>
    %c8_i32 = arith.constant 8 : i32
    %c0_i32_14 = arith.constant 0 : i32
    %26 = arith.cmpi eq, %c8_i32, %c0_i32_14 : i32
    %c1_i32 = arith.constant 1 : i32
    %27 = arith.select %26, %c1_i32, %c8_i32 : i32
    %28 = vector.broadcast %27 : i32 to vector<64x1xi32>
    %29 = arith.remsi %25, %28 : vector<64x1xi32>
    %c0_i32_15 = arith.constant 0 : i32
    %30 = vector.broadcast %c0_i32_15 : i32 to vector<64x1xi32>
    %31 = arith.cmpi ne, %29, %30 : vector<64x1xi32>
    %c0_i32_16 = arith.constant 0 : i32
    %32 = vector.broadcast %c0_i32_16 : i32 to vector<64x1xi32>
    %33 = arith.cmpi slt, %29, %32 : vector<64x1xi32>
    %c0_i32_17 = arith.constant 0 : i32
    %34 = arith.cmpi slt, %27, %c0_i32_17 : i32
    %35 = vector.broadcast %34 : i1 to vector<64x1xi1>
    %36 = vector.broadcast %35 : vector<64x1xi1> to vector<64x1xi1>
    %37 = arith.xori %33, %36 : vector<64x1xi1>
    %38 = arith.andi %37, %31 : vector<64x1xi1>
    %39 = vector.broadcast %27 : i32 to vector<64x1xi32>
    %40 = arith.addi %29, %39 : vector<64x1xi32>
    %41 = arith.select %38, %40, %29 : vector<64x1xi1>, vector<64x1xi32>
    %c0_i32_18 = arith.constant 0 : i32
    %42 = vector.broadcast %c0_i32_18 : i32 to vector<64x1xi32>
    %43 = arith.cmpi ne, %41, %42 : vector<64x1xi32>
    %c7_i32 = arith.constant 7 : i32
    %44 = vector.broadcast %c7_i32 : i32 to vector<64x1xi32>
    %45 = arith.cmpi ne, %41, %44 : vector<64x1xi32>
    %c7 = arith.constant 7 : index
    %c0_19 = arith.constant 0 : index
    %46 = vector.load %arg10[%c7, %c0_19] : memref<96x128xbf16, #tpu.memory_space<vmem>>, vector<64x128xbf16>
    %c0_i32_20 = arith.constant 0 : i32
    %47 = arith.sitofp %c0_i32_20 : i32 to bf16
    %48 = vector.shape_cast %43 : vector<64x1xi1> to vector<64x1xi1>
    %49 = vector.broadcast %48 : vector<64x1xi1> to vector<64x128xi1>
    %50 = vector.broadcast %47 : bf16 to vector<64x128xbf16>
    %51 = arith.select %49, %46, %50 : vector<64x128xi1>, vector<64x128xbf16>
    %c0_21 = arith.constant 0 : index
    %c0_22 = arith.constant 0 : index
    %52 = vector.load %arg11[%c0_21, %c0_22] : memref<64x128xf32, #tpu.memory_space<vmem>>, vector<64x128xf32>
    %c0_23 = arith.constant 0 : index
    %c0_24 = arith.constant 0 : index
    %c0_25 = arith.constant 0 : index
    %53 = vector.load %arg6[%c0_23, %c0_24, %c0_25] : memref<9x128x128xbf16, #tpu.memory_space<vmem>>, vector<1x128x128xbf16>
    %54 = vector.shape_cast %53 : vector<1x128x128xbf16> to vector<128x128xbf16>
    %cst_26 = arith.constant dense<0.000000e+00> : vector<64x128xf32>
    %55 = tpu.matmul %51, %54, %cst_26 {dimension_numbers = #tpu.dot_dimension_numbers<[1], [0], [0], [1], [0, 0, 1, 1], [], []>} : vector<64x128xbf16>, vector<128x128xbf16>, vector<64x128xf32> -> vector<64x128xf32>
    %56 = arith.addf %52, %55 : vector<64x128xf32>
    %c0_27 = arith.constant 0 : index
    %c0_28 = arith.constant 0 : index
    %57 = vector.load %arg11[%c0_27, %c0_28] : memref<64x128xf32, #tpu.memory_space<vmem>>, vector<64x128xf32>
    tpu.vector_store %arg11[%c0_27, %c0_28], %56 {strides = array<i32>} : memref<64x128xf32, #tpu.memory_space<vmem>>, vector<64x128xf32>,
    %c8 = arith.constant 8 : index
    %c0_29 = arith.constant 0 : index
    %58 = vector.load %arg10[%c8, %c0_29] : memref<96x128xbf16, #tpu.memory_space<vmem>>, vector<64x128xbf16>
    %c0_30 = arith.constant 0 : index
    %c0_31 = arith.constant 0 : index
    %59 = vector.load %arg11[%c0_30, %c0_31] : memref<64x128xf32, #tpu.memory_space<vmem>>, vector<64x128xf32>
    %c1 = arith.constant 1 : index
    %c0_32 = arith.constant 0 : index
    %c0_33 = arith.constant 0 : index
    %60 = vector.load %arg6[%c1, %c0_32, %c0_33] : memref<9x128x128xbf16, #tpu.memory_space<vmem>>, vector<1x128x128xbf16>
    %61 = vector.shape_cast %60 : vector<1x128x128xbf16> to vector<128x128xbf16>
    %cst_34 = arith.constant dense<0.000000e+00> : vector<64x128xf32>
    %62 = tpu.matmul %58, %61, %cst_34 {dimension_numbers = #tpu.dot_dimension_numbers<[1], [0], [0], [1], [0, 0, 1, 1], [], []>} : vector<64x128xbf16>, vector<128x128xbf16>, vector<64x128xf32> -> vector<64x128xf32>
    %63 = arith.addf %59, %62 : vector<64x128xf32>
    %c0_35 = arith.constant 0 : index
    %c0_36 = arith.constant 0 : index
    %64 = vector.load %arg11[%c0_35, %c0_36] : memref<64x128xf32, #tpu.memory_space<vmem>>, vector<64x128xf32>
    tpu.vector_store %arg11[%c0_35, %c0_36], %63 {strides = array<i32>} : memref<64x128xf32, #tpu.memory_space<vmem>>, vector<64x128xf32>,
    %c9 = arith.constant 9 : index
    %c0_37 = arith.constant 0 : index
    %65 = vector.load %arg10[%c9, %c0_37] : memref<96x128xbf16, #tpu.memory_space<vmem>>, vector<64x128xbf16>
    %c0_i32_38 = arith.constant 0 : i32
    %66 = arith.sitofp %c0_i32_38 : i32 to bf16
    %67 = vector.shape_cast %45 : vector<64x1xi1> to vector<64x1xi1>
    %68 = vector.broadcast %67 : vector<64x1xi1> to vector<64x128xi1>
    %69 = vector.broadcast %66 : bf16 to vector<64x128xbf16>
    %70 = arith.select %68, %65, %69 : vector<64x128xi1>, vector<64x128xbf16>
    %c0_39 = arith.constant 0 : index
    %c0_40 = arith.constant 0 : index
    %71 = vector.load %arg11[%c0_39, %c0_40] : memref<64x128xf32, #tpu.memory_space<vmem>>, vector<64x128xf32>
    %c2 = arith.constant 2 : index
    %c0_41 = arith.constant 0 : index
    %c0_42 = arith.constant 0 : index
    %72 = vector.load %arg6[%c2, %c0_41, %c0_42] : memref<9x128x128xbf16, #tpu.memory_space<vmem>>, vector<1x128x128xbf16>
    %73 = vector.shape_cast %72 : vector<1x128x128xbf16> to vector<128x128xbf16>
    %cst_43 = arith.constant dense<0.000000e+00> : vector<64x128xf32>
    %74 = tpu.matmul %70, %73, %cst_43 {dimension_numbers = #tpu.dot_dimension_numbers<[1], [0], [0], [1], [0, 0, 1, 1], [], []>} : vector<64x128xbf16>, vector<128x128xbf16>, vector<64x128xf32> -> vector<64x128xf32>
    %75 = arith.addf %71, %74 : vector<64x128xf32>
    %c0_44 = arith.constant 0 : index
    %c0_45 = arith.constant 0 : index
    %76 = vector.load %arg11[%c0_44, %c0_45] : memref<64x128xf32, #tpu.memory_space<vmem>>, vector<64x128xf32>
    tpu.vector_store %arg11[%c0_44, %c0_45], %75 {strides = array<i32>} : memref<64x128xf32, #tpu.memory_space<vmem>>, vector<64x128xf32>,
    %c15 = arith.constant 15 : index
    %c0_46 = arith.constant 0 : index
    %77 = vector.load %arg10[%c15, %c0_46] : memref<96x128xbf16, #tpu.memory_space<vmem>>, vector<64x128xbf16>
    %c0_i32_47 = arith.constant 0 : i32
    %78 = arith.sitofp %c0_i32_47 : i32 to bf16
    %79 = vector.shape_cast %43 : vector<64x1xi1> to vector<64x1xi1>
    %80 = vector.broadcast %79 : vector<64x1xi1> to vector<64x128xi1>
    %81 = vector.broadcast %78 : bf16 to vector<64x128xbf16>
    %82 = arith.select %80, %77, %81 : vector<64x128xi1>, vector<64x128xbf16>
    %c0_48 = arith.constant 0 : index
    %c0_49 = arith.constant 0 : index
    %83 = vector.load %arg11[%c0_48, %c0_49] : memref<64x128xf32, #tpu.memory_space<vmem>>, vector<64x128xf32>
    %c3 = arith.constant 3 : index
    %c0_50 = arith.constant 0 : index
    %c0_51 = arith.constant 0 : index
    %84 = vector.load %arg6[%c3, %c0_50, %c0_51] : memref<9x128x128xbf16, #tpu.memory_space<vmem>>, vector<1x128x128xbf16>
    %85 = vector.shape_cast %84 : vector<1x128x128xbf16> to vector<128x128xbf16>
    %cst_52 = arith.constant dense<0.000000e+00> : vector<64x128xf32>
    %86 = tpu.matmul %82, %85, %cst_52 {dimension_numbers = #tpu.dot_dimension_numbers<[1], [0], [0], [1], [0, 0, 1, 1], [], []>} : vector<64x128xbf16>, vector<128x128xbf16>, vector<64x128xf32> -> vector<64x128xf32>
    %87 = arith.addf %83, %86 : vector<64x128xf32>
    %c0_53 = arith.constant 0 : index
    %c0_54 = arith.constant 0 : index
    %88 = vector.load %arg11[%c0_53, %c0_54] : memref<64x128xf32, #tpu.memory_space<vmem>>, vector<64x128xf32>
    tpu.vector_store %arg11[%c0_53, %c0_54], %87 {strides = array<i32>} : memref<64x128xf32, #tpu.memory_space<vmem>>, vector<64x128xf32>,
    %c16_55 = arith.constant 16 : index
    %c0_56 = arith.constant 0 : index
    %89 = vector.load %arg10[%c16_55, %c0_56] : memref<96x128xbf16, #tpu.memory_space<vmem>>, vector<64x128xbf16>
    %c0_57 = arith.constant 0 : index
    %c0_58 = arith.constant 0 : index
    %90 = vector.load %arg11[%c0_57, %c0_58] : memref<64x128xf32, #tpu.memory_space<vmem>>, vector<64x128xf32>
    %c4 = arith.constant 4 : index
    %c0_59 = arith.constant 0 : index
    %c0_60 = arith.constant 0 : index
    %91 = vector.load %arg6[%c4, %c0_59, %c0_60] : memref<9x128x128xbf16, #tpu.memory_space<vmem>>, vector<1x128x128xbf16>
    %92 = vector.shape_cast %91 : vector<1x128x128xbf16> to vector<128x128xbf16>
    %cst_61 = arith.constant dense<0.000000e+00> : vector<64x128xf32>
    %93 = tpu.matmul %89, %92, %cst_61 {dimension_numbers = #tpu.dot_dimension_numbers<[1], [0], [0], [1], [0, 0, 1, 1], [], []>} : vector<64x128xbf16>, vector<128x128xbf16>, vector<64x128xf32> -> vector<64x128xf32>
    %94 = arith.addf %90, %93 : vector<64x128xf32>
    %c0_62 = arith.constant 0 : index
    %c0_63 = arith.constant 0 : index
    %95 = vector.load %arg11[%c0_62, %c0_63] : memref<64x128xf32, #tpu.memory_space<vmem>>, vector<64x128xf32>
    tpu.vector_store %arg11[%c0_62, %c0_63], %94 {strides = array<i32>} : memref<64x128xf32, #tpu.memory_space<vmem>>, vector<64x128xf32>,
    %c17 = arith.constant 17 : index
    %c0_64 = arith.constant 0 : index
    %96 = vector.load %arg10[%c17, %c0_64] : memref<96x128xbf16, #tpu.memory_space<vmem>>, vector<64x128xbf16>
    %c0_i32_65 = arith.constant 0 : i32
    %97 = arith.sitofp %c0_i32_65 : i32 to bf16
    %98 = vector.shape_cast %45 : vector<64x1xi1> to vector<64x1xi1>
    %99 = vector.broadcast %98 : vector<64x1xi1> to vector<64x128xi1>
    %100 = vector.broadcast %97 : bf16 to vector<64x128xbf16>
    %101 = arith.select %99, %96, %100 : vector<64x128xi1>, vector<64x128xbf16>
    %c0_66 = arith.constant 0 : index
    %c0_67 = arith.constant 0 : index
    %102 = vector.load %arg11[%c0_66, %c0_67] : memref<64x128xf32, #tpu.memory_space<vmem>>, vector<64x128xf32>
    %c5 = arith.constant 5 : index
    %c0_68 = arith.constant 0 : index
    %c0_69 = arith.constant 0 : index
    %103 = vector.load %arg6[%c5, %c0_68, %c0_69] : memref<9x128x128xbf16, #tpu.memory_space<vmem>>, vector<1x128x128xbf16>
    %104 = vector.shape_cast %103 : vector<1x128x128xbf16> to vector<128x128xbf16>
    %cst_70 = arith.constant dense<0.000000e+00> : vector<64x128xf32>
    %105 = tpu.matmul %101, %104, %cst_70 {dimension_numbers = #tpu.dot_dimension_numbers<[1], [0], [0], [1], [0, 0, 1, 1], [], []>} : vector<64x128xbf16>, vector<128x128xbf16>, vector<64x128xf32> -> vector<64x128xf32>
    %106 = arith.addf %102, %105 : vector<64x128xf32>
    %c0_71 = arith.constant 0 : index
    %c0_72 = arith.constant 0 : index
    %107 = vector.load %arg11[%c0_71, %c0_72] : memref<64x128xf32, #tpu.memory_space<vmem>>, vector<64x128xf32>
    tpu.vector_store %arg11[%c0_71, %c0_72], %106 {strides = array<i32>} : memref<64x128xf32, #tpu.memory_space<vmem>>, vector<64x128xf32>,
    %c23 = arith.constant 23 : index
    %c0_73 = arith.constant 0 : index
    %108 = vector.load %arg10[%c23, %c0_73] : memref<96x128xbf16, #tpu.memory_space<vmem>>, vector<64x128xbf16>
    %c0_i32_74 = arith.constant 0 : i32
    %109 = arith.sitofp %c0_i32_74 : i32 to bf16
    %110 = vector.shape_cast %43 : vector<64x1xi1> to vector<64x1xi1>
    %111 = vector.broadcast %110 : vector<64x1xi1> to vector<64x128xi1>
    %112 = vector.broadcast %109 : bf16 to vector<64x128xbf16>
    %113 = arith.select %111, %108, %112 : vector<64x128xi1>, vector<64x128xbf16>
    %c0_75 = arith.constant 0 : index
    %c0_76 = arith.constant 0 : index
    %114 = vector.load %arg11[%c0_75, %c0_76] : memref<64x128xf32, #tpu.memory_space<vmem>>, vector<64x128xf32>
    %c6 = arith.constant 6 : index
    %c0_77 = arith.constant 0 : index
    %c0_78 = arith.constant 0 : index
    %115 = vector.load %arg6[%c6, %c0_77, %c0_78] : memref<9x128x128xbf16, #tpu.memory_space<vmem>>, vector<1x128x128xbf16>
    %116 = vector.shape_cast %115 : vector<1x128x128xbf16> to vector<128x128xbf16>
    %cst_79 = arith.constant dense<0.000000e+00> : vector<64x128xf32>
    %117 = tpu.matmul %113, %116, %cst_79 {dimension_numbers = #tpu.dot_dimension_numbers<[1], [0], [0], [1], [0, 0, 1, 1], [], []>} : vector<64x128xbf16>, vector<128x128xbf16>, vector<64x128xf32> -> vector<64x128xf32>
    %118 = arith.addf %114, %117 : vector<64x128xf32>
    %c0_80 = arith.constant 0 : index
    %c0_81 = arith.constant 0 : index
    %119 = vector.load %arg11[%c0_80, %c0_81] : memref<64x128xf32, #tpu.memory_space<vmem>>, vector<64x128xf32>
    tpu.vector_store %arg11[%c0_80, %c0_81], %118 {strides = array<i32>} : memref<64x128xf32, #tpu.memory_space<vmem>>, vector<64x128xf32>,
    %c24 = arith.constant 24 : index
    %c0_82 = arith.constant 0 : index
    %120 = vector.load %arg10[%c24, %c0_82] : memref<96x128xbf16, #tpu.memory_space<vmem>>, vector<64x128xbf16>
    %c0_83 = arith.constant 0 : index
    %c0_84 = arith.constant 0 : index
    %121 = vector.load %arg11[%c0_83, %c0_84] : memref<64x128xf32, #tpu.memory_space<vmem>>, vector<64x128xf32>
    %c7_85 = arith.constant 7 : index
    %c0_86 = arith.constant 0 : index
    %c0_87 = arith.constant 0 : index
    %122 = vector.load %arg6[%c7_85, %c0_86, %c0_87] : memref<9x128x128xbf16, #tpu.memory_space<vmem>>, vector<1x128x128xbf16>
    %123 = vector.shape_cast %122 : vector<1x128x128xbf16> to vector<128x128xbf16>
    %cst_88 = arith.constant dense<0.000000e+00> : vector<64x128xf32>
    %124 = tpu.matmul %120, %123, %cst_88 {dimension_numbers = #tpu.dot_dimension_numbers<[1], [0], [0], [1], [0, 0, 1, 1], [], []>} : vector<64x128xbf16>, vector<128x128xbf16>, vector<64x128xf32> -> vector<64x128xf32>
    %125 = arith.addf %121, %124 : vector<64x128xf32>
    %c0_89 = arith.constant 0 : index
    %c0_90 = arith.constant 0 : index
    %126 = vector.load %arg11[%c0_89, %c0_90] : memref<64x128xf32, #tpu.memory_space<vmem>>, vector<64x128xf32>
    tpu.vector_store %arg11[%c0_89, %c0_90], %125 {strides = array<i32>} : memref<64x128xf32, #tpu.memory_space<vmem>>, vector<64x128xf32>,
    %c25 = arith.constant 25 : index
    %c0_91 = arith.constant 0 : index
    %127 = vector.load %arg10[%c25, %c0_91] : memref<96x128xbf16, #tpu.memory_space<vmem>>, vector<64x128xbf16>
    %c0_i32_92 = arith.constant 0 : i32
    %128 = arith.sitofp %c0_i32_92 : i32 to bf16
    %129 = vector.shape_cast %45 : vector<64x1xi1> to vector<64x1xi1>
    %130 = vector.broadcast %129 : vector<64x1xi1> to vector<64x128xi1>
    %131 = vector.broadcast %128 : bf16 to vector<64x128xbf16>
    %132 = arith.select %130, %127, %131 : vector<64x128xi1>, vector<64x128xbf16>
    %c0_93 = arith.constant 0 : index
    %c0_94 = arith.constant 0 : index
    %133 = vector.load %arg11[%c0_93, %c0_94] : memref<64x128xf32, #tpu.memory_space<vmem>>, vector<64x128xf32>
    %c8_95 = arith.constant 8 : index
    %c0_96 = arith.constant 0 : index
    %c0_97 = arith.constant 0 : index
    %134 = vector.load %arg6[%c8_95, %c0_96, %c0_97] : memref<9x128x128xbf16, #tpu.memory_space<vmem>>, vector<1x128x128xbf16>
    %135 = vector.shape_cast %134 : vector<1x128x128xbf16> to vector<128x128xbf16>
    %cst_98 = arith.constant dense<0.000000e+00> : vector<64x128xf32>
    %136 = tpu.matmul %132, %135, %cst_98 {dimension_numbers = #tpu.dot_dimension_numbers<[1], [0], [0], [1], [0, 0, 1, 1], [], []>} : vector<64x128xbf16>, vector<128x128xbf16>, vector<64x128xf32> -> vector<64x128xf32>
    %137 = arith.addf %133, %136 : vector<64x128xf32>
    %c0_99 = arith.constant 0 : index
    %c0_100 = arith.constant 0 : index
    %138 = vector.load %arg11[%c0_99, %c0_100] : memref<64x128xf32, #tpu.memory_space<vmem>>, vector<64x128xf32>
    tpu.vector_store %arg11[%c0_99, %c0_100], %137 {strides = array<i32>} : memref<64x128xf32, #tpu.memory_space<vmem>>, vector<64x128xf32>,
    %c0_i32_101 = arith.constant 0 : i32
    %139 = arith.cmpi eq, %arg2, %c0_i32_101 : i32
    %140 = arith.extui %139 : i1 to i32
    %c0_i32_102 = arith.constant 0 : i32
    %141 = arith.cmpi ne, %140, %c0_i32_102 : i32
    scf.if %141 {
      %c0_103 = arith.constant 0 : index
      %c0_104 = arith.constant 0 : index
      %142 = vector.load %arg11[%c0_103, %c0_104] : memref<64x128xf32, #tpu.memory_space<vmem>>, vector<64x128xf32>
      %c0_105 = arith.constant 0 : index
      %c0_106 = arith.constant 0 : index
      %c0_107 = arith.constant 0 : index
      %143 = vector.load %arg7[%c0_105, %c0_106, %c0_107] : memref<1x1x128xf32, #tpu.memory_space<vmem>>, vector<1x1x128xf32>
      %144 = vector.shape_cast %143 : vector<1x1x128xf32> to vector<1x128xf32>
      %145 = vector.broadcast %144 : vector<1x128xf32> to vector<64x128xf32>
      %146 = arith.addf %142, %145 : vector<64x128xf32>
      %c0_108 = arith.constant 0 : index
      %c0_109 = arith.constant 0 : index
      %c0_110 = arith.constant 0 : index
      %147 = vector.load %arg8[%c0_108, %c0_109, %c0_110] : memref<1x64x128xbf16, #tpu.memory_space<vmem>>, vector<1x64x128xbf16>
      %148 = vector.shape_cast %147 : vector<1x64x128xbf16> to vector<64x128xbf16>
      %149 = arith.extf %148 : vector<64x128xbf16> to vector<64x128xf32>
      %150 = arith.addf %146, %149 : vector<64x128xf32>
      %c0_111 = arith.constant 0 : index
      %c0_112 = arith.constant 0 : index
      %c0_113 = arith.constant 0 : index
      %151 = vector.load %arg9[%c0_111, %c0_112, %c0_113] : memref<1x64x128xf32, #tpu.memory_space<vmem>>, vector<1x64x128xf32>
      %152 = vector.shape_cast %151 : vector<1x64x128xf32> to vector<64x128xf32>
      %153 = vector.shape_cast %150 : vector<64x128xf32> to vector<1x64x128xf32>
      tpu.vector_store %arg9[%c0_111, %c0_112, %c0_113], %153 {strides = array<i32>} : memref<1x64x128xf32, #tpu.memory_space<vmem>>, vector<1x64x128xf32>,
    } else {
    }
    return
  }
  func.func @transform_0(%arg0: i32, %arg1: i32, %arg2: i32) -> (i32, i32, i32) {
    %c0_i32 = arith.constant 0 : i32
    %c0_i32_0 = arith.constant 0 : i32
    return %arg0, %c0_i32, %arg2 : i32, i32, i32
  }
  func.func @transform_1(%arg0: i32, %arg1: i32, %arg2: i32) -> (i32, i32, i32) {
    %c0_i32 = arith.constant 0 : i32
    %c0_i32_0 = arith.constant 0 : i32
    return %arg0, %c0_i32, %arg2 : i32, i32, i32
  }
  func.func @transform_2(%arg0: i32, %arg1: i32, %arg2: i32) -> (i32, i32, i32) {
    %c0_i32 = arith.constant 0 : i32
    %c0_i32_0 = arith.constant 0 : i32
    return %arg0, %c0_i32, %arg2 : i32, i32, i32
  }
  func.func @transform_3(%arg0: i32, %arg1: i32, %arg2: i32) -> (i32, i32, i32) {
    %c0_i32 = arith.constant 0 : i32
    %c0_i32_0 = arith.constant 0 : i32
    return %c0_i32, %arg2, %arg1 : i32, i32, i32
  }
  func.func @transform_4(%arg0: i32, %arg1: i32, %arg2: i32) -> (i32, i32, i32) {
    %c0_i32 = arith.constant 0 : i32
    %c0_i32_0 = arith.constant 0 : i32
    %c0_i32_1 = arith.constant 0 : i32
    return %c0_i32, %c0_i32_0, %arg1 : i32, i32, i32
  }
  func.func @transform_5(%arg0: i32, %arg1: i32, %arg2: i32) -> (i32, i32, i32) {
    %c0_i32 = arith.constant 0 : i32
    %c0_i32_0 = arith.constant 0 : i32
    return %arg0, %c0_i32, %arg1 : i32, i32, i32
  }
  func.func @transform_6(%arg0: i32, %arg1: i32, %arg2: i32) -> (i32, i32, i32) {
    %c0_i32 = arith.constant 0 : i32
    %c0_i32_0 = arith.constant 0 : i32
    return %arg0, %c0_i32, %arg1 : i32, i32, i32
  }
}

</mosaic_0001>

<bundles_post_ra>
// kernel: squeeze.4
= control target key start
LH: loop header
LB: loop body
LE: loop exit
PB: predicated region body
PF: predicated region fallthrough
CT: control target
= control target key end

     0   :  { %s354_s8 = smov 122   ;;  %s355_s9 = smov 124   ;;  %vm7_vm0 = vcmask 15360   ;;  %s653_s0 = inlined_call_operand.vmem [shape: f32[2,64], index: 0, kind: input, shape index: {}]   ;;  %s654_s1 = inlined_call_operand.vmem [shape: f32[2,32,2], index: 1, kind: output, shape index: {}]  }
   0x1   :  { %v4_v0 = vld [vmem:[%s653_s0] sm:$0x3]  ;;  %s353_s0 = smov 126   ;;  %s356_s10 = smov 120  }
   0x2   :  { %5 = vst [vmem:[#allocation0] sm:$0x3] %v4_v0  ;;  %s357_s11 = smov 118   ;;  %s358_s12 = smov 116  }
   0x3   :  { %s359_s13 = smov 114   ;;  %s360_s14 = smov 112  }
   0x4   :  { %s361_s15 = smov 110   ;;  %s362_s16 = smov 108  }
   0x5   :  { %s363_s17 = smov 106   ;;  %s364_s18 = smov 104  }
   0x6   :  { %s365_s19 = smov 102   ;;  %s366_s20 = smov 100  }
   0x7   :  { %s367_s21 = smov 98   ;;  %s368_s22 = smov 96  }
   0x8   :  { %s369_s23 = smov 94   ;;  %s370_s24 = smov 92  }
   0x9   :  { %v11_v1 = vld [vmem:[#allocation0] sm:$0x3]   ;;  %s371_s25 = smov 90   ;;  %s372_s26 = smov 88  }
   0xa   :  { %v27_v2 = vld [vmem:[#allocation0] sm:$0x3]   ;;  %12 = vrot.lane.b32.xlu0 %v11_v1, %s353_s0  ;;  %s373_s27 = smov 86   ;;  %s374_s28 = smov 84  }
   0xb   :  { %28 = vrot.lane.b32.xlu1 %v27_v2, %s354_s8  ;;  %v19_v3 = vld [vmem:[#allocation0] sm:$0x3]   ;;  %s375_s29 = smov 82   ;;  %s376_s30 = smov 80  }
   0xc   :  { %v35_v4 = vld [vmem:[#allocation0] sm:$0x3]   ;;  %s377_s6 = smov 78   ;;  %s378_s7 = smov 76  }
   0xd   :  { %v43_v5 = vld [vmem:[#allocation0] sm:$0x3]   ;;  %s379_s0 = smov 74   ;;  %s380_s8 = smov 72  }
   0xe   :  { %20 = vrot.lane.b32.xlu0 %v19_v3, %s355_s9  ;;  %v51_v6 = vld [vmem:[#allocation0] sm:$0x3]   ;;  %s381_s9 = smov 70  }
   0xf   :  { %36 = vrot.lane.b32.xlu1 %v35_v4, %s356_s10  ;;  %v59_v7 = vld [vmem:[#allocation0] sm:$0x3]   ;;  %s382_s10 = smov 68  }
  0x10   :  { %v67_v8 = vld [vmem:[#allocation0] sm:$0x3]  }
  0x11   :  { %v75_v9 = vld [vmem:[#allocation0] sm:$0x3]  }
  0x12   :  { %44 = vrot.lane.b32.xlu0 %v43_v5, %s357_s11  ;;  %v83_v10 = vld [vmem:[#allocation0] sm:$0x3]   ;;  %s383_s11 = smov 66  }
  0x13   :  { %52 = vrot.lane.b32.xlu1 %v51_v6, %s358_s12  ;;  %v91_v11 = vld [vmem:[#allocation0] sm:$0x3]  }
  0x14   :  { %v99_v12 = vld [vmem:[#allocation0] sm:$0x3]  }
  0x15   :  { %v107_v13 = vld [vmem:[#allocation0] sm:$0x3]  }
  0x16   :  { %60 = vrot.lane.b32.xlu0 %v59_v7, %s359_s13  ;;  %v115_v14 = vld [vmem:[#allocation0] sm:$0x3]  }
  0x17   :  { %68 = vrot.lane.b32.xlu1 %v67_v8, %s360_s14  ;;  %v123_v15 = vld [vmem:[#allocation0] sm:$0x3]  }
  0x18   :  { %v131_v16 = vld [vmem:[#allocation0] sm:$0x3]  }
  0x19   :  { %v139_v17 = vld [vmem:[#allocation0] sm:$0x3]  }
  0x1a   :  { %76 = vrot.lane.b32.xlu0 %v75_v9, %s361_s15  ;;  %v147_v18 = vld [vmem:[#allocation0] sm:$0x3]  }
  0x1b   :  { %84 = vrot.lane.b32.xlu1 %v83_v10, %s362_s16  ;;  %v155_v19 = vld [vmem:[#allocation0] sm:$0x3]  }
  0x1c   :  { %v163_v20 = vld [vmem:[#allocation0] sm:$0x3]  }
  0x1d   :  { %v171_v21 = vld [vmem:[#allocation0] sm:$0x3]  }
  0x1e   :  { %92 = vrot.lane.b32.xlu0 %v91_v11, %s363_s17  ;;  %v179_v22 = vld [vmem:[#allocation0] sm:$0x3]  }
  0x1f   :  { %100 = vrot.lane.b32.xlu1 %v99_v12, %s364_s18  ;;  %v187_v23 = vld [vmem:[#allocation0] sm:$0x3]  }
  0x20   :  { %v195_v24 = vld [vmem:[#allocation0] sm:$0x3]  }
  0x21   :  { %v203_v25 = vld [vmem:[#allocation0] sm:$0x3]  }
  0x22   :  { %108 = vrot.lane.b32.xlu0 %v107_v13, %s365_s19  ;;  %v211_v26 = vld [vmem:[#allocation0] sm:$0x3]  }
  0x23   :  { %116 = vrot.lane.b32.xlu1 %v115_v14, %s366_s20  ;;  %v6_v27 = vld [vmem:[#allocation0] sm:$0x3]  }
  0x24   :  { %8 = vst.msk [vmem:[%s654_s1] sm:$0x1] %vm7_vm0, %v6_v27   ;;  %259 = vst.msk [vmem:[%s654_s1 + $0x1f] sm:$0x2] %vm7_vm0, %v6_v27   ;;  %v219_v28 = vld [vmem:[#allocation0] sm:$0x3]  }
  0x25   :  { %v227_v29 = vld [vmem:[#allocation0] sm:$0x3]  }
  0x26   :  { %124 = vrot.lane.b32.xlu0 %v123_v15, %s367_s21  ;;  %v235_v30 = vld [vmem:[#allocation0] sm:$0x3]  }
  0x27   :  { %132 = vrot.lane.b32.xlu1 %v131_v16, %s368_s22  ;;  %v243_v31 = vld [vmem:[#allocation0] sm:$0x3]  }
  0x28   :  { %v251_v32 = vld [vmem:[#allocation0] sm:$0x3]  }
  0x2a   :  { %140 = vrot.lane.b32.xlu0 %v139_v17, %s369_s23 }
  0x2b   :  { %148 = vrot.lane.b32.xlu1 %v147_v18, %s370_s24 }
  0x2e   :  { %156 = vrot.lane.b32.xlu0 %v155_v19, %s371_s25 }
  0x2f   :  { %164 = vrot.lane.b32.xlu1 %v163_v20, %s372_s26 }
  0x32   :  { %172 = vrot.lane.b32.xlu0 %v171_v21, %s373_s27 }
  0x33   :  { %180 = vrot.lane.b32.xlu1 %v179_v22, %s374_s28 }
  0x36   :  { %188 = vrot.lane.b32.xlu0 %v187_v23, %s375_s29 }
  0x37   :  { %196 = vrot.lane.b32.xlu1 %v195_v24, %s376_s30 }
  0x3a   :  { %204 = vrot.lane.b32.xlu0 %v203_v25, %s377_s6 }
  0x3b   :  { %212 = vrot.lane.b32.xlu1 %v211_v26, %s378_s7 }
  0x3e   :  { %220 = vrot.lane.b32.xlu0 %v219_v28, %s379_s0 }
  0x3f   :  { %228 = vrot.lane.b32.xlu1 %v227_v29, %s380_s8 }
  0x42   :  { %236 = vrot.lane.b32.xlu0 %v235_v30, %s381_s9 }
  0x43   :  { %244 = vrot.lane.b32.xlu1 %v243_v31, %s382_s10 }
  0x46   :  { %252 = vrot.lane.b32.xlu0 %v251_v32, %s383_s11 }
  0x7c   :  { %v13_v33 = vpop.permute.xlu0 %12  }
  0x7d   :  { %v29_v34 = vpop.permute.xlu1 %28   ;;  %260 = vst.msk [vmem:[%s654_s1 + $0x1] sm:$0x1] %vm7_vm0, %v13_v33   ;;  %261 = vst.msk [vmem:[%s654_s1 + $0x20] sm:$0x2] %vm7_vm0, %v13_v33  }
  0x7e   :  { %264 = vst.msk [vmem:[%s654_s1 + $0x3] sm:$0x1] %vm7_vm0, %v29_v34   ;;  %265 = vst.msk [vmem:[%s654_s1 + $0x22] sm:$0x2] %vm7_vm0, %v29_v34  }
  0x80   :  { %v21_v35 = vpop.permute.xlu0 %20  }
  0x81   :  { %v37_v36 = vpop.permute.xlu1 %36   ;;  %262 = vst.msk [vmem:[%s654_s1 + $0x2] sm:$0x1] %vm7_vm0, %v21_v35   ;;  %263 = vst.msk [vmem:[%s654_s1 + $0x21] sm:$0x2] %vm7_vm0, %v21_v35  }
  0x82   :  { %266 = vst.msk [vmem:[%s654_s1 + $0x4] sm:$0x1] %vm7_vm0, %v37_v36   ;;  %267 = vst.msk [vmem:[%s654_s1 + $0x23] sm:$0x2] %vm7_vm0, %v37_v36  }
  0x84   :  { %v45_v37 = vpop.permute.xlu0 %44  }
  0x85   :  { %v53_v38 = vpop.permute.xlu1 %52   ;;  %268 = vst.msk [vmem:[%s654_s1 + $0x5] sm:$0x1] %vm7_vm0, %v45_v37   ;;  %269 = vst.msk [vmem:[%s654_s1 + $0x24] sm:$0x2] %vm7_vm0, %v45_v37  }
  0x86   :  { %270 = vst.msk [vmem:[%s654_s1 + $0x6] sm:$0x1] %vm7_vm0, %v53_v38   ;;  %271 = vst.msk [vmem:[%s654_s1 + $0x25] sm:$0x2] %vm7_vm0, %v53_v38  }
  0x88   :  { %v61_v39 = vpop.permute.xlu0 %60  }
  0x89   :  { %v69_v40 = vpop.permute.xlu1 %68   ;;  %272 = vst.msk [vmem:[%s654_s1 + $0x7] sm:$0x1] %vm7_vm0, %v61_v39   ;;  %273 = vst.msk [vmem:[%s654_s1 + $0x26] sm:$0x2] %vm7_vm0, %v61_v39  }
  0x8a   :  { %274 = vst.msk [vmem:[%s654_s1 + $0x8] sm:$0x1] %vm7_vm0, %v69_v40   ;;  %275 = vst.msk [vmem:[%s654_s1 + $0x27] sm:$0x2] %vm7_vm0, %v69_v40  }
  0x8c   :  { %v77_v41 = vpop.permute.xlu0 %76  }
  0x8d   :  { %v85_v42 = vpop.permute.xlu1 %84   ;;  %276 = vst.msk [vmem:[%s654_s1 + $0x9] sm:$0x1] %vm7_vm0, %v77_v41   ;;  %277 = vst.msk [vmem:[%s654_s1 + $0x28] sm:$0x2] %vm7_vm0, %v77_v41  }
  0x8e   :  { %278 = vst.msk [vmem:[%s654_s1 + $0xa] sm:$0x1] %vm7_vm0, %v85_v42   ;;  %279 = vst.msk [vmem:[%s654_s1 + $0x29] sm:$0x2] %vm7_vm0, %v85_v42  }
  0x90   :  { %v93_v43 = vpop.permute.xlu0 %92  }
  0x91   :  { %v101_v44 = vpop.permute.xlu1 %100   ;;  %280 = vst.msk [vmem:[%s654_s1 + $0xb] sm:$0x1] %vm7_vm0, %v93_v43   ;;  %281 = vst.msk [vmem:[%s654_s1 + $0x2a] sm:$0x2] %vm7_vm0, %v93_v43  }
  0x92   :  { %282 = vst.msk [vmem:[%s654_s1 + $0xc] sm:$0x1] %vm7_vm0, %v101_v44   ;;  %283 = vst.msk [vmem:[%s654_s1 + $0x2b] sm:$0x2] %vm7_vm0, %v101_v44  }
  0x94   :  { %v109_v45 = vpop.permute.xlu0 %108  }
  0x95   :  { %v117_v46 = vpop.permute.xlu1 %116   ;;  %284 = vst.msk [vmem:[%s654_s1 + $0xd] sm:$0x1] %vm7_vm0, %v109_v45   ;;  %285 = vst.msk [vmem:[%s654_s1 + $0x2c] sm:$0x2] %vm7_vm0, %v109_v45  }
  0x96   :  { %286 = vst.msk [vmem:[%s654_s1 + $0xe] sm:$0x1] %vm7_vm0, %v117_v46   ;;  %287 = vst.msk [vmem:[%s654_s1 + $0x2d] sm:$0x2] %vm7_vm0, %v117_v46  }
  0x98   :  { %v125_v47 = vpop.permute.xlu0 %124  }
  0x99   :  { %v133_v48 = vpop.permute.xlu1 %132   ;;  %288 = vst.msk [vmem:[%s654_s1 + $0xf] sm:$0x1] %vm7_vm0, %v125_v47   ;;  %289 = vst.msk [vmem:[%s654_s1 + $0x2e] sm:$0x2] %vm7_vm0, %v125_v47  }
  0x9a   :  { %290 = vst.msk [vmem:[%s654_s1 + $0x10] sm:$0x1] %vm7_vm0, %v133_v48   ;;  %291 = vst.msk [vmem:[%s654_s1 + $0x2f] sm:$0x2] %vm7_vm0, %v133_v48  }
  0x9c   :  { %v141_v49 = vpop.permute.xlu0 %140  }
  0x9d   :  { %v149_v50 = vpop.permute.xlu1 %148   ;;  %292 = vst.msk [vmem:[%s654_s1 + $0x11] sm:$0x1] %vm7_vm0, %v141_v49   ;;  %293 = vst.msk [vmem:[%s654_s1 + $0x30] sm:$0x2] %vm7_vm0, %v141_v49  }
  0x9e   :  { %294 = vst.msk [vmem:[%s654_s1 + $0x12] sm:$0x1] %vm7_vm0, %v149_v50   ;;  %295 = vst.msk [vmem:[%s654_s1 + $0x31] sm:$0x2] %vm7_vm0, %v149_v50  }
  0xa0   :  { %v157_v51 = vpop.permute.xlu0 %156  }
  0xa1   :  { %v165_v52 = vpop.permute.xlu1 %164   ;;  %296 = vst.msk [vmem:[%s654_s1 + $0x13] sm:$0x1] %vm7_vm0, %v157_v51   ;;  %297 = vst.msk [vmem:[%s654_s1 + $0x32] sm:$0x2] %vm7_vm0, %v157_v51  }
  0xa2   :  { %298 = vst.msk [vmem:[%s654_s1 + $0x14] sm:$0x1] %vm7_vm0, %v165_v52   ;;  %299 = vst.msk [vmem:[%s654_s1 + $0x33] sm:$0x2] %vm7_vm0, %v165_v52  }
  0xa4   :  { %v173_v53 = vpop.permute.xlu0 %172  }
  0xa5   :  { %v181_v54 = vpop.permute.xlu1 %180   ;;  %300 = vst.msk [vmem:[%s654_s1 + $0x15] sm:$0x1] %vm7_vm0, %v173_v53   ;;  %301 = vst.msk [vmem:[%s654_s1 + $0x34] sm:$0x2] %vm7_vm0, %v173_v53  }
  0xa6   :  { %302 = vst.msk [vmem:[%s654_s1 + $0x16] sm:$0x1] %vm7_vm0, %v181_v54   ;;  %303 = vst.msk [vmem:[%s654_s1 + $0x35] sm:$0x2] %vm7_vm0, %v181_v54  }
  0xa8   :  { %v189_v55 = vpop.permute.xlu0 %188  }
  0xa9   :  { %v197_v56 = vpop.permute.xlu1 %196   ;;  %304 = vst.msk [vmem:[%s654_s1 + $0x17] sm:$0x1] %vm7_vm0, %v189_v55   ;;  %305 = vst.msk [vmem:[%s654_s1 + $0x36] sm:$0x2] %vm7_vm0, %v189_v55  }
  0xaa   :  { %306 = vst.msk [vmem:[%s654_s1 + $0x18] sm:$0x1] %vm7_vm0, %v197_v56   ;;  %307 = vst.msk [vmem:[%s654_s1 + $0x37] sm:$0x2] %vm7_vm0, %v197_v56  }
  0xac   :  { %v205_v57 = vpop.permute.xlu0 %204  }
  0xad   :  { %v213_v58 = vpop.permute.xlu1 %212   ;;  %308 = vst.msk [vmem:[%s654_s1 + $0x19] sm:$0x1] %vm7_vm0, %v205_v57   ;;  %309 = vst.msk [vmem:[%s654_s1 + $0x38] sm:$0x2] %vm7_vm0, %v205_v57  }
  0xae   :  { %310 = vst.msk [vmem:[%s654_s1 + $0x1a] sm:$0x1] %vm7_vm0, %v213_v58   ;;  %311 = vst.msk [vmem:[%s654_s1 + $0x39] sm:$0x2] %vm7_vm0, %v213_v58  }
  0xb0   :  { %v221_v59 = vpop.permute.xlu0 %220  }
  0xb1   :  { %v229_v60 = vpop.permute.xlu1 %228   ;;  %312 = vst.msk [vmem:[%s654_s1 + $0x1b] sm:$0x1] %vm7_vm0, %v221_v59   ;;  %313 = vst.msk [vmem:[%s654_s1 + $0x3a] sm:$0x2] %vm7_vm0, %v221_v59  }
  0xb2   :  { %314 = vst.msk [vmem:[%s654_s1 + $0x1c] sm:$0x1] %vm7_vm0, %v229_v60   ;;  %315 = vst.msk [vmem:[%s654_s1 + $0x3b] sm:$0x2] %vm7_vm0, %v229_v60  }
  0xb4   :  { %v237_v61 = vpop.permute.xlu0 %236  }
  0xb5   :  { %v245_v62 = vpop.permute.xlu1 %244   ;;  %316 = vst.msk [vmem:[%s654_s1 + $0x1d] sm:$0x1] %vm7_vm0, %v237_v61   ;;  %317 = vst.msk [vmem:[%s654_s1 + $0x3c] sm:$0x2] %vm7_vm0, %v237_v61  }
  0xb6   :  { %318 = vst.msk [vmem:[%s654_s1 + $0x1e] sm:$0x1] %vm7_vm0, %v245_v62   ;;  %319 = vst.msk [vmem:[%s654_s1 + $0x3d] sm:$0x2] %vm7_vm0, %v245_v62  }
  0xb8   :  { %v253_v63 = vpop.permute.xlu0 %252  }
  0xb9   :  { %320 = vst.msk [vmem:[%s654_s1 + $0x1f] sm:$0x1] %vm7_vm0, %v253_v63   ;;  %321 = vst.msk [vmem:[%s654_s1 + $0x3e] sm:$0x2] %vm7_vm0, %v253_v63  }

// kernel: squeeze.6
= control target key start
LH: loop header
LB: loop body
LE: loop exit
PB: predicated region body
PF: predicated region fallthrough
CT: control target
= control target key end

     0   :  { %s354_s8 = smov 116   ;;  %s355_s9 = smov 120   ;;  %vm7_vm0 = vcmask 31744   ;;  %s653_s0 = inlined_call_operand.vmem [shape: f32[2,128], index: 0, kind: input, shape index: {}]   ;;  %s654_s1 = inlined_call_operand.vmem [shape: f32[2,32,4], index: 1, kind: output, shape index: {}]  }
   0x1   :  { %v4_v0 = vld [vmem:[%s653_s0] sm:$0x3]  ;;  %s353_s0 = smov 124   ;;  %s356_s10 = smov 112  }
   0x2   :  { %5 = vst [vmem:[#allocation0] sm:$0x3] %v4_v0  ;;  %s357_s11 = smov 108   ;;  %s358_s12 = smov 104  }
   0x3   :  { %s359_s13 = smov 100   ;;  %s360_s14 = smov 96  }
   0x4   :  { %s361_s15 = smov 92   ;;  %s362_s16 = smov 88  }
   0x5   :  { %s363_s17 = smov 84   ;;  %s364_s18 = smov 80  }
   0x6   :  { %s365_s19 = smov 76   ;;  %s366_s20 = smov 72  }
   0x7   :  { %s367_s21 = smov 68   ;;  %s368_s22 = smov 64  }
   0x8   :  { %s369_s23 = smov 60   ;;  %s370_s24 = smov 56  }
   0x9   :  { %v11_v1 = vld [vmem:[#allocation0] sm:$0x3]   ;;  %s371_s25 = smov 52   ;;  %s372_s26 = smov 48  }
   0xa   :  { %v27_v2 = vld [vmem:[#allocation0] sm:$0x3]   ;;  %12 = vrot.lane.b32.xlu0 %v11_v1, %s353_s0  ;;  %s373_s27 = smov 44   ;;  %s374_s28 = smov 40  }
   0xb   :  { %28 = vrot.lane.b32.xlu1 %v27_v2, %s354_s8  ;;  %v19_v3 = vld [vmem:[#allocation0] sm:$0x3]   ;;  %s375_s29 = smov 36   ;;  %s376_s30 = smov 32  }
   0xc   :  { %v35_v4 = vld [vmem:[#allocation0] sm:$0x3]   ;;  %s377_s6 = smov 28   ;;  %s378_s7 = smov 24  }
   0xd   :  { %v43_v5 = vld [vmem:[#allocation0] sm:$0x3]   ;;  %s379_s0 = smov 20   ;;  %s380_s8 = smov 16  }
   0xe   :  { %20 = vrot.lane.b32.xlu0 %v19_v3, %s355_s9  ;;  %v51_v6 = vld [vmem:[#allocation0] sm:$0x3]   ;;  %s381_s9 = smov 12  }
   0xf   :  { %36 = vrot.lane.b32.xlu1 %v35_v4, %s356_s10  ;;  %v59_v7 = vld [vmem:[#allocation0] sm:$0x3]   ;;  %s382_s10 = smov 8  }
  0x10   :  { %v67_v8 = vld [vmem:[#allocation0] sm:$0x3]  }
  0x11   :  { %v75_v9 = vld [vmem:[#allocation0] sm:$0x3]  }
  0x12   :  { %44 = vrot.lane.b32.xlu0 %v43_v5, %s357_s11  ;;  %v83_v10 = vld [vmem:[#allocation0] sm:$0x3]   ;;  %s383_s11 = smov 4  }
  0x13   :  { %52 = vrot.lane.b32.xlu1 %v51_v6, %s358_s12  ;;  %v91_v11 = vld [vmem:[#allocation0] sm:$0x3]  }
  0x14   :  { %v99_v12 = vld [vmem:[#allocation0] sm:$0x3]  }
  0x15   :  { %v107_v13 = vld [vmem:[#allocation0] sm:$0x3]  }
  0x16   :  { %60 = vrot.lane.b32.xlu0 %v59_v7, %s359_s13  ;;  %v115_v14 = vld [vmem:[#allocation0] sm:$0x3]  }
  0x17   :  { %68 = vrot.lane.b32.xlu1 %v67_v8, %s360_s14  ;;  %v123_v15 = vld [vmem:[#allocation0] sm:$0x3]  }
  0x18   :  { %v131_v16 = vld [vmem:[#allocation0] sm:$0x3]  }
  0x19   :  { %v139_v17 = vld [vmem:[#allocation0] sm:$0x3]  }
  0x1a   :  { %76 = vrot.lane.b32.xlu0 %v75_v9, %s361_s15  ;;  %v147_v18 = vld [vmem:[#allocation0] sm:$0x3]  }
  0x1b   :  { %84 = vrot.lane.b32.xlu1 %v83_v10, %s362_s16  ;;  %v155_v19 = vld [vmem:[#allocation0] sm:$0x3]  }
  0x1c   :  { %v163_v20 = vld [vmem:[#allocation0] sm:$0x3]  }
  0x1d   :  { %v171_v21 = vld [vmem:[#allocation0] sm:$0x3]  }
  0x1e   :  { %92 = vrot.lane.b32.xlu0 %v91_v11, %s363_s17  ;;  %v179_v22 = vld [vmem:[#allocation0] sm:$0x3]  }
  0x1f   :  { %100 = vrot.lane.b32.xlu1 %v99_v12, %s364_s18  ;;  %v187_v23 = vld [vmem:[#allocation0] sm:$0x3]  }
  0x20   :  { %v195_v24 = vld [vmem:[#allocation0] sm:$0x3]  }
  0x21   :  { %v203_v25 = vld [vmem:[#allocation0] sm:$0x3]  }
  0x22   :  { %108 = vrot.lane.b32.xlu0 %v107_v13, %s365_s19  ;;  %v211_v26 = vld [vmem:[#allocation0] sm:$0x3]  }
  0x23   :  { %116 = vrot.lane.b32.xlu1 %v115_v14, %s366_s20  ;;  %v6_v27 = vld [vmem:[#allocation0] sm:$0x3]  }
  0x24   :  { %8 = vst.msk [vmem:[%s654_s1] sm:$0x1] %vm7_vm0, %v6_v27   ;;  %259 = vst.msk [vmem:[%s654_s1 + $0x1f] sm:$0x2] %vm7_vm0, %v6_v27   ;;  %v219_v28 = vld [vmem:[#allocation0] sm:$0x3]  }
  0x25   :  { %v227_v29 = vld [vmem:[#allocation0] sm:$0x3]  }
  0x26   :  { %124 = vrot.lane.b32.xlu0 %v123_v15, %s367_s21  ;;  %v235_v30 = vld [vmem:[#allocation0] sm:$0x3]  }
  0x27   :  { %132 = vrot.lane.b32.xlu1 %v131_v16, %s368_s22  ;;  %v243_v31 = vld [vmem:[#allocation0] sm:$0x3]  }
  0x28   :  { %v251_v32 = vld [vmem:[#allocation0] sm:$0x3]  }
  0x2a   :  { %140 = vrot.lane.b32.xlu0 %v139_v17, %s369_s23 }
  0x2b   :  { %148 = vrot.lane.b32.xlu1 %v147_v18, %s370_s24 }
  0x2e   :  { %156 = vrot.lane.b32.xlu0 %v155_v19, %s371_s25 }
  0x2f   :  { %164 = vrot.lane.b32.xlu1 %v163_v20, %s372_s26 }
  0x32   :  { %172 = vrot.lane.b32.xlu0 %v171_v21, %s373_s27 }
  0x33   :  { %180 = vrot.lane.b32.xlu1 %v179_v22, %s374_s28 }
  0x36   :  { %188 = vrot.lane.b32.xlu0 %v187_v23, %s375_s29 }
  0x37   :  { %196 = vrot.lane.b32.xlu1 %v195_v24, %s376_s30 }
  0x3a   :  { %204 = vrot.lane.b32.xlu0 %v203_v25, %s377_s6 }
  0x3b   :  { %212 = vrot.lane.b32.xlu1 %v211_v26, %s378_s7 }
  0x3e   :  { %220 = vrot.lane.b32.xlu0 %v219_v28, %s379_s0 }
  0x3f   :  { %228 = vrot.lane.b32.xlu1 %v227_v29, %s380_s8 }
  0x42   :  { %236 = vrot.lane.b32.xlu0 %v235_v30, %s381_s9 }
  0x43   :  { %244 = vrot.lane.b32.xlu1 %v243_v31, %s382_s10 }
  0x46   :  { %252 = vrot.lane.b32.xlu0 %v251_v32, %s383_s11 }
  0x7c   :  { %v13_v33 = vpop.permute.xlu0 %12  }
  0x7d   :  { %v29_v34 = vpop.permute.xlu1 %28   ;;  %260 = vst.msk [vmem:[%s654_s1 + $0x1] sm:$0x1] %vm7_vm0, %v13_v33   ;;  %261 = vst.msk [vmem:[%s654_s1 + $0x20] sm:$0x2] %vm7_vm0, %v13_v33  }
  0x7e   :  { %264 = vst.msk [vmem:[%s654_s1 + $0x3] sm:$0x1] %vm7_vm0, %v29_v34   ;;  %265 = vst.msk [vmem:[%s654_s1 + $0x22] sm:$0x2] %vm7_vm0, %v29_v34  }
  0x80   :  { %v21_v35 = vpop.permute.xlu0 %20  }
  0x81   :  { %v37_v36 = vpop.permute.xlu1 %36   ;;  %262 = vst.msk [vmem:[%s654_s1 + $0x2] sm:$0x1] %vm7_vm0, %v21_v35   ;;  %263 = vst.msk [vmem:[%s654_s1 + $0x21] sm:$0x2] %vm7_vm0, %v21_v35  }
  0x82   :  { %266 = vst.msk [vmem:[%s654_s1 + $0x4] sm:$0x1] %vm7_vm0, %v37_v36   ;;  %267 = vst.msk [vmem:[%s654_s1 + $0x23] sm:$0x2] %vm7_vm0, %v37_v36  }
  0x84   :  { %v45_v37 = vpop.permute.xlu0 %44  }
  0x85   :  { %v53_v38 = vpop.permute.xlu1 %52   ;;  %268 = vst.msk [vmem:[%s654_s1 + $0x5] sm:$0x1] %vm7_vm0, %v45_v37   ;;  %269 = vst.msk [vmem:[%s654_s1 + $0x24] sm:$0x2] %vm7_vm0, %v45_v37  }
  0x86   :  { %270 = vst.msk [vmem:[%s654_s1 + $0x6] sm:$0x1] %vm7_vm0, %v53_v38   ;;  %271 = vst.msk [vmem:[%s654_s1 + $0x25] sm:$0x2] %vm7_vm0, %v53_v38  }
  0x88   :  { %v61_v39 = vpop.permute.xlu0 %60  }
  0x89   :  { %v69_v40 = vpop.permute.xlu1 %68   ;;  %272 = vst.msk [vmem:[%s654_s1 + $0x7] sm:$0x1] %vm7_vm0, %v61_v39   ;;  %273 = vst.msk [vmem:[%s654_s1 + $0x26] sm:$0x2] %vm7_vm0, %v61_v39  }
  0x8a   :  { %274 = vst.msk [vmem:[%s654_s1 + $0x8] sm:$0x1] %vm7_vm0, %v69_v40   ;;  %275 = vst.msk [vmem:[%s654_s1 + $0x27] sm:$0x2] %vm7_vm0, %v69_v40  }
  0x8c   :  { %v77_v41 = vpop.permute.xlu0 %76  }
  0x8d   :  { %v85_v42 = vpop.permute.xlu1 %84   ;;  %276 = vst.msk [vmem:[%s654_s1 + $0x9] sm:$0x1] %vm7_vm0, %v77_v41   ;;  %277 = vst.msk [vmem:[%s654_s1 + $0x28] sm:$0x2] %vm7_vm0, %v77_v41  }
  0x8e   :  { %278 = vst.msk [vmem:[%s654_s1 + $0xa] sm:$0x1] %vm7_vm0, %v85_v42   ;;  %279 = vst.msk [vmem:[%s654_s1 + $0x29] sm:$0x2] %vm7_vm0, %v85_v42  }
  0x90   :  { %v93_v43 = vpop.permute.xlu0 %92  }
  0x91   :  { %v101_v44 = vpop.permute.xlu1 %100   ;;  %280 = vst.msk [vmem:[%s654_s1 + $0xb] sm:$0x1] %vm7_vm0, %v93_v43   ;;  %281 = vst.msk [vmem:[%s654_s1 + $0x2a] sm:$0x2] %vm7_vm0, %v93_v43  }
  0x92   :  { %282 = vst.msk [vmem:[%s654_s1 + $0xc] sm:$0x1] %vm7_vm0, %v101_v44   ;;  %283 = vst.msk [vmem:[%s654_s1 + $0x2b] sm:$0x2] %vm7_vm0, %v101_v44  }
  0x94   :  { %v109_v45 = vpop.permute.xlu0 %108  }
  0x95   :  { %v117_v46 = vpop.permute.xlu1 %116   ;;  %284 = vst.msk [vmem:[%s654_s1 + $0xd] sm:$0x1] %vm7_vm0, %v109_v45   ;;  %285 = vst.msk [vmem:[%s654_s1 + $0x2c] sm:$0x2] %vm7_vm0, %v109_v45  }
  0x96   :  { %286 = vst.msk [vmem:[%s654_s1 + $0xe] sm:$0x1] %vm7_vm0, %v117_v46   ;;  %287 = vst.msk [vmem:[%s654_s1 + $0x2d] sm:$0x2] %vm7_vm0, %v117_v46  }
  0x98   :  { %v125_v47 = vpop.permute.xlu0 %124  }
  0x99   :  { %v133_v48 = vpop.permute.xlu1 %132   ;;  %288 = vst.msk [vmem:[%s654_s1 + $0xf] sm:$0x1] %vm7_vm0, %v125_v47   ;;  %289 = vst.msk [vmem:[%s654_s1 + $0x2e] sm:$0x2] %vm7_vm0, %v125_v47  }
  0x9a   :  { %290 = vst.msk [vmem:[%s654_s1 + $0x10] sm:$0x1] %vm7_vm0, %v133_v48   ;;  %291 = vst.msk [vmem:[%s654_s1 + $0x2f] sm:$0x2] %vm7_vm0, %v133_v48  }
  0x9c   :  { %v141_v49 = vpop.permute.xlu0 %140  }
  0x9d   :  { %v149_v50 = vpop.permute.xlu1 %148   ;;  %292 = vst.msk [vmem:[%s654_s1 + $0x11] sm:$0x1] %vm7_vm0, %v141_v49   ;;  %293 = vst.msk [vmem:[%s654_s1 + $0x30] sm:$0x2] %vm7_vm0, %v141_v49  }
  0x9e   :  { %294 = vst.msk [vmem:[%s654_s1 + $0x12] sm:$0x1] %vm7_vm0, %v149_v50   ;;  %295 = vst.msk [vmem:[%s654_s1 + $0x31] sm:$0x2] %vm7_vm0, %v149_v50  }
  0xa0   :  { %v157_v51 = vpop.permute.xlu0 %156  }
  0xa1   :  { %v165_v52 = vpop.permute.xlu1 %164   ;;  %296 = vst.msk [vmem:[%s654_s1 + $0x13] sm:$0x1] %vm7_vm0, %v157_v51   ;;  %297 = vst.msk [vmem:[%s654_s1 + $0x32] sm:$0x2] %vm7_vm0, %v157_v51  }
  0xa2   :  { %298 = vst.msk [vmem:[%s654_s1 + $0x14] sm:$0x1] %vm7_vm0, %v165_v52   ;;  %299 = vst.msk [vmem:[%s654_s1 + $0x33] sm:$0x2] %vm7_vm0, %v165_v52  }
  0xa4   :  { %v173_v53 = vpop.permute.xlu0 %172  }
  0xa5   :  { %v181_v54 = vpop.permute.xlu1 %180   ;;  %300 = vst.msk [vmem:[%s654_s1 + $0x15] sm:$0x1] %vm7_vm0, %v173_v53   ;;  %301 = vst.msk [vmem:[%s654_s1 + $0x34] sm:$0x2] %vm7_vm0, %v173_v53  }
  0xa6   :  { %302 = vst.msk [vmem:[%s654_s1 + $0x16] sm:$0x1] %vm7_vm0, %v181_v54   ;;  %303 = vst.msk [vmem:[%s654_s1 + $0x35] sm:$0x2] %vm7_vm0, %v181_v54  }
  0xa8   :  { %v189_v55 = vpop.permute.xlu0 %188  }
  0xa9   :  { %v197_v56 = vpop.permute.xlu1 %196   ;;  %304 = vst.msk [vmem:[%s654_s1 + $0x17] sm:$0x1] %vm7_vm0, %v189_v55   ;;  %305 = vst.msk [vmem:[%s654_s1 + $0x36] sm:$0x2] %vm7_vm0, %v189_v55  }
  0xaa   :  { %306 = vst.msk [vmem:[%s654_s1 + $0x18] sm:$0x1] %vm7_vm0, %v197_v56   ;;  %307 = vst.msk [vmem:[%s654_s1 + $0x37] sm:$0x2] %vm7_vm0, %v197_v56  }
  0xac   :  { %v205_v57 = vpop.permute.xlu0 %204  }
  0xad   :  { %v213_v58 = vpop.permute.xlu1 %212   ;;  %308 = vst.msk [vmem:[%s654_s1 + $0x19] sm:$0x1] %vm7_vm0, %v205_v57   ;;  %309 = vst.msk [vmem:[%s654_s1 + $0x38] sm:$0x2] %vm7_vm0, %v205_v57  }
  0xae   :  { %310 = vst.msk [vmem:[%s654_s1 + $0x1a] sm:$0x1] %vm7_vm0, %v213_v58   ;;  %311 = vst.msk [vmem:[%s654_s1 + $0x39] sm:$0x2] %vm7_vm0, %v213_v58  }
  0xb0   :  { %v221_v59 = vpop.permute.xlu0 %220  }
  0xb1   :  { %v229_v60 = vpop.permute.xlu1 %228   ;;  %312 = vst.msk [vmem:[%s654_s1 + $0x1b] sm:$0x1] %vm7_vm0, %v221_v59   ;;  %313 = vst.msk [vmem:[%s654_s1 + $0x3a] sm:$0x2] %vm7_vm0, %v221_v59  }
  0xb2   :  { %314 = vst.msk [vmem:[%s654_s1 + $0x1c] sm:$0x1] %vm7_vm0, %v229_v60   ;;  %315 = vst.msk [vmem:[%s654_s1 + $0x3b] sm:$0x2] %vm7_vm0, %v229_v60  }
  0xb4   :  { %v237_v61 = vpop.permute.xlu0 %236  }
  0xb5   :  { %v245_v62 = vpop.permute.xlu1 %244   ;;  %316 = vst.msk [vmem:[%s654_s1 + $0x1d] sm:$0x1] %vm7_vm0, %v237_v61   ;;  %317 = vst.msk [vmem:[%s654_s1 + $0x3c] sm:$0x2] %vm7_vm0, %v237_v61  }
  0xb6   :  { %318 = vst.msk [vmem:[%s654_s1 + $0x1e] sm:$0x1] %vm7_vm0, %v245_v62   ;;  %319 = vst.msk [vmem:[%s654_s1 + $0x3d] sm:$0x2] %vm7_vm0, %v245_v62  }
  0xb8   :  { %v253_v63 = vpop.permute.xlu0 %252  }
  0xb9   :  { %320 = vst.msk [vmem:[%s654_s1 + $0x1f] sm:$0x1] %vm7_vm0, %v253_v63   ;;  %321 = vst.msk [vmem:[%s654_s1 + $0x3e] sm:$0x2] %vm7_vm0, %v253_v63  }

// kernel: unet_residual_block.3
= control target key start
LH: loop header
LB: loop body
LE: loop exit
PB: predicated region body
PF: predicated region fallthrough
CT: control target
= control target key end

     0   :  { %6 = vsyncpa [#allocation3], 0  ;;  %s623_s0 = inlined_call_operand.hbm [shape: f32[2,64,64], index: 0, kind: input, shape index: {}]   ;;  %s624_s1 = inlined_call_operand.vmem [shape: f32[2,2,64], index: 1, kind: output, shape index: {}]  }
   0x1   :  { %8 = vsyncpa [#allocation3 + $0x1], 0  ;;  %s466_s6 = smov 0   ;;  %s468_s7 = smov 0  }
   0x2   :  { %s470_s8 = smov 0   ;;  %s472_s9 = smov 0  }
   0x3   :  { %s474_s10 = smov 0   ;;  %s476_s11 = smov 0  }
   0x4 LB: > { %s299_s12 = sadd.s32 4294967295, %s450_s11   ;;  %s26_s13 = sadd.s32 1, %s446_s10  ;;  %s450_s11 = sphi %s476_s11, %s14_s11   ;;  %s446_s10 = sphi %s474_s10, %s632_s10   ;;  %s442_s9 = sphi %s472_s9, %s631_s9   ;;  %s438_s8 = sphi %s470_s8, %s630_s8   ;;  %s434_s7 = sphi %s468_s7, %s629_s7   ;;  %s430_s6 = sphi %s466_s6, %s628_s6  }
   0x5   : > { %p28_p0 = scmp.ge.s32.totalorder %s26_s13, 2  ;;  %s35_s14 = sadd.s32 1, %s438_s8 }
   0x6   : > { %p42_p1 = scmp.ne.s32.totalorder %s438_s8, %s434_s7  ;;  %p43_p2 = scmp.eq.s32.totalorder %s450_s11, 0 }
   0x7   : > { %s634_s13 = smov (%p28_p0, %s26_s13), 0  ;;  %p48_p4 = scmp.ne.s32.totalorder %s434_s7, %s430_s6 }
   0x8   : > { %p502_p3 = por %p43_p2, %p42_p1  ;;  %s30_s16 = ssub.s32 %s446_s10, %s634_s13 }
   0x9   : > { %p49_p5 = scmp.eq.s32.totalorder %s299_s12, 0  ;;  %p33_p6 = scmp.eq.s32.totalorder %s30_s16, 0 }
   0xa   : > { %p318_p8 = scmp.lt.s32.totalorder %s450_s11, 2  ;;  %s98_s19 = sand.u32 1, %s438_s8  }
   0xb   : > { %p509_p7 = por %p49_p5, %p48_p4  ;;  %s311_s20 = sshll.u32 %s446_s10, 10 }
   0xc   : > { %s515_s18 = scalar_select %p33_p6, %s438_s8, %s35_s14  }
   0xd   : > { %s303_s21 = sshll.u32 %s98_s19, 6  ;;  %s522_s24 = scalar_lea.hbm %s623_s0, %s311_s20 }
   0xe   : > { %s102_s25 = scalar_lea.vmem [#allocation2], %s303_s21  ;;  %p526_p9 = pnand %p318_p8, %p502_p3 }
   0xf   : > { %s111_s26 = sshll.u32 %s102_s25, 4  ;;  %s532_s28 = scalar_lea.sflag [#allocation3], %s98_s19  ;;  %s530_s26 = int_to_ptr.vmem [resolvable:$true] %s111_s26 }
  0x10   : > { %s370_s29 = scalar_lea.hbm %s522_s24, 1024  ;;  %p372_p11 = pneg %p526_p9 }
  0x11   : > { %p371_p10 = scmp.ne.s32.totalorder %s522_s24, %s370_s29  ;;  %s375_s3 = scalar_lea.hbm %s623_s0, 2048 }
  0x12   : > { %p376_p0 = scmp.lt.u32.totalorder %s522_s24, %s623_s0  ;;  %p377_p1 = scmp.lt.u32.totalorder %s375_s3, %s370_s29 }
  0x13   : > { %p373_p12 = pnand %p372_p11, %p371_p10  ;;  %p379_p3 = scmp.lt.u32.totalorder %s370_s29, %s522_s24 }
  0x14   : > { %p378_p2 = por %p377_p1, %p376_p0 }
  0x15   : > { %p374_p13 = pneg %p373_p12 }
  0x16   : > { %p380_p4 = por %p379_p3, %p378_p2 }
  0x18   : > { %p381_p5 = pnand %p380_p4, %p374_p13 }
  0x1a   : > { %384 = shalt.err (!%p381_p5)
}
  0x1b   : > { %s385_s6 = scalar_lea.vmem %s530_s26, 1024  ;;  %s452_s12 = smov [#allocation2]  }
  0x1c   : > { %p386_p6 = scmp.ne.s32.totalorder %s530_s26, %s385_s6  ;;  %s390_s14 = sshll.u32 %s452_s12, 4  ;;  %s391_s14 = int_to_ptr.vmem [resolvable:$false] %s390_s14 }
  0x1d   : > { %s392_s15 = scalar_lea.vmem %s391_s14, 2048  ;;  %p393_p12 = scmp.lt.s32.totalorder %s530_s26, %s391_s14 }
  0x1e   : > { %p388_p8 = pnand %p386_p6, %p372_p11  ;;  %p394_p0 = scmp.lt.s32.totalorder %s392_s15, %s385_s6 }
  0x20   : > { %p389_p10 = pneg %p388_p8  ;;  %p395_p1 = por %p394_p0, %p393_p12 }
  0x22   : > { %p396_p2 = pnand %p395_p1, %p389_p10 }
  0x24   : > { %399 = shalt.err (!%p396_p2)
}
  0x25   : > { %s453_s16 = smov 128   ;;  %s454_s19 = smov 8  }
  0x26   : > { %317 = dma.hbm_to_vmem [thread:$0]  (!%p526_p9), %s522_s24, 1024, %s530_s26, %s532_s28, %s453_s16, %s453_s16, %s454_s19  }
  0x27   : > { %p306_p11 = scmp.ge.s32.totalorder %s450_s11, 1  ;;  %p119_p13 = scmp.lt.s32.totalorder %s450_s11, 3 }
  0x29   : > { %p120_p3 = pnand %p306_p11, %p119_p13 }
  0x2a   : > { %s125_s20 = sand.u32 (!%p120_p3), 1, %s434_s7  }
  0x2b   : > { %123 = sbr.rel (%p120_p3) target bundleno = 86 (0x56), region = 24  ;;  %s307_s21 = sshll.u32 (!%p120_p3), %s125_s20, 6 }
  0x2c   : > { %s126_s22 = scalar_lea.sflag (!%p120_p3), [#allocation3], %s125_s20  ;;  %s563_s23 = scalar_lea.vmem (!%p120_p3), [#allocation2], %s307_s21 }
  0x32   : > { %425 = dma.done.wait (%p509_p7), %s126_s22, 1024  }
  0x33   : > { %427 = vsyncadd (%p509_p7), %s126_s22, 4294966272  ;;  %p148_p9 = scmp.lt.s32.totalorder %s442_s9, 1  ;;  %vm156_vm0 = vcmask 517120   ;;  %vm166_vm1 = vcmask 523264   ;;  %v455_v0 = vmov 0.0   ;;  %v158_v1 = vld [vmem:[%s563_s23] sm:$0xff] }
  0x34   : > { %v159_v2 = vld [vmem:[%s563_s23 + $0x8] sm:$0xff]  ;;  %v160_v3 = vld [vmem:[%s563_s23 + $0x10] sm:$0xff]  ;;  %v161_v4 = vld [vmem:[%s563_s23 + $0x18] sm:$0xff]  ;;  %v167_v5 = vsel %vm166_vm1, %v158_v1, 0.0  ;;  %v188_v8 = vmul.f32 %v158_v1, %v158_v1  ;;  %vm218_vm2 = vcmask 1040384  }
  0x35   : > { %s636_s9 = smov (!%p148_p9, %s442_s9), 1  ;;  %v168_v6 = vsel %vm166_vm1, %v159_v2, 0.0  ;;  %v170_v7 = vsel %vm166_vm1, %v160_v3, 0.0  ;;  %v162_v9 = vld [vmem:[%s563_s23 + $0x20] sm:$0xff]  ;;  %v172_v11 = vsel %vm166_vm1, %v161_v4, 0.0  ;;  %v189_v12 = vmul.f32 %v159_v2, %v159_v2  ;;  %v163_v14 = vld [vmem:[%s563_s23 + $0x28] sm:$0xff] }
  0x36   : > { %s308_s24 = sshll.u32 %s636_s9, 1  ;;  %v169_v10 = vadd.f32 %v168_v6, %v167_v5  ;;  %v190_v13 = vmul.f32 %v160_v3, %v160_v3  ;;  %v191_v16 = vmul.f32 %v161_v4, %v161_v4  ;;  %v174_v17 = vsel %vm166_vm1, %v162_v9, 0.0  ;;  %v164_v21 = vld [vmem:[%s563_s23 + $0x30] sm:$0xff]  ;;  %v165_v28 = vld [vmem:[%s563_s23 + $0x38] sm:$0xff] }
  0x37   : > { %s574_s27 = scalar_lea.vmem %s624_s1, %s308_s24  ;;  %v192_v18 = vmul.f32 %v162_v9, %v162_v9  ;;  %v196_v19 = vsel %vm166_vm1, %v188_v8, 0.0  ;;  %v197_v20 = vsel %vm166_vm1, %v189_v12, 0.0  ;;  %v176_v25 = vsel %vm166_vm1, %v163_v14, 0.0 }
  0x38   : > { %157 = vst.msk [vmem:[%s574_s27] sm:$0x3] %vm156_vm0, %v455_v0  ;;  %v171_v15 = vadd.f32 %v170_v7, %v169_v10  ;;  %v198_v23 = vadd.f32 %v197_v20, %v196_v19  ;;  %v199_v24 = vsel %vm166_vm1, %v190_v13, 0.0  ;;  %v193_v26 = vmul.f32 %v163_v14, %v163_v14 }
  0x39   : > { %v201_v27 = vsel %vm166_vm1, %v191_v16, 0.0  ;;  %v178_v31 = vsel %vm166_vm1, %v164_v21, 0.0  ;;  %v194_v32 = vmul.f32 %v164_v21, %v164_v21  ;;  %v203_v33 = vsel %vm166_vm1, %v192_v18, 0.0 }
  0x3a   : > { %v173_v22 = vadd.f32 %v172_v11, %v171_v15  ;;  %v200_v30 = vadd.f32 %v199_v24, %v198_v23  ;;  %v180_v36 = vsel %vm166_vm1, %v165_v28, 0.0  ;;  %v195_v37 = vmul.f32 %v165_v28, %v165_v28 }
  0x3b   : > { %v205_v38 = vsel %vm166_vm1, %v193_v26, 0.0  ;;  %v207_v41 = vsel %vm166_vm1, %v194_v32, 0.0 }
  0x3c   : > { %v175_v29 = vadd.f32 %v174_v17, %v173_v22  ;;  %v202_v35 = vadd.f32 %v201_v27, %v200_v30  ;;  %v209_v44 = vsel %vm166_vm1, %v195_v37, 0.0 }
  0x3e   : > { %v177_v34 = vadd.f32 %v176_v25, %v175_v29  ;;  %v204_v40 = vadd.f32 %v203_v33, %v202_v35 }
  0x3f   : > { %v217_v59 = vld [vmem:[%s574_s27] sm:$0x3] }
  0x40   : > { %v179_v39 = vadd.f32 %v178_v31, %v177_v34  ;;  %v206_v43 = vadd.f32 %v205_v38, %v204_v40 }
  0x42   : > { %v181_v42 = vadd.f32 %v180_v36, %v179_v39  ;;  %v208_v46 = vadd.f32 %v207_v41, %v206_v43 }
  0x44   : > { %v182_v45 = vrot.slane %v181_v42, 4  ;;  %v210_v48 = vadd.f32 %v209_v44, %v208_v46 }
  0x46   : > { %v183_v47 = vadd.f32 %v182_v45, %v181_v42  ;;  %v211_v50 = vrot.slane %v210_v48, 4 }
  0x48   : > { %v184_v49 = vrot.slane %v183_v47, 2  ;;  %v212_v52 = vadd.f32 %v211_v50, %v210_v48 }
  0x4a   : > { %v185_v51 = vadd.f32 %v184_v49, %v183_v47  ;;  %v213_v54 = vrot.slane %v212_v52, 2 }
  0x4c   : > { %v186_v53 = vrot.slane %v185_v51, 1  ;;  %v214_v55 = vadd.f32 %v213_v54, %v212_v52 }
  0x4e   : > { %v187_v56 = vadd.f32 %v186_v53, %v185_v51  ;;  %v215_v57 = vrot.slane %v214_v55, 1 }
  0x50   : > { %v216_v58 = vadd.f32 %v215_v57, %v214_v55 }
  0x52   : > { %v219_v60 = vsel %vm218_vm2, %v187_v56, %v216_v58 }
  0x53   : > { %v220_v61 = vadd.f32 %v219_v60, %v217_v59 }
  0x55   : > { %222 = vst.msk [vmem:[%s574_s27] sm:$0x3] %vm156_vm0, %v220_v61 }
  0x56 PF: > { %s14_s11 = sadd.s32 1, %s450_s11   ;;  %s628_s6 = smov %s434_s7 }
  0x57   : > { %p11_p7 = scmp.ge.s32.totalorder %s14_s11, 4   ;;  %s629_s7 = smov %s438_s8 }
  0x58   : > { %s630_s8 = smov %s515_s18  ;;  %s631_s9 = smov %s446_s10 }
  0x59   : > { %s632_s10 = smov %s634_s13  ;;  %13 = sbr.rel (!%p11_p7) target bundleno = 4 (0x4), region = 68 }
  0x60   :  { %242 = vsyncpa [#allocation3], 1 }
  0x61   :  { %244 = vsyncpa [#allocation3 + $0x1], 1 }

// kernel: unet_residual_block.4
= control target key start
LH: loop header
LB: loop body
LE: loop exit
PB: predicated region body
PF: predicated region fallthrough
CT: control target
= control target key end

     0   :  { %s3953_s13 = smov 0   ;;  %s3955_s14 = smov 0   ;;  %s4804_s0 = inlined_call_operand.vmem [shape: f32[2,64,64], index: 0, kind: input, shape index: {}]   ;;  %s4805_s1 = inlined_call_operand.vmem [shape: f32[2,1,64], index: 1, kind: input, shape index: {}]   ;;  %s4806_s2 = inlined_call_operand.vmem [shape: f32[2,1,64], index: 2, kind: input, shape index: {}]   ;;  %s4807_s3 = inlined_call_operand.vmem [shape: bf16[9,64,128], index: 3, kind: input, shape index: {}]   ;;  %s4808_s4 = inlined_call_operand.vmem [shape: f32[1,1,128], index: 4, kind: input, shape index: {}]   ;;  %s4809_s5 = inlined_call_operand.vmem [shape: f32[2,1,128], index: 5, kind: input, shape index: {}]   ;;  %s4810_s6 = inlined_call_operand.vmem [shape: bf16[64,128], index: 6, kind: input, shape index: {}]   ;;  %s4811_s7 = inlined_call_operand.vmem [shape: f32[1,1,128], index: 7, kind: input, shape index: {}]   ;;  %s4812_s8 = inlined_call_operand.vmem [shape: bf16[2,64,128], index: 8, kind: output, shape index: {0}]   ;;  %s4813_s9 = inlined_call_operand.vmem [shape: f32[2,2,128], index: 9, kind: output, shape index: {1}]   ;;  %s4814_s10 = inlined_call_operand.vmem [shape: bf16[2,64,128], index: 10, kind: output, shape index: {2}]  }
   0x1   :  { %s3957_s15 = smov 0  }
   0x2 LB: > { %s40_s16 = sadd.s32 1, %s3891_s14  ;;  %p3212_p0 = scmp.ge.s32.totalorder %s3895_s15, 1  ;;  %s3895_s15 = sphi %s3957_s15, %s21_s15   ;;  %s3891_s14 = sphi %s3955_s14, %s4842_s14   ;;  %s3887_s13 = sphi %s3953_s13, %s4841_s13  }
   0x3   : > { %p42_p1 = scmp.ge.s32.totalorder %s40_s16, 2  ;;  %p434_p2 = scmp.lt.s32.totalorder %s3895_s15, 3 }
   0x5   : > { %s4844_s16 = smov (%p42_p1, %s40_s16), 0  ;;  %p435_p3 = pnand %p3212_p0, %p434_p2 }
   0x6   : > { %v3797_v0 = vld [vmem:[%s4807_s3 + $0x80] sm:$0xff] (!%p435_p3)   ;;  %p533_p4 = scmp.lt.s32.totalorder (!%p435_p3), %s3887_s13, 1  ;;  %v3798_v1 = vld [vmem:[%s4807_s3 + $0x88] sm:$0xff] (!%p435_p3)   ;;  %vm707_vm0 = vcmask (!%p435_p3), 523264   ;;  %v734_v2 = vlaneseq (!%p435_p3)  ;;  %v3799_v4 = vld [vmem:[%s4807_s3 + $0x90] sm:$0xff] (!%p435_p3)   ;;  %v3897_v5 = vmov (!%p435_p3), 0  }
   0x7   : > { %438 = sbr.rel (%p435_p3) target bundleno = 385 (0x181), region = 52  ;;  %3612 = vmatprep.subr.bf16.mxu0 (!%p435_p3), %v3797_v0  ;;  %v3800_v3 = vld [vmem:[%s4807_s3] sm:$0xff] (!%p435_p3)   ;;  %708 = vst.msk [vmem:[#allocation2] sm:$0xff] (!%p435_p3), %vm707_vm0, %v3897_v5  ;;  %709 = vst.msk [vmem:[#allocation2 + $0x28] sm:$0xff] (!%p435_p3), %vm707_vm0, %v3897_v5  ;;  %v3802_v6 = vld [vmem:[%s4807_s3 + $0x8] sm:$0xff] (!%p435_p3)  }
   0x8   : > { %3613 = vmatpush3.bf16.msra.mxu0 (!%p435_p3), %v3797_v0  ;;  %3548 = vmatprep.subr.bf16.mxu1 (!%p435_p3), %v3800_v3  ;;  %v4006_v7 = vshrl.u32 (!%p435_p3), %v734_v2, 7  ;;  %v3801_v15 = vld [vmem:[%s4807_s3 + $0x98] sm:$0xff] (!%p435_p3)   ;;  %v3804_v19 = vld [vmem:[%s4807_s3 + $0x10] sm:$0xff] (!%p435_p3)   ;;  %v4054_v24 = vld [vmem:[%s4807_s3 + $0xa0] sm:$0xff] (!%p435_p3)   ;;  %vm904_vm14 = vsmask.f32 (!%p435_p3), 3328 }
   0x9   : > { %3614 = vmatprep.subr.bf16.mxu0 (!%p435_p3), %v3798_v1  ;;  %3549 = vmatpush3.bf16.msra.mxu1 (!%p435_p3), %v3800_v3  ;;  %v3806_v33 = vld [vmem:[%s4807_s3 + $0x18] sm:$0xff] (!%p435_p3)   ;;  %v4113_v50 = vld [vmem:[%s4807_s3 + $0x20] sm:$0xff] (!%p435_p3)  }
   0xa   : > { %3550 = vmatprep.subr.bf16.mxu1 (!%p435_p3), %v3802_v6  ;;  %v4028_v16 = vadd.s32 (!%p435_p3), 8, %v4006_v7  ;;  %v4046_v22 = vadd.s32 (!%p435_p3), 16, %v4006_v7  ;;  %v4049_v23 = vadd.s32 (!%p435_p3), 24, %v4006_v7  ;;  %v747_v27 = vand.u32 (!%p435_p3), 7, %v4006_v7 }
   0xb   : > { %v4099_v46 = vadd.s32 (!%p435_p3), 32, %v4006_v7  ;;  %v4120_v53 = vadd.s32 (!%p435_p3), 40, %v4006_v7 }
   0xc   : > { %3615 = vmatpush3.bf16.msra.mxu0 (!%p435_p3), %v3798_v1  ;;  %v754_v34 = vand.u32 (!%p435_p3), 7, %v4028_v16  ;;  %v761_v35 = vand.u32 (!%p435_p3), 7, %v4046_v22  ;;  %v768_v37 = vand.u32 (!%p435_p3), 7, %v4049_v23  ;;  %vm839_vm1 = vcmp.ne.s32.totalorder (!%p435_p3), %v747_v27, 0 }
   0xd   : > { %3616 = vmatprep.subr.bf16.mxu0 (!%p435_p3), %v3799_v4  ;;  %3551 = vmatpush3.bf16.msra.mxu1 (!%p435_p3), %v3802_v6  ;;  %vm876_vm3 = vmpackc.low (!%p435_p3), %vm839_vm1, %vm839_vm1  ;;  %v775_v54 = vand.u32 (!%p435_p3), 7, %v4099_v46  ;;  %v782_v62 = vand.u32 (!%p435_p3), 7, %v4120_v53  ;;  %vm4181_vm15 = vcmp.ne.s32.totalorder (!%p435_p3), %v747_v27, 7 }
   0xe   : > { %s4846_s13 = smov (!%p533_p4, %s3887_s13), 1  ;;  %3552 = vmatprep.subr.bf16.mxu1 %v3804_v19  ;;  %vm840_vm2 = vcmp.ne.s32.totalorder %v754_v34, 0  ;;  %vm841_vm4 = vcmp.ne.s32.totalorder %v761_v35, 0  ;;  %vm4089_vm5 = vcmp.ne.s32.totalorder %v768_v37, 0  ;;  %v884_v42 = vsel %vm876_vm3, 65537, %v3897_v5 }
   0xf   : > { %s3403_s25 = sshll.u32 %s4846_s13, 6  ;;  %s546_s28 = scalar_lea.vmem %s4805_s1, %s4846_s13  ;;  %vm877_vm6 = vmpackc.low %vm840_vm2, %vm840_vm2  ;;  %vm843_vm9 = vcmp.ne.s32.totalorder %v775_v54, 0  ;;  %vm844_vm11 = vcmp.ne.s32.totalorder %v782_v62, 0  ;;  %vm4190_vm1 = vcmp.ne.s32.totalorder %v754_v34, 7 }
  0x10   : > { %s4000_s17 = scalar_lea.vmem %s4804_s0, %s3403_s25  ;;  %s552_s20 = scalar_lea.vmem %s4806_s2, %s4846_s13  ;;  %v4014_v10 = vld [vmem:[%s546_s28] ss:$0 sm:$0xff]  ;;  %3617 = vmatpush3.bf16.msra.mxu0 %v3799_v4  ;;  %vm878_vm7 = vmpackc.low %vm841_vm4, %vm841_vm4  ;;  %v885_v44 = vsel %vm877_vm6, 65537, %v3897_v5  ;;  %vm4203_vm4 = vcmp.ne.s32.totalorder %v761_v35, 7 }
  0x11   : > { %v4009_v8 = vld [vmem:[%s4000_s17] sm:$0xff]  ;;  %v4012_v9 = vld [vmem:[%s4000_s17 + $0x8] sm:$0xff]  ;;  %v4040_v20 = vld [vmem:[%s4000_s17 + $0x10] sm:$0xff]  ;;  %3618 = vmatprep.subr.bf16.mxu0 %v3801_v15  ;;  %3553 = vmatpush3.bf16.msra.mxu1 %v3804_v19  ;;  %v886_v47 = vsel %vm878_vm7, 65537, %v3897_v5  ;;  %v4105_v48 = vcombine.low %v884_v42, %v885_v44  ;;  %s570_s18 = scalar_lea.vmem %s4809_s5, %s4846_s13  ;;  %s3217_s29 = sshll.u32 %s4846_s13, 1 }
  0x12   : > { %v624_v11 = vmul.f32 %v4014_v10, %v4009_v8  ;;  %v625_v12 = vmul.f32 %v4014_v10, %v4012_v9  ;;  %v4020_v13 = vld [vmem:[%s552_s20] ss:$0 sm:$0xff]  ;;  %v4043_v21 = vld [vmem:[%s4000_s17 + $0x18] sm:$0xff]  ;;  %v626_v25 = vmul.f32 %v4014_v10, %v4040_v20  ;;  %v614_v40 = vld [vmem:[%s4000_s17 + $0x28] sm:$0xff]  ;;  %3554 = vmatprep.subr.bf16.mxu1 %v3806_v33  ;;  %s597_s12 = scalar_lea.vmem %s4813_s9, %s3217_s29 }
  0x13   : > { %v627_v26 = vmul.f32 %v4014_v10, %v4043_v21  ;;  %v613_v36 = vld [vmem:[%s4000_s17 + $0x20] sm:$0xff]  ;;  %v629_v45 = vmul.f32 %v4014_v10, %v614_v40  ;;  %vm879_vm8 = vmpackc.low %vm4089_vm5, %vm4089_vm5  ;;  %v615_v55 = vld [vmem:[%s4000_s17 + $0x30] sm:$0xff]  ;;  %v906_v58 = vshrl.u32 %v4105_v48, 16  ;;  %v909_v59 = vshll.u32 %v4105_v48, 16 }
  0x14   : > { %v4031_v17 = vadd.f32 %v4020_v13, %v624_v11  ;;  %v4034_v18 = vadd.f32 %v4020_v13, %v625_v12  ;;  %v4066_v31 = vadd.f32 %v4020_v13, %v626_v25  ;;  %3619 = vmatpush3.bf16.msra.mxu0 %v3801_v15  ;;  %v628_v43 = vmul.f32 %v4014_v10, %v613_v36  ;;  %v616_v56 = vld [vmem:[%s4000_s17 + $0x38] sm:$0xff]  ;;  %vm880_vm10 = vmpackc.low %vm843_vm9, %vm843_vm9  ;;  %v3821_v48 = vld [vmem:[%s4807_s3 + $0xe8] sm:$0xff]  }
  0x15   : > { %v4069_v32 = vadd.f32 %v4020_v13, %v627_v26  ;;  %3628 = vmatprep.subr.bf16.mxu0 %v4054_v24  ;;  %3555 = vmatpush3.bf16.msra.mxu1 %v3806_v33  ;;  %v887_v51 = vsel %vm879_vm8, 65537, %v3897_v5  ;;  %v4117_v52 = vadd.f32 %v4020_v13, %v629_v45  ;;  %v630_v63 = vmul.f32 %v4014_v10, %v615_v55  ;;  %vm881_vm12 = vmpackc.low %vm844_vm11, %vm844_vm11 }
  0x16   : > { %v3222_v29 = vmul.f32 -1.442695, %v4031_v17  ;;  %v3223_v30 = vmul.f32 -1.442695, %v4034_v18  ;;  %v3224_v38 = vmul.f32 -1.442695, %v4066_v31  ;;  %v4108_v49 = vadd.f32 %v4020_v13, %v628_v43  ;;  %3564 = vmatprep.subr.bf16.mxu1 %v4113_v50  ;;  %vm1303_vm2 = vmpackc.low %vm4181_vm15, %vm4181_vm15 }
  0x17   : > { %v3225_v39 = vmul.f32 -1.442695, %v4069_v32  ;;  %v4125_v57 = vcombine.low %v886_v47, %v887_v51  ;;  %v3227_v61 = vmul.f32 -1.442695, %v4117_v52  ;;  %v908_v0 = vrot.slane %v906_v58, 4  ;;  %vm1304_vm5 = vmpackc.low %vm4190_vm1, %vm4190_vm1 }
  0x18   : > { %3837 = vpow2.f32 %v3222_v29  ;;  %v3226_v60 = vmul.f32 -1.442695, %v4108_v49  ;;  %v911_v1 = vrot.slane %v909_v59, 5  ;;  %v888_v4 = vsel %vm880_vm10, 65537, %v3897_v5  ;;  %vm1305_vm10 = vmpackc.low %vm4203_vm4, %vm4203_vm4 }
  0x19   : > { %3839 = vpow2.f32 %v3223_v30  ;;  %v914_v2 = vshrl.u32 %v4125_v57, 16  ;;  %v917_v3 = vshll.u32 %v4125_v57, 16  ;;  %v631_v6 = vmul.f32 %v4014_v10, %v616_v56  ;;  %v855_v10 = vld [vmem:[#allocation2] sm:$0xf8] }
  0x1a   : > { %3841 = vpow2.f32 %v3224_v38  ;;  %v4146_v12 = vor.u32 %v911_v1, %v908_v0  ;;  %v889_v25 = vsel %vm881_vm12, 65537, %v3897_v5  ;;  %v4150_v26 = vadd.f32 %v4020_v13, %v630_v63 }
  0x1b   : > { %3843 = vpow2.f32 %v3225_v39  ;;  %v4153_v29 = vadd.f32 %v4020_v13, %v631_v6  ;;  %v4155_v33 = vcombine.low %v888_v4, %v889_v25  ;;  %v916_v38 = vrot.slane %v914_v2, 4 }
  0x1c   : > { %3845 = vpow2.f32 %v3226_v60  ;;  %v919_v39 = vrot.slane %v917_v3, 5  ;;  %v3228_v40 = vmul.f32 -1.442695, %v4150_v26  ;;  %vm940_vm13 = vcmp.ne.s16.totalorder %v4146_v12, 0 }
  0x1d   : > { %3847 = vpow2.f32 %v3227_v61  ;;  %v4817_v43 = vshrl.u32 %v4155_v33, 16  ;;  %v3229_v44 = vmul.f32 -1.442695, %v4153_v29  ;;  %v4818_v45 = vshll.u32 %v4155_v33, 16 }
  0x1e   : > { %v4167_v47 = vadd.s32 48, %v4006_v7  ;;  %v4171_v51 = vsel %vm940_vm13, %v855_v10, 0  ;;  %v4174_v55 = vadd.s32 56, %v4006_v7  ;;  %v4185_v0 = vor.u32 %v919_v39, %v916_v38 }
  0x1f   : > { %v925_v56 = vrot.slane %v4817_v43, 4  ;;  %v928_v6 = vrot.slane %v4818_v45, 5  ;;  %vm4214_vm8 = vcmp.ne.s32.totalorder %v768_v37, 7  ;;  %v1311_v22 = vsel %vm1303_vm2, 65537, %v3897_v5 }
  0x20   : > { %v789_v60 = vand.u32 7, %v4167_v47  ;;  %v796_v1 = vand.u32 7, %v4174_v55  ;;  %v4224_v25 = vsel %vm904_vm14, %v4146_v12, %v4185_v0  ;;  %v968_v10 = vshrl.u32 %v4171_v51, 16  ;;  %vm1306_vm11 = vmpackc.low %vm4214_vm8, %vm4214_vm8  ;;  %v3809_v12 = vld [vmem:[%s4807_s3 + $0xb8] sm:$0xff]  }
  0x21   : > { %v1313_v39 = vsel %vm1305_vm10, 65537, %v3897_v5  ;;  %vm941_vm12 = vcmp.ne.s16.totalorder %v4224_v25, 0  ;;  %vm4254_vm15 = vcmp.ne.s32.totalorder %v775_v54, 7  ;;  %vm852_vm2 = vcmp.ne.s32.totalorder %v782_v62, 7  ;;  %v4426_v25 = vld [vmem:[%s4807_s3 + $0xc0] sm:$0xff]  }
  0x22   : > { %v3838_v11 = vpop.eup %3837  ;;  %vm845_vm3 = vcmp.ne.s32.totalorder %v789_v60, 0  ;;  %vm846_vm6 = vcmp.ne.s32.totalorder %v796_v1, 0  ;;  %vm1307_vm1 = vmpackc.low %vm4254_vm15, %vm4254_vm15  ;;  %vm1598_vm4 = vsmask.f32 256  ;;  %vm4308_vm8 = vcmp.ne.s32.totalorder %v796_v1, 7 }
  0x23   : > { %v3840_v15 = vpop.eup %3839  ;;  %v671_v19 = vadd.f32 1.0, %v3838_v11  ;;  %vm882_vm7 = vmpackc.low %vm845_vm3, %vm845_vm3 }
  0x24   : > { %v672_v30 = vadd.f32 1.0, %v3840_v15  ;;  %v3842_v36 = vpop.eup %3841  ;;  %vm883_vm9 = vmpackc.low %vm846_vm6, %vm846_vm6  ;;  %v890_v35 = vsel %vm882_vm7, 65537, %v3897_v5  ;;  %v1312_v15 = vsel %vm1304_vm5, 65537, %v3897_v5  ;;  %vm966_vm5 = vsmask.f32 4352 }
  0x25   : > { %3849 = vrcp.f32 %v671_v19  ;;  %v3844_v41 = vpop.eup %3843  ;;  %v673_v42 = vadd.f32 1.0, %v3842_v36  ;;  %v891_v23 = vsel %vm883_vm9, 65537, %v3897_v5  ;;  %v4230_v37 = vcombine.low %v1311_v22, %v1312_v15  ;;  %vm1308_vm3 = vmpackc.low %vm852_vm2, %vm852_vm2 }
  0x26   : > { %3851 = vrcp.f32 %v672_v30  ;;  %v674_v13 = vadd.f32 1.0, %v3844_v41  ;;  %v3846_v63 = vpop.eup %3845  ;;  %v4234_v38 = vcombine.low %v890_v35, %v891_v23  ;;  %v1314_v41 = vsel %vm1306_vm11, 65537, %v3897_v5 }
  0x27   : > { %3853 = vrcp.f32 %v673_v42  ;;  %v3848_v7 = vpop.eup %3847  ;;  %v675_v27 = vadd.f32 1.0, %v3846_v63  ;;  %v1332_v42 = vshrl.u32 %v4230_v37, 16  ;;  %v4247_v4 = vcombine.low %v1313_v39, %v1314_v41 }
  0x28   : > { %3855 = vrcp.f32 %v674_v13  ;;  %v676_v34 = vadd.f32 1.0, %v3848_v7  ;;  %v1335_v13 = vshll.u32 %v4230_v37, 16  ;;  %v4815_v61 = vshrl.u32 %v4234_v38, 16 }
  0x29   : > { %3857 = vpow2.f32 %v3228_v40  ;;  %v4816_v63 = vshll.u32 %v4234_v38, 16  ;;  %v1895_v16 = vrot.slane %v1332_v42, 7  ;;  %v1343_v35 = vshll.u32 %v4247_v4, 16 }
  0x2a   : > { %3859 = vpow2.f32 %v3229_v44  ;;  %v934_v11 = vrot.slane %v4815_v61, 4  ;;  %v1315_v39 = vsel %vm1307_vm1, 65537, %v3897_v5  ;;  %vm4300_vm7 = vcmp.ne.s32.totalorder %v789_v60, 7  ;;  %v4316_v60 = vld [vmem:[#allocation2] sm:$0xf0]  ;;  %vm1310_vm1 = vmpackc.low %vm4308_vm8, %vm4308_vm8 }
  0x2b   : > { %3861 = vrcp.f32 %v675_v27  ;;  %v937_v22 = vrot.slane %v4816_v63, 5  ;;  %vm1309_vm10 = vmpackc.low %vm4300_vm7, %vm4300_vm7  ;;  %vm1559_vm2 = vsmask.f32 7424 }
  0x2c   : > { %3863 = vrcp.f32 %v676_v34 }
  0x2d   : > { %v4273_v23 = vor.u32 %v937_v22, %v934_v11  ;;  %v3805_v11 = vld [vmem:[%s4807_s3 + $0xa8] sm:$0xff]  }
  0x2f   : > { %v3850_v19 = vpop.eup %3849 }
  0x30   : > { %v3852_v30 = vpop.eup %3851  ;;  %v695_v36 = vmul.f32 %v3850_v19, %v4031_v17  ;;  %v929_v17 = vor.u32 %v928_v6, %v925_v56 }
  0x31   : > { %v696_v40 = vmul.f32 %v3852_v30, %v4034_v18  ;;  %v3854_v44 = vpop.eup %3853 }
  0x32   : > { %v3856_v7 = vpop.eup %3855  ;;  %v697_v18 = vmul.f32 %v3854_v44, %v4066_v31  ;;  %v1340_v31 = vshrl.u32 %v4247_v4, 16  ;;  %v970_v44 = vrot.slane %v968_v10, 3  ;;  %v4296_v34 = vsel %vm904_vm14, %v929_v17, %v4273_v23 }
  0x33   : > { %v703_v27 = vpack.c.bf16 %v696_v40, %v695_v36  ;;  %v3858_v56 = vpop.eup %3857  ;;  %v698_v6 = vmul.f32 %v3856_v7, %v4069_v32  ;;  %v1896_v32 = vor.u32 %v1895_v16, %v1335_v13  ;;  %v971_v36 = vshll.u32 %v4171_v51, 16 }
  0x34   : > { %v3860_v46 = vpop.eup %3859  ;;  %v677_v54 = vadd.f32 1.0, %v3858_v56  ;;  %v4277_v30 = vrot.slane %v1340_v31, 7  ;;  %v1316_v40 = vsel %vm1308_vm3, 65537, %v3897_v5  ;;  %v4289_v51 = vsel %vm904_vm14, %v4185_v0, %v929_v17 }
  0x35   : > { %710 = vst.msk [vmem:[#allocation2 + $0x8] sm:$0xff] %vm707_vm0, %v703_v27  ;;  %v704_v15 = vpack.c.bf16 %v698_v6, %v697_v18  ;;  %v678_v19 = vadd.f32 1.0, %v3860_v46  ;;  %v3862_v41 = vpop.eup %3861  ;;  %v4291_v27 = vcombine.low %v1315_v39, %v1316_v40  ;;  %vm1906_vm6 = vcmp.ne.s16.totalorder %v1896_v32, 0 }
  0x36   : > { %3865 = vrcp.f32 %v677_v54  ;;  %v1898_v53 = vor.u32 %v4277_v30, %v1343_v35  ;;  %v3864_v62 = vpop.eup %3863  ;;  %v699_v7 = vmul.f32 %v3862_v41, %v4108_v49  ;;  %v973_v49 = vrot.slane %v971_v36, 4 }
  0x37   : > { %711 = vst.msk [vmem:[#allocation2 + $0x10] sm:$0xff] %vm707_vm0, %v704_v15  ;;  %3867 = vrcp.f32 %v678_v19  ;;  %v700_v18 = vmul.f32 %v3864_v62, %v4117_v52  ;;  %v1349_v0 = vshrl.u32 %v4291_v27, 16  ;;  %vm942_vm9 = vcmp.ne.s16.totalorder %v4289_v51, 0 }
  0x38   : > { %v1899_v10 = vsel %vm1598_vm4, %v1895_v16, %v1898_v53  ;;  %v1352_v47 = vshll.u32 %v4291_v27, 16  ;;  %vm943_vm11 = vcmp.ne.s16.totalorder %v4296_v34, 0  ;;  %v974_v15 = vor.u32 %v973_v49, %v970_v44  ;;  %v3807_v53 = vld [vmem:[%s4807_s3 + $0xb0] sm:$0xff]  }
  0x39   : > { %v705_v6 = vpack.c.bf16 %v700_v18, %v699_v7  ;;  %v4330_v16 = vrot.slane %v1349_v0, 7  ;;  %vm1907_vm15 = vcmp.ne.s16.totalorder %v1899_v10, 0  ;;  %vm1155_vm3 = vcmask 1043456   ;;  %v3815_v34 = vld [vmem:[%s4807_s3 + $0xd0] sm:$0xff]  }
  0x3a   : > { %v1156_v36 = vrot.slane %v4316_v60, 4  ;;  %v1317_v39 = vsel %vm1309_vm10, 65537, %v3897_v5 }
  0x3b   : > { %712 = vst.msk [vmem:[#allocation2 + $0x18] sm:$0xff] %vm707_vm0, %v705_v6  ;;  %v1901_v44 = vor.u32 %v4330_v16, %v1352_v47 }
  0x3c   : > { %v4312_v17 = vld [vmem:[#allocation2 + $0x8] sm:$0xff] }
  0x3d   : > { %3620 = vmatprep.mubr.msk.bf16.mxu0 %vm707_vm0, %v4312_v17  ;;  %v946_v55 = vsel %vm941_vm12, %v4312_v17, 0  ;;  %v1911_v1 = vsel %vm1906_vm6, %v4312_v17, 0  ;;  %v2086_v18 = vld [vmem:[#allocation2 + $0x8] sm:$0xf8]  ;;  %vm944_vm6 = vcmp.ne.s16.totalorder %v4273_v23, 0  ;;  %v3817_v23 = vld [vmem:[%s4807_s3 + $0xd8] sm:$0xff]  }
  0x3e   : > { %v976_v22 = vshrl.u32 %v946_v55, 16  ;;  %v979_v46 = vshll.u32 %v946_v55, 16  ;;  %v1936_v54 = vshll.u32 %v1911_v1, 16  ;;  %v4339_v32 = vld [vmem:[#allocation2 + $0x10] sm:$0xff]  ;;  %v1934_v19 = vshrl.u32 %v1911_v1, 16 }
  0x3f   : > { %3621 = vmatmul.mubr.msk.bf16.vlgmr.msra.gmra.mrb[0].mxu0 %vm707_vm0, %v4339_v32  ;;  %v947_v62 = vsel %vm942_vm9, %v4339_v32, 0  ;;  %v1912_v6 = vsel %vm1907_vm15, %v4339_v32, 0  ;;  %v1318_v55 = vsel %vm1310_vm1, 65537, %v3897_v5  ;;  %v4373_v63 = vsel %vm940_vm13, %v2086_v18, 0 }
  0x40   : > { %v978_v40 = vrot.slane %v976_v22, 3  ;;  %v981_v41 = vrot.slane %v979_v46, 4  ;;  %v3866_v7 = vpop.eup %3865  ;;  %3629 = vmatpush3.bf16.msra.mxu0 %v4054_v24  ;;  %v985_v56 = vshrl.u32 %v947_v62, 16  ;;  %v988_v49 = vshll.u32 %v947_v62, 16 }
  0x41   : > { %v3868_v1 = vpop.eup %3867  ;;  %3630 = vmatprep.subr.bf16.mxu0 %v3805_v11  ;;  %v701_v46 = vmul.f32 %v3866_v7, %v4150_v26  ;;  %v1938_v28 = vrot.slane %v1936_v54, 1  ;;  %v1941_v24 = vshll.u32 %v1912_v6, 16  ;;  %v1902_v5 = vsel %vm1598_vm4, %v4277_v30, %v1901_v44 }
  0x42   : > { %v982_v22 = vor.u32 %v981_v41, %v978_v40  ;;  %v987_v14 = vrot.slane %v985_v56, 3  ;;  %v990_v61 = vrot.slane %v988_v49, 4  ;;  %v702_v62 = vmul.f32 %v3868_v1, %v4153_v29  ;;  %v4383_v52 = vld [vmem:[#allocation2 + $0x18] sm:$0xff] }
  0x43   : > { %v4380_v26 = vrot.slane %v1332_v42, 3  ;;  %vm1908_vm13 = vcmp.ne.s16.totalorder %v1902_v5, 0  ;;  %3624 = vmatprep.mubr.msk.bf16.mxu0 %vm707_vm0, %v4383_v52  ;;  %v3810_v42 = vld [vmem:[%s4807_s3 + $0x28] sm:$0xff]   ;;  %v1943_v30 = vrot.slane %v1941_v24, 1  ;;  %v1945_v44 = vshrl.u32 %v1912_v6, 16 }
  0x44   : > { %v983_v10 = vsel %vm966_vm5, %v974_v15, %v982_v22  ;;  %3631 = vmatpush3.bf16.msra.mxu0 %v3805_v11  ;;  %v991_v29 = vor.u32 %v990_v61, %v987_v14  ;;  %v706_v54 = vpack.c.bf16 %v702_v62, %v701_v46  ;;  %v4388_v15 = vcombine.low %v1317_v39, %v1318_v55  ;;  %v1894_v62 = vld [vmem:[#allocation2 + $0x28] sm:$0x1] }
  0x45   : > { %3556 = vmatprep.mubr.msk.bf16.mxu1 %vm707_vm0, %v983_v10  ;;  %3632 = vmatprep.subr.bf16.mxu0 %v3807_v53  ;;  %v948_v14 = vsel %vm943_vm11, %v4383_v52, 0  ;;  %v1939_v61 = vor.u32 %v1938_v28, %v1934_v19  ;;  %v1157_v11 = vrot.slane %v4312_v17, 4  ;;  %v4403_v39 = vsel %vm942_vm9, %v4383_v52, 0 }
  0x46   : > { %v992_v40 = vsel %vm966_vm5, %v982_v22, %v991_v29  ;;  %713 = vst.msk [vmem:[#allocation2 + $0x20] sm:$0xff] %vm707_vm0, %v706_v54  ;;  %v994_v41 = vshrl.u32 %v948_v14, 16  ;;  %v997_v7 = vshll.u32 %v948_v14, 16  ;;  %v4409_v28 = vsel %vm1908_vm13, %v4383_v52, 0 }
  0x47   : > { %3557 = vmatmul.mubr.msk.bf16.vlgmr.msra.gmra.mrb[0].mxu1 %vm707_vm0, %v992_v40  ;;  %v1358_v19 = vshrl.u32 %v4388_v15, 16  ;;  %v1361_v18 = vshll.u32 %v4388_v15, 16  ;;  %v4416_v51 = vsel %vm941_vm12, %v4339_v32, 0  ;;  %v2114_v49 = vshrl.u32 %v4373_v63, 16  ;;  %v3819_v15 = vld [vmem:[%s4807_s3 + $0xe0] sm:$0xff]  }
  0x48   : > { %3633 = vmatpush3.bf16.msra.mxu0 %v3807_v53  ;;  %3565 = vmatpush3.bf16.msra.mxu1 %v4113_v50  ;;  %v996_v56 = vrot.slane %v994_v41, 3  ;;  %v1337_v6 = vrot.slane %v1335_v13, 4  ;;  %v999_v55 = vrot.slane %v997_v7, 4  ;;  %v1944_v1 = vsel %vm1559_vm2, %v1939_v61, %v1943_v30  ;;  %v3812_v50 = vld [vmem:[%s4807_s3 + $0x30] sm:$0xff]  }
  0x49   : > { %3634 = vmatprep.subr.bf16.mxu0 %v3809_v12  ;;  %3566 = vmatprep.subr.bf16.mxu1 %v3810_v42  ;;  %v4434_v53 = vsel %vm1155_vm3, %v1156_v36, %v1157_v11  ;;  %v1903_v37 = vrot.slane %v1358_v19, 7  ;;  %v2131_v13 = vshrl.u32 %v4403_v39, 16  ;;  %v1947_v22 = vor.u32 %v1945_v44, %v1943_v30 }
  0x4a   : > { %v1949_v46 = vshll.u32 %v4409_v28, 16  ;;  %v4441_v24 = vrot.slane %v4339_v32, 4  ;;  %v1000_v10 = vor.u32 %v999_v55, %v996_v56  ;;  %v2117_v60 = vshll.u32 %v4373_v63, 16  ;;  %v3814_v63 = vld [vmem:[%s4807_s3 + $0x38] sm:$0xff]   ;;  %v4477_v55 = vld [vmem:[%s4807_s3 + $0x40] sm:$0xff]  }
  0x4b   : > { %v1904_v5 = vor.u32 %v1903_v37, %v1361_v18  ;;  %vm1910_vm12 = vcmp.ne.s16.totalorder %v1903_v37, 0  ;;  %v2134_v36 = vshll.u32 %v4403_v39, 16  ;;  %v1953_v54 = vshrl.u32 %v4409_v28, 16 }
  0x4c   : > { %3635 = vmatpush3.bf16.msra.mxu0 %v3809_v12  ;;  %3567 = vmatpush3.bf16.msra.mxu1 %v3810_v42  ;;  %v4449_v14 = vrot.slane %v4383_v52, 4  ;;  %v2122_v61 = vshrl.u32 %v4416_v51, 16  ;;  %v1001_v40 = vsel %vm966_vm5, %v991_v29, %v1000_v10  ;;  %v1915_v42 = vsel %vm1910_vm12, %v1894_v62, 0 }
  0x4d   : > { %v4452_v30 = vld [vmem:[#allocation2 + $0x20] sm:$0xff]  ;;  %3644 = vmatprep.subr.bf16.mxu0 %v4426_v25  ;;  %3568 = vmatprep.subr.bf16.mxu1 %v3812_v50  ;;  %v1905_v12 = vsel %vm1598_vm4, %v4330_v16, %v1904_v5  ;;  %v4461_v44 = vrot.slane %v2114_v49, 3  ;;  %v1951_v7 = vrot.slane %v1949_v46, 1  ;;  %v4470_v28 = vsel %vm1155_vm3, %v1157_v11, %v4441_v24 }
  0x4e   : > { %v859_v41 = vld [vmem:[#allocation2 + $0x20] sm:$0xf]  ;;  %3625 = vmatmul.mubr.msk.bf16.gmra.mrb[4].mxu0 %vm707_vm0, %v4452_v30  ;;  %3560 = vmatprep.mubr.msk.bf16.mxu1 %vm707_vm0, %v1001_v40  ;;  %vm1909_vm7 = vcmp.ne.s16.totalorder %v1905_v12, 0  ;;  %v4479_v37 = vrot.slane %v2117_v60, 4  ;;  %v1965_v62 = vshll.u32 %v1915_v42, 16  ;;  %v2124_v5 = vrot.slane %v2122_v61, 3 }
  0x4f   : > { %v949_v29 = vsel %vm944_vm6, %v859_v41, 0  ;;  %3636 = vmatprep.mubr.msk.bf16.mxu0 %vm707_vm0, %v1944_v1  ;;  %v1914_v49 = vsel %vm1909_vm7, %v4452_v30, 0  ;;  %v2125_v11 = vshll.u32 %v4416_v51, 16  ;;  %v1282_v40 = vld [vmem:[#allocation2] sm:$0xf0]  ;;  %v1955_v12 = vor.u32 %v1953_v54, %v1951_v7 }
  0x50   : > { %v1003_v16 = vshrl.u32 %v949_v29, 16  ;;  %v1006_v56 = vshll.u32 %v949_v29, 16  ;;  %3569 = vmatpush3.bf16.msra.mxu1 %v3812_v50  ;;  %v1957_v46 = vshll.u32 %v1914_v49, 16  ;;  %v4485_v29 = vsel %vm1155_vm3, %v4441_v24, %v4449_v14  ;;  %v1132_v43 = vld [vmem:[#allocation2 + $0x20] sm:$0xf] }
  0x51   : > { %3570 = vmatprep.subr.bf16.mxu1 %v3814_v63  ;;  %v1952_v60 = vsel %vm1559_vm2, %v1947_v22, %v1951_v7  ;;  %v1961_v50 = vshrl.u32 %v1914_v49, 16  ;;  %v4489_v42 = vor.u32 %v1337_v6, %v4380_v26  ;;  %v2120_v51 = vor.u32 %v4479_v37, %v4461_v44  ;;  %v2090_v44 = vld [vmem:[#allocation2 + $0x28] sm:$0xf] }
  0x52   : > { %v1005_v41 = vrot.slane %v1003_v16, 3  ;;  %v1008_v1 = vrot.slane %v1006_v56, 4  ;;  %v1959_v45 = vrot.slane %v1957_v46, 1  ;;  %v1342_v54 = vrot.slane %v1340_v31, 3  ;;  %v3813_v56 = vld [vmem:[%s4807_s3 + $0xc8] sm:$0xff]  }
  0x53   : > { %v1345_v16 = vrot.slane %v1343_v35, 4  ;;  %v1967_v22 = vrot.slane %v1965_v62, 1  ;;  %v2127_v7 = vrot.slane %v2125_v11, 4  ;;  %v1163_v49 = vrot.slane %v1132_v43, 4 }
  0x54   : > { %v1009_v61 = vor.u32 %v1008_v1, %v1005_v41  ;;  %3571 = vmatpush3.bf16.msra.mxu1 %v3814_v63  ;;  %vm1366_vm8 = vcmp.ne.s16.totalorder %v4489_v42, 0  ;;  %v1960_v6 = vsel %vm1559_vm2, %v1955_v12, %v1959_v45  ;;  %v1963_v35 = vor.u32 %v1961_v50, %v1959_v45 }
  0x55   : > { %3580 = vmatprep.subr.bf16.mxu1 %v4477_v55  ;;  %v1346_v31 = vor.u32 %v1345_v16, %v1342_v54  ;;  %v1371_v4 = vsel %vm1366_vm8, %v1282_v40, 0  ;;  %v2133_v43 = vrot.slane %v2131_v13, 3  ;;  %v2136_v63 = vrot.slane %v2134_v36, 4 }
  0x56   : > { %v1010_v26 = vsel %vm966_vm5, %v1000_v10, %v1009_v61  ;;  %3637 = vmatmul.mubr.msk.bf16.vlgmr.msra.gmra.mrb[0].mxu0 %vm707_vm0, %v1952_v60  ;;  %v2094_v10 = vsel %vm943_vm11, %v4452_v30, 0  ;;  %v1394_v46 = vshrl.u32 %v1371_v4, 16  ;;  %v1397_v45 = vshll.u32 %v1371_v4, 16 }
  0x57   : > { %3561 = vmatmul.mubr.msk.bf16.gmra.mrb[4].mxu1 %vm707_vm0, %v1010_v26  ;;  %3645 = vmatpush3.bf16.msra.mxu0 %v4426_v25  ;;  %v4518_v37 = vsel %vm966_vm5, %v4489_v42, %v1346_v31  ;;  %v1351_v39 = vrot.slane %v1349_v0, 3  ;;  %v2128_v25 = vor.u32 %v2127_v7, %v2124_v5  ;;  %v1354_v13 = vrot.slane %v1352_v47, 4  ;;  %v3818_v47 = vld [vmem:[%s4807_s3 + $0x48] sm:$0xff]  }
  0x58   : > { %3572 = vmatprep.mubr.msk.bf16.mxu1 %vm707_vm0, %v4434_v53  ;;  %3646 = vmatprep.subr.bf16.mxu0 %v3813_v56  ;;  %v4528_v53 = vsel %vm1155_vm3, %v4449_v14, %v1163_v49  ;;  %vm1367_vm9 = vcmp.ne.s16.totalorder %v4518_v37, 0  ;;  %v2140_v36 = vshrl.u32 %v2094_v10, 16  ;;  %v2143_v62 = vshll.u32 %v2094_v10, 16 }
  0x59   : > { %3640 = vmatprep.mubr.msk.bf16.mxu0 %vm707_vm0, %v1960_v6  ;;  %v1372_v0 = vsel %vm1367_vm9, %v4312_v17, 0  ;;  %v2095_v11 = vsel %vm944_vm6, %v2090_v44, 0  ;;  %v4538_v40 = vor.u32 %v2136_v63, %v2133_v43  ;;  %v1355_v1 = vor.u32 %v1354_v13, %v1351_v39  ;;  %v1286_v43 = vld [vmem:[#allocation2 + $0x20] sm:$0x1f] }
  0x5a   : > { %v1402_v5 = vshrl.u32 %v1372_v0, 16  ;;  %v1405_v41 = vshll.u32 %v1372_v0, 16  ;;  %v1968_v12 = vsel %vm1559_vm2, %v1963_v35, %v1967_v22  ;;  %v4541_v60 = vrot.slane %v1394_v46, 4 }
  0x5b   : > { %3647 = vmatpush3.bf16.msra.mxu0 %v3813_v56  ;;  %v4543_v27 = vrot.slane %v1397_v45, 5  ;;  %v1360_v17 = vrot.slane %v1358_v19, 3  ;;  %v4554_v50 = vsel %vm966_vm5, %v1346_v31, %v1355_v1  ;;  %v2149_v61 = vshrl.u32 %v2095_v11, 16 }
  0x5c   : > { %3648 = vmatprep.subr.bf16.mxu0 %v3815_v34  ;;  %v2152_v54 = vshll.u32 %v2095_v11, 16  ;;  %v1363_v16 = vrot.slane %v1361_v18, 4  ;;  %v2129_v56 = vsel %vm966_vm5, %v2120_v51, %v2128_v25  ;;  %v2142_v19 = vrot.slane %v2140_v36, 3 }
  0x5d   : > { %v2145_v22 = vrot.slane %v2143_v62, 4  ;;  %vm1368_vm10 = vcmp.ne.s16.totalorder %v4554_v50, 0  ;;  %v1404_v7 = vrot.slane %v1402_v5, 4  ;;  %v1407_v49 = vrot.slane %v1405_v41, 5  ;;  %v1555_v62 = vld [vmem:[#allocation2 + $0x8] sm:$0xff] }
  0x5e   : > { %3641 = vmatmul.mubr.msk.bf16.gmra.mrb[4].mxu0 %vm707_vm0, %v1968_v12  ;;  %v1373_v26 = vsel %vm1368_vm10, %v4339_v32, 0  ;;  %v4566_v6 = vor.u32 %v1363_v16, %v1360_v17  ;;  %v1400_v18 = vor.u32 %v4543_v27, %v4541_v60  ;;  %v4576_v31 = vrot.slane %v909_v59, 1  ;;  %v3820_v32 = vld [vmem:[%s4807_s3 + $0x50] sm:$0xff]  }
  0x5f   : > { %3573 = vmatmul.mubr.msk.bf16.vlgmr.msra.gmra.mrb[0].mxu1 %vm707_vm0, %v4470_v28  ;;  %3649 = vmatpush3.bf16.msra.mxu0 %v3815_v34  ;;  %v1411_v28 = vshrl.u32 %v1373_v26, 16  ;;  %v1414_v51 = vshll.u32 %v1373_v26, 16  ;;  %v2154_v4 = vrot.slane %v2152_v54, 4  ;;  %v2146_v59 = vor.u32 %v2145_v22, %v2142_v19 }
  0x60   : > { %3581 = vmatpush3.bf16.msra.mxu1 %v4477_v55  ;;  %3650 = vmatprep.subr.bf16.mxu0 %v3817_v23  ;;  %v2151_v55 = vrot.slane %v2149_v61, 3  ;;  %v4583_v35 = vsel %vm966_vm5, %v1355_v1, %v4566_v6  ;;  %vm1370_vm11 = vcmp.ne.s16.totalorder %v4566_v6, 0  ;;  %v1408_v44 = vor.u32 %v1407_v49, %v1404_v7  ;;  %v2274_v1 = vld [vmem:[#allocation2 + $0x8] sm:$0xf0] }
  0x61   : > { %3582 = vmatprep.subr.bf16.mxu1 %v3818_v47  ;;  %3576 = vmatprep.mubr.msk.bf16.mxu1 %vm707_vm0, %v4485_v29  ;;  %v1413_v63 = vrot.slane %v1411_v28, 4  ;;  %v1416_v10 = vrot.slane %v1414_v51, 5  ;;  %vm1369_vm15 = vcmp.ne.s16.totalorder %v4583_v35, 0  ;;  %v1561_v45 = vor.u32 %v4576_v31, %v906_v58  ;;  %v3822_v58 = vld [vmem:[%s4807_s3 + $0x58] sm:$0xff]   ;;  %v2427_v49 = vld [vmem:[#allocation2 + $0x8] sm:$0xf0] }
  0x62   : > { %3652 = vmatprep.mubr.msk.bf16.mxu0 %vm707_vm0, %v2129_v56  ;;  %v1374_v46 = vsel %vm1369_vm15, %v4383_v52, 0  ;;  %v1562_v39 = vrot.slane %v917_v3, 1  ;;  %v2138_v34 = vsel %vm966_vm5, %v2128_v25, %v4538_v40  ;;  %v1375_v36 = vsel %vm1370_vm11, %v1286_v43, 0  ;;  %v1556_v56 = vld [vmem:[#allocation2 + $0x10] sm:$0xff]  ;;  %v3833_v35 = vld [vmem:[%s4810_s6] sm:$0xff]  }
  0x63   : > { %3651 = vmatpush3.bf16.msra.mxu0 %v3817_v23  ;;  %v1420_v13 = vshrl.u32 %v1374_v46, 16  ;;  %v1423_v0 = vshll.u32 %v1374_v46, 16  ;;  %v2155_v3 = vor.u32 %v2154_v4, %v2151_v55  ;;  %v1417_v25 = vor.u32 %v1416_v10, %v1413_v63 }
  0x64   : > { %3583 = vmatpush3.bf16.msra.mxu1 %v3818_v47  ;;  %3660 = vmatprep.subr.bf16.mxu0 %v3819_v15  ;;  %v1563_v11 = vsel %vm1559_vm2, %v1561_v45, %v1562_v39  ;;  %v1564_v12 = vor.u32 %v1562_v39, %v914_v2  ;;  %v1409_v60 = vsel %vm904_vm14, %v1400_v18, %v1408_v44  ;;  %v1429_v17 = vshrl.u32 %v1375_v36, 16  ;;  %v1554_v47 = vld [vmem:[#allocation2] sm:$0x80] }
  0x65   : > { %3584 = vmatprep.subr.bf16.mxu1 %v3820_v32  ;;  %v1422_v5 = vrot.slane %v1420_v13, 4  ;;  %v1425_v41 = vrot.slane %v1423_v0, 5  ;;  %v2147_v27 = vsel %vm966_vm5, %v4538_v40, %v2146_v59  ;;  %vm1572_vm1 = vcmp.ne.s16.totalorder %v1563_v11, 0  ;;  %v3824_v40 = vld [vmem:[%s4807_s3 + $0x60] sm:$0xff]  }
  0x66   : > { %3653 = vmatmul.mubr.msk.bf16.vlgmr.msra.gmra.mrb[0].mxu0 %vm707_vm0, %v2138_v34  ;;  %v1432_v23 = vshll.u32 %v1375_v36, 16  ;;  %vm1571_vm6 = vcmp.ne.s16.totalorder %v4576_v31, 0  ;;  %v1577_v57 = vsel %vm1572_vm1, %v1555_v62, 0  ;;  %v4835_v2 = vshll.u32 %v4155_v33, 16  ;;  %v3825_v31 = vld [vmem:[%s4807_s3 + $0xf8] sm:$0xff]   ;;  %v3827_v36 = vld [vmem:[%s4807_s3 + $0x100] sm:$0xff]  }
  0x67   : > { %3577 = vmatmul.mubr.msk.bf16.gmra.mrb[4].mxu1 %vm707_vm0, %v4528_v53  ;;  %3661 = vmatpush3.bf16.msra.mxu0 %v3819_v15  ;;  %v3823_v53 = vld [vmem:[%s4807_s3 + $0xf0] sm:$0xff]   ;;  %v2156_v54 = vsel %vm966_vm5, %v2146_v59, %v2155_v3  ;;  %v2301_v16 = vrot.slane %v2274_v1, 4  ;;  %v1418_v19 = vsel %vm904_vm14, %v1408_v44, %v1417_v25  ;;  %v1426_v22 = vor.u32 %v1425_v41, %v1422_v5  ;;  %v2429_v5 = vld [vmem:[#allocation2 + $0x18] sm:$0xff] }
  0x68   : > { %3585 = vmatpush3.bf16.msra.mxu1 %v3820_v32  ;;  %v1565_v61 = vrot.slane %v4835_v2, 1  ;;  %3662 = vmatprep.subr.bf16.mxu0 %v3821_v48  ;;  %v1576_v26 = vsel %vm1571_vm6, %v1554_v47, 0  ;;  %v1604_v15 = vshrl.u32 %v1577_v57, 16  ;;  %v4836_v18 = vshrl.u32 %v4155_v33, 16  ;;  %v3826_v33 = vld [vmem:[%s4807_s3 + $0x68] sm:$0xff]   ;;  %v3830_v47 = vld [vmem:[%s4807_s3 + $0x78] sm:$0xff]  }
  0x69   : > { %3586 = vmatprep.subr.bf16.mxu1 %v3822_v58  ;;  %3588 = vmatprep.mubr.msk.bf16.mxu1 %vm707_vm0, %v1409_v60  ;;  %v1431_v51 = vrot.slane %v1429_v17, 4  ;;  %v1434_v32 = vrot.slane %v1432_v23, 5  ;;  %v4837_v4 = vshll.u32 %v4234_v38, 16  ;;  %v2303_v59 = vsel %vm1155_vm3, %v2301_v16, %v4441_v24  ;;  %v2278_v17 = vld [vmem:[#allocation2 + $0x28] sm:$0xf] }
  0x6a   : > { %3656 = vmatprep.mubr.msk.bf16.mxu0 %vm707_vm0, %v2147_v27  ;;  %v1566_v7 = vsel %vm1559_vm2, %v1564_v12, %v1565_v61  ;;  %v1567_v28 = vor.u32 %v1565_v61, %v4836_v18  ;;  %v2432_v63 = vsel %vm1366_vm8, %v2427_v49, 0  ;;  %v1427_v10 = vsel %vm904_vm14, %v1417_v25, %v1426_v22 }
  0x6b   : > { %vm1573_vm13 = vcmp.ne.s16.totalorder %v1566_v7, 0  ;;  %3663 = vmatpush3.bf16.msra.mxu0 %v3821_v48  ;;  %v1568_v43 = vrot.slane %v4837_v4, 1  ;;  %v1600_v44 = vshrl.u32 %v1576_v26, 16  ;;  %v1607_v46 = vshll.u32 %v1577_v57, 16  ;;  %v3828_v48 = vld [vmem:[%s4807_s3 + $0x70] sm:$0xff]  }
  0x6c   : > { %3587 = vmatpush3.bf16.msra.mxu1 %v3822_v58  ;;  %v4635_v55 = vsel %vm1573_vm13, %v1556_v56, 0  ;;  %3664 = vmatprep.subr.bf16.mxu0 %v3823_v53  ;;  %v4653_v39 = vrot.slane %v1604_v15, 7  ;;  %v2433_v24 = vsel %vm1367_vm9, %v1556_v56, 0  ;;  %v1435_v42 = vor.u32 %v1434_v32, %v1431_v51  ;;  %v2431_v32 = vld [vmem:[#allocation2 + $0x28] sm:$0x1f] }
  0x6d   : > { %3596 = vmatprep.subr.bf16.mxu1 %v3824_v40  ;;  %v1569_v45 = vsel %vm1559_vm2, %v1567_v28, %v1568_v43  ;;  %v1612_v34 = vshrl.u32 %v4635_v55, 16  ;;  %v2455_v0 = vshrl.u32 %v2432_v63, 16  ;;  %v2306_v58 = vrot.slane %v4452_v30, 4 }
  0x6e   : > { %3657 = vmatmul.mubr.msk.bf16.gmra.mrb[4].mxu0 %vm707_vm0, %v2156_v54  ;;  %vm1574_vm5 = vcmp.ne.s16.totalorder %v1569_v45, 0  ;;  %v2458_v3 = vshll.u32 %v2432_v63, 16  ;;  %v2466_v62 = vshll.u32 %v2433_v24, 16  ;;  %v4838_v11 = vshrl.u32 %v4234_v38, 16  ;;  %v3829_v38 = vld [vmem:[%s4807_s3 + $0x108] sm:$0xff]   ;;  %v3832_v63 = vld [vmem:[%s4807_s3 + $0x118] sm:$0xff]  }
  0x6f   : > { %3589 = vmatmul.mubr.msk.bf16.vlgmr.msra.gmra.mrb[0].mxu1 %vm707_vm0, %v1418_v19  ;;  %3665 = vmatpush3.bf16.msra.mxu0 %v3823_v53  ;;  %v1579_v13 = vsel %vm1574_vm5, %v4383_v52, 0  ;;  %v2463_v52 = vshrl.u32 %v2433_v24, 16  ;;  %v1602_v41 = vrot.slane %v1600_v44, 7  ;;  %v1609_v1 = vor.u32 %v1607_v46, %v4653_v39 }
  0x70   : > { %3597 = vmatpush3.bf16.msra.mxu1 %v3824_v40  ;;  %3666 = vmatprep.subr.bf16.mxu0 %v3825_v31  ;;  %v1620_v37 = vshrl.u32 %v1579_v13, 16  ;;  %v1570_v25 = vor.u32 %v1568_v43, %v4838_v11  ;;  %v1614_v12 = vrot.slane %v1612_v34, 7  ;;  %v1615_v60 = vshll.u32 %v4635_v55, 16  ;;  %v3834_v34 = vld [vmem:[%s4810_s6 + $0x8] sm:$0xff]  }
  0x71   : > { %3598 = vmatprep.subr.bf16.mxu1 %v3826_v33  ;;  %3592 = vmatprep.mubr.msk.bf16.mxu1 %vm707_vm0, %v1427_v10  ;;  %v1436_v27 = vsel %vm904_vm14, %v1426_v22, %v1435_v42  ;;  %v2457_v23 = vrot.slane %v2455_v0, 4  ;;  %v1623_v2 = vshll.u32 %v1579_v13, 16  ;;  %v2434_v53 = vsel %vm1368_vm10, %v2429_v5, 0 }
  0x72   : > { %3668 = vmatprep.mubr.msk.bf16.mxu0 %vm707_vm0, %v2303_v59  ;;  %vm1575_vm2 = vcmp.ne.s16.totalorder %v1570_v25, 0  ;;  %v4679_v57 = vrot.slane %v1620_v37, 7  ;;  %v2460_v40 = vrot.slane %v2458_v3, 5  ;;  %v2465_v54 = vrot.slane %v2463_v52, 4  ;;  %v3835_v3 = vld [vmem:[%s4810_s6 + $0x10] sm:$0xff]  }
  0x73   : > { %3667 = vmatpush3.bf16.msra.mxu0 %v3825_v31  ;;  %v1580_v61 = vsel %vm1575_vm2, %v4452_v30, 0  ;;  %v2468_v16 = vrot.slane %v2466_v62, 5  ;;  %v2435_v56 = vsel %vm1369_vm15, %v4452_v30, 0  ;;  %v1610_v19 = vsel %vm1598_vm4, %v1602_v41, %v1609_v1  ;;  %v3831_v30 = vld [vmem:[%s4807_s3 + $0x110] sm:$0xff]   ;;  %v3836_v62 = vld [vmem:[%s4810_s6 + $0x18] sm:$0xff]   ;;  %v3869_v41 = vld [vmem:[%s4000_s17 + $0x20] sm:$0xff] }
  0x74   : > { %3599 = vmatpush3.bf16.msra.mxu1 %v3826_v33  ;;  %3676 = vmatprep.subr.bf16.mxu0 %v3827_v36  ;;  %v2307_v22 = vsel %vm1155_vm3, %v4449_v14, %v2306_v58  ;;  %v1617_v7 = vor.u32 %v1615_v60, %v1614_v12  ;;  %v2308_v50 = vrot.slane %v2278_v17, 4  ;;  %v1628_v49 = vshrl.u32 %v1580_v61, 16  ;;  %v3870_v1 = vld [vmem:[%s4000_s17 + $0x28] sm:$0xff] }
  0x75   : > { %3600 = vmatprep.subr.bf16.mxu1 %v3828_v48  ;;  %v2472_v26 = vshrl.u32 %v2434_v53, 16  ;;  %v2475_v15 = vshll.u32 %v2434_v53, 16  ;;  %v2481_v14 = vshrl.u32 %v2435_v56, 16  ;;  %v2484_v18 = vshll.u32 %v2435_v56, 16 }
  0x76   : > { %3669 = vmatmul.mubr.msk.bf16.vlgmr.msra.gmra.mrb[0].mxu0 %vm707_vm0, %v4485_v29  ;;  %v1625_v29 = vor.u32 %v1623_v2, %v4679_v57  ;;  %v2461_v28 = vor.u32 %v2460_v40, %v2457_v23  ;;  %v2469_v51 = vor.u32 %v2468_v16, %v2465_v54  ;;  %v1618_v55 = vsel %vm1598_vm4, %v4653_v39, %v1617_v7 }
  0x77   : > { %3593 = vmatmul.mubr.msk.bf16.gmra.mrb[4].mxu1 %vm707_vm0, %v1436_v27  ;;  %3677 = vmatpush3.bf16.msra.mxu0 %v3827_v36  ;;  %v2309_v4 = vsel %vm1155_vm3, %v2306_v58, %v2308_v50  ;;  %v1630_v43 = vrot.slane %v1628_v49, 7  ;;  %v1631_v31 = vshll.u32 %v1580_v61, 16  ;;  %v2474_v33 = vrot.slane %v2472_v26, 4 }
  0x78   : > { %3601 = vmatpush3.bf16.msra.mxu1 %v3828_v48  ;;  %3678 = vmatprep.subr.bf16.mxu0 %v3829_v38  ;;  %v2477_v59 = vrot.slane %v2475_v15, 5  ;;  %v1626_v10 = vsel %vm1598_vm4, %v1614_v12, %v1625_v29  ;;  %v2483_v44 = vrot.slane %v2481_v14, 4  ;;  %v2486_v46 = vrot.slane %v2484_v18, 5 }
  0x79   : > { %3602 = vmatprep.subr.bf16.mxu1 %v3830_v47  ;;  %3604 = vmatprep.mubr.msk.bf16.mxu1 %vm707_vm0, %v1610_v19  ;;  %v2436_v45 = vsel %vm1370_vm11, %v2431_v32, 0  ;;  %v2470_v39 = vsel %vm904_vm14, %v2461_v28, %v2469_v51  ;;  %v1633_v24 = vor.u32 %v1631_v31, %v1630_v43  ;;  %v4839_v25 = vpack.c.bf16 %v4012_v9, %v4009_v8  ;;  %v3871_v8 = vld [vmem:[%s4000_s17 + $0x30] sm:$0xff]  ;;  %v3872_v9 = vld [vmem:[%s4000_s17 + $0x38] sm:$0xff]  ;;  %v3383_v19 = vld [vmem:[%s570_s18] ss:$0 sm:$0xff]  ;;  %s3404_s17 = sshll.u32 %s4846_s13, 5 }
  0x7a   : > { %3672 = vmatprep.mubr.msk.bf16.mxu0 %vm707_vm0, %v2307_v22  ;;  %v2478_v42 = vor.u32 %v2477_v59, %v2474_v33  ;;  %v2490_v13 = vshrl.u32 %v2436_v45, 16  ;;  %v2493_v0 = vshll.u32 %v2436_v45, 16  ;;  %v2487_v6 = vor.u32 %v2486_v46, %v2483_v44  ;;  %s4766_s25 = scalar_lea.vmem %s4812_s8, %s3404_s17  ;;  %s4778_s28 = scalar_lea.vmem %s4814_s10, %s3404_s17 }
  0x7b   : > { %3679 = vmatpush3.bf16.msra.mxu0 %v3829_v38  ;;  %v1634_v36 = vsel %vm1598_vm4, %v4679_v57, %v1633_v24  ;;  %v2625_v12 = vpack.c.bf16 %v3870_v1, %v3869_v41  ;;  %v4840_v60 = vpack.c.bf16 %v4043_v21, %v4040_v20  ;;  %v2626_v27 = vpack.c.bf16 %v3872_v9, %v3871_v8  ;;  %v3382_v20 = vld [vmem:[%s4808_s4] ss:$0 sm:$0xff] }
  0x7c   : > { %3603 = vmatpush3.bf16.msra.mxu1 %v3830_v47  ;;  %3680 = vmatprep.subr.bf16.mxu0 %v3831_v30  ;;  %v2479_v48 = vsel %vm904_vm14, %v2469_v51, %v2478_v42  ;;  %v2492_v58 = vrot.slane %v2490_v13, 4  ;;  %v2495_v37 = vrot.slane %v2493_v0, 5  ;;  %v2488_v52 = vsel %vm904_vm14, %v2478_v42, %v2487_v6  ;;  %v4759_v51 = vld [vmem:[%s4811_s7] ss:$0 sm:$0xff] }
  0x7d   : > { %3692 = vmatprep.subr.bf16.mxu1 %v3833_v35 }
  0x7e   : > { %3673 = vmatmul.mubr.msk.bf16.gmra.mrb[4].mxu0 %vm707_vm0, %v2309_v4  ;;  %v2496_v11 = vor.u32 %v2495_v37, %v2492_v58 }
  0x7f   : > { %3605 = vmatmul.mubr.msk.bf16.vlgmr.msra.gmra.mrb[0].mxu1 %vm707_vm0, %v1618_v55  ;;  %3681 = vmatpush3.bf16.msra.mxu0 %v3831_v30 }
  0x80   : > { %3608 = vmatprep.mubr.msk.bf16.mxu1 %vm707_vm0, %v1626_v10  ;;  %3682 = vmatprep.subr.bf16.mxu0 %v3832_v63  ;;  %v2497_v5 = vsel %vm904_vm14, %v2487_v6, %v2496_v11 }
  0x81   : > { %3684 = vmatprep.mubr.msk.bf16.mxu0 %vm707_vm0, %v2470_v39  ;;  %3693 = vmatpush3.bf16.msra.mxu1 %v3833_v35 }
  0x82   : > { %3694 = vmatprep.subr.bf16.mxu1 %v3834_v34 }
  0x83   : > { %3683 = vmatpush3.bf16.msra.mxu0 %v3832_v63 }
  0x85   : > { %3695 = vmatpush3.bf16.msra.mxu1 %v3834_v34 }
  0x86   : > { %3685 = vmatmul.mubr.msk.bf16.vlgmr.msra.gmra.mrb[0].mxu0 %vm707_vm0, %v2479_v48  ;;  %3696 = vmatprep.subr.bf16.mxu1 %v3835_v3 }
  0x87   : > { %3609 = vmatmul.mubr.msk.bf16.gmra.mrb[4].mxu1 %vm707_vm0, %v1634_v36  ;;  %3688 = vmatprep.mubr.msk.bf16.mxu0 %vm707_vm0, %v2488_v52 }
  0x88   : > { %3700 = vmatprep.mubr.msk.bf16.mxu1 %vm707_vm0, %v4839_v25 }
  0x89   : > { %3697 = vmatpush3.bf16.msra.mxu1 %v3835_v3 }
  0x8a   : > { %3698 = vmatprep.subr.bf16.mxu1 %v3836_v62 }
  0x8d   : > { %3699 = vmatpush3.bf16.msra.mxu1 %v3836_v62 }
  0x8e   : > { %3689 = vmatmul.mubr.msk.bf16.gmra.mrb[4].mxu0 %vm707_vm0, %v2497_v5 }
  0x90   : > { %3701 = vmatmul.mubr.msk.bf16.vlgmr.msra.gmra.mrb[8].mxu1 %vm707_vm0, %v4840_v60 }
  0x91   : > { %3704 = vmatprep.mubr.msk.bf16.mxu1 %vm707_vm0, %v2625_v12 }
  0x98   : > { %3705 = vmatmul.mubr.msk.bf16.gmra.mrb[12].mxu1 %vm707_vm0, %v2626_v27  ;;  %vm2867_vm0 = vcmask 1040384  }
 0x152   : > { %v3606_v17 = vpop.f32.mrb[0].mxu1 }
 0x153   : > { %v1705_v23 = vpop.f32.mrb[1].mxu1 }
 0x154   : > { %v3607_v38 = vpop.f32.mrb[2].mxu1 }
 0x155   : > { %v1708_v47 = vpop.f32.mrb[3].mxu1 }
 0x159   : > { %v3686_v2 = vpop.f32.mrb[0].mxu0 }
 0x15a   : > { %v3610_v57 = vpop.f32.mrb[4].mxu1  ;;  %v3708_v21 = vadd.f32 %v3686_v2, %v3606_v17  ;;  %v2568_v53 = vpop.f32.mrb[1].mxu0 }
 0x15b   : > { %v1721_v61 = vpop.f32.mrb[5].mxu1  ;;  %v3709_v40 = vadd.f32 %v2568_v53, %v1705_v23  ;;  %v3687_v16 = vpop.f32.mrb[2].mxu0 }
 0x15c   : > { %v3611_v54 = vpop.f32.mrb[6].mxu1  ;;  %v2772_v56 = vadd.f32 %v3708_v21, %v3382_v20  ;;  %v3710_v22 = vadd.f32 %v3687_v16, %v3607_v38  ;;  %v2571_v50 = vpop.f32.mrb[3].mxu0 }
 0x15d   : > { %v1724_v7 = vpop.f32.mrb[7].mxu1  ;;  %v2770_v49 = vadd.f32 %v3709_v40, %v3382_v20  ;;  %v3711_v26 = vadd.f32 %v2571_v50, %v1708_v47 }
 0x15e   : > { %v2773_v15 = vadd.f32 %v3710_v22, %v3382_v20  ;;  %v2787_v35 = vadd.f32 %v3383_v19, %v2772_v56 }
 0x15f   : > { %v2785_v30 = vadd.f32 %v3383_v19, %v2770_v49  ;;  %v2771_v29 = vadd.f32 %v3711_v26, %v3382_v20 }
 0x160   : > { %v2788_v14 = vadd.f32 %v3383_v19, %v2773_v15  ;;  %v2848_v46 = vmul.f32 %v2787_v35, %v2787_v35 }
 0x161   : > { %v2786_v18 = vadd.f32 %v3383_v19, %v2771_v29  ;;  %v3690_v28 = vpop.f32.mrb[4].mxu0  ;;  %v2846_v32 = vmul.f32 %v2785_v30, %v2785_v30 }
 0x162   : > { %v3430_v55 = vpack.c.bf16 %v2788_v14, %v2787_v35  ;;  %v3712_v4 = vadd.f32 %v3690_v28, %v3610_v57  ;;  %v2584_v43 = vpop.f32.mrb[5].mxu0  ;;  %v2849_v58 = vmul.f32 %v2788_v14, %v2788_v14 }
 0x163   : > { %v3425_v31 = vpack.c.bf16 %v2786_v18, %v2785_v30  ;;  %v2833_v33 = vadd.f32 %v2786_v18, %v2785_v30  ;;  %v2847_v59 = vmul.f32 %v2786_v18, %v2786_v18  ;;  %v3713_v63 = vadd.f32 %v2584_v43, %v1721_v61  ;;  %v3691_v10 = vpop.f32.mrb[6].mxu0  ;;  %v3702_v44 = vpop.f32.mrb[8].mxu1 }
 0x164   : > { %v2776_v45 = vadd.f32 %v3712_v4, %v3382_v20  ;;  %v3714_v39 = vadd.f32 %v3691_v10, %v3611_v54  ;;  %v2587_v34 = vpop.f32.mrb[7].mxu0  ;;  %v2887_v24 = vadd.f32 %v3702_v44, %v4759_v51  ;;  %v2705_v42 = vpop.f32.mrb[9].mxu1  ;;  %3462 = vst [vmem:[%s4766_s25 + $0x8] sm:$0xff] %v3430_v55  }
 0x165   : > { %v2834_v13 = vadd.f32 %v2833_v33, %v2787_v35  ;;  %v2854_v0 = vadd.f32 %v2847_v59, %v2846_v32  ;;  %v2774_v6 = vadd.f32 %v3713_v63, %v3382_v20  ;;  %v3715_v36 = vadd.f32 %v2587_v34, %v1724_v7  ;;  %v3703_v48 = vpop.f32.mrb[10].mxu1  ;;  %3426 = vst [vmem:[%s4766_s25] sm:$0xff] %v3425_v31  }
 0x166   : > { %v2777_v37 = vadd.f32 %v3714_v39, %v3382_v20  ;;  %v2885_v3 = vadd.f32 %v4759_v51, %v2705_v42  ;;  %v2888_v52 = vadd.f32 %v3703_v48, %v4759_v51  ;;  %v2708_v62 = vpop.f32.mrb[11].mxu1  ;;  %v2791_v1 = vadd.f32 %v3383_v19, %v2776_v45 }
 0x167   : > { %v2855_v11 = vadd.f32 %v2854_v0, %v2848_v46  ;;  %v2789_v25 = vadd.f32 %v3383_v19, %v2774_v6  ;;  %v2835_v5 = vadd.f32 %v2834_v13, %v2788_v14  ;;  %v2775_v41 = vadd.f32 %v3715_v36, %v3382_v20 }
 0x168   : > { %v2792_v12 = vadd.f32 %v3383_v19, %v2777_v37  ;;  %v3450_v60 = vpack.c.bf16 %v2888_v52, %v2887_v24  ;;  %v2886_v8 = vadd.f32 %v4759_v51, %v2708_v62  ;;  %v2852_v54 = vmul.f32 %v2791_v1, %v2791_v1 }
 0x169   : > { %v2836_v9 = vadd.f32 %v2835_v5, %v2789_v25  ;;  %v2850_v27 = vmul.f32 %v2789_v25, %v2789_v25  ;;  %v2856_v17 = vadd.f32 %v2855_v11, %v2849_v58  ;;  %v2790_v23 = vadd.f32 %v3383_v19, %v2775_v41 }
 0x16a   : > { %v3440_v38 = vpack.c.bf16 %v2792_v12, %v2791_v1  ;;  %3465 = vst [vmem:[%s4778_s28 + $0x8] sm:$0xff] %v3450_v60   ;;  %v3445_v47 = vpack.c.bf16 %v2886_v8, %v2885_v3  ;;  %v2853_v49 = vmul.f32 %v2792_v12, %v2792_v12 }
 0x16b   : > { %v2857_v57 = vadd.f32 %v2856_v17, %v2850_v27  ;;  %v3435_v2 = vpack.c.bf16 %v2790_v23, %v2789_v25  ;;  %v2837_v20 = vadd.f32 %v2836_v9, %v2790_v23  ;;  %v2851_v21 = vmul.f32 %v2790_v23, %v2790_v23  ;;  %v3706_v61 = vpop.f32.mrb[12].mxu1 }
 0x16c   : > { %3464 = vst [vmem:[%s4766_s25 + $0x18] sm:$0xff] %v3440_v38   ;;  %3446 = vst [vmem:[%s4778_s28] sm:$0xff] %v3445_v47   ;;  %v2891_v53 = vadd.f32 %v3706_v61, %v4759_v51  ;;  %v2721_v40 = vpop.f32.mrb[13].mxu1 }
 0x16d   : > { %v2838_v16 = vadd.f32 %v2837_v20, %v2791_v1  ;;  %v2858_v56 = vadd.f32 %v2857_v57, %v2851_v21  ;;  %3463 = vst [vmem:[%s4766_s25 + $0x10] sm:$0xff] %v3435_v2   ;;  %v2889_v19 = vadd.f32 %v4759_v51, %v2721_v40  ;;  %v3707_v22 = vpop.f32.mrb[14].mxu1 }
 0x16e   : > { %v2892_v7 = vadd.f32 %v3707_v22, %v4759_v51  ;;  %v2724_v50 = vpop.f32.mrb[15].mxu1 }
 0x16f   : > { %v2839_v26 = vadd.f32 %v2838_v16, %v2792_v12  ;;  %v2859_v15 = vadd.f32 %v2858_v56, %v2852_v54  ;;  %v2890_v30 = vadd.f32 %v4759_v51, %v2724_v50 }
 0x170   : > { %v3460_v29 = vpack.c.bf16 %v2892_v7, %v2891_v53 }
 0x171   : > { %v2840_v35 = vrot.slane %v2839_v26, 4  ;;  %v2860_v14 = vadd.f32 %v2859_v15, %v2853_v49  ;;  %v3455_v18 = vpack.c.bf16 %v2890_v30, %v2889_v19 }
 0x172   : > { %3467 = vst [vmem:[%s4778_s28 + $0x18] sm:$0xff] %v3460_v29  }
 0x173   : > { %v2841_v28 = vadd.f32 %v2840_v35, %v2839_v26  ;;  %v2861_v32 = vrot.slane %v2860_v14, 4  ;;  %3466 = vst [vmem:[%s4778_s28 + $0x10] sm:$0xff] %v3455_v18  }
 0x175   : > { %v2842_v55 = vrot.slane %v2841_v28, 2  ;;  %v2862_v4 = vadd.f32 %v2861_v32, %v2860_v14 }
 0x177   : > { %v2843_v43 = vadd.f32 %v2842_v55, %v2841_v28  ;;  %v2863_v31 = vrot.slane %v2862_v4, 2 }
 0x179   : > { %v2844_v33 = vrot.slane %v2843_v43, 1  ;;  %v2864_v59 = vadd.f32 %v2863_v31, %v2862_v4 }
 0x17b   : > { %v2865_v63 = vrot.slane %v2864_v59, 1  ;;  %v2845_v51 = vadd.f32 %v2844_v33, %v2843_v43 }
 0x17d   : > { %v2866_v10 = vadd.f32 %v2865_v63, %v2864_v59 }
 0x17f   : > { %v2868_v44 = vsel %vm2867_vm0, %v2845_v51, %v2866_v10 }
 0x180   : > { %2869 = vst [vmem:[%s597_s12] sm:$0x3] %v2868_v44 }
 0x181 PF: > { %s21_s15 = sadd.s32 1, %s3895_s15   ;;  %s4841_s13 = smov %s3891_s14 }
 0x182   : > { %p18_p5 = scmp.ge.s32.totalorder %s21_s15, 4   ;;  %s4842_s14 = smov %s4844_s16 }
 0x184   :  { %20 = sbr.rel (!%p18_p5) target bundleno = 2 (0x2), region = 143 }

// kernel: unet_residual_block.5
= control target key start
LH: loop header
LB: loop body
LE: loop exit
PB: predicated region body
PF: predicated region fallthrough
CT: control target
= control target key end

     0   :  { %11 = vsyncpa [#allocation5], 0  ;;  %s4784_s0 = inlined_call_operand.vmem [shape: bf16[2,64,128], index: 0, kind: input, shape index: {}]   ;;  %s4785_s1 = inlined_call_operand.vmem [shape: f32[2,1,128], index: 1, kind: input, shape index: {}]   ;;  %s4786_s2 = inlined_call_operand.vmem [shape: f32[2,1,128], index: 2, kind: input, shape index: {}]   ;;  %s4787_s3 = inlined_call_operand.vmem [shape: bf16[9,128,128], index: 3, kind: input, shape index: {}]   ;;  %s4788_s4 = inlined_call_operand.vmem [shape: f32[1,1,128], index: 4, kind: input, shape index: {}]   ;;  %s4789_s5 = inlined_call_operand.vmem [shape: bf16[2,64,128], index: 5, kind: input, shape index: {}]   ;;  %s4790_s6 = inlined_call_operand.hbm [shape: f32[2,64,128], index: 6, kind: output, shape index: {}]  }
   0x1   :  { %13 = vsyncpa [#allocation5 + $0x1], 0  ;;  %s3818_s21 = smov 0   ;;  %s3820_s22 = smov 0  }
   0x2   :  { %s3822_s23 = smov 0   ;;  %s3824_s24 = smov 0  }
   0x3   :  { %s3826_s25 = smov 0   ;;  %s3828_s26 = smov 0  }
   0x4 LB: > { %s2856_s27 = sadd.s32 4294967295, %s3777_s26   ;;  %s2857_s28 = sadd.s32 4294967294, %s3777_s26   ;;  %s3777_s26 = sphi %s3828_s26, %s19_s26   ;;  %s3773_s25 = sphi %s3826_s25, %s4821_s25   ;;  %s3769_s24 = sphi %s3824_s24, %s4820_s24   ;;  %s3765_s23 = sphi %s3822_s23, %s4819_s23   ;;  %s3761_s22 = sphi %s3820_s22, %s4818_s22   ;;  %s3757_s21 = sphi %s3818_s21, %s4817_s21  }
   0x5   : > { %s38_s29 = sadd.s32 1, %s3773_s25  ;;  %s213_s30 = sadd.s32 1, %s3765_s23 }
   0x6   : > { %p40_p0 = scmp.ge.s32.totalorder %s38_s29, 2  ;;  %p223_p1 = scmp.ne.s32.totalorder %s3765_s23, %s3761_s22 }
   0x7   : > { %p224_p2 = scmp.eq.s32.totalorder %s2856_s27, 1  ;;  %p229_p3 = scmp.ne.s32.totalorder %s3761_s22, %s3757_s21 }
   0x8   : > { %s4823_s29 = smov (%p40_p0, %s38_s29), 0  ;;  %p230_p5 = scmp.eq.s32.totalorder %s2857_s28, 1 }
   0x9   : > { %p3858_p4 = por %p224_p2, %p223_p1  ;;  %s208_s8 = ssub.s32 %s3773_s25, %s4823_s29 }
   0xa   : > { %p2862_p6 = scmp.ge.s32.totalorder %s3777_s26, 1  ;;  %p211_p7 = scmp.eq.s32.totalorder %s208_s8, 0 }
   0xb   : > { %p3865_p8 = por %p230_p5, %p229_p3  ;;  %p306_p9 = scmp.lt.s32.totalorder %s3777_s26, 3 }
   0xc   : > { %s3871_s10 = scalar_select %p211_p7, %s3765_s23, %s213_s30  }
   0xd   : > { %p307_p10 = pnand %p2862_p6, %p306_p9 }
   0xe   : > { %v3595_v0 = vld [vmem:[%s4787_s3 + $0x100] sm:$0xff] (!%p307_p10)   ;;  %p370_p11 = scmp.lt.s32.totalorder (!%p307_p10), %s3769_s24, 1  ;;  %v537_v1 = vlaneseq (!%p307_p10)  ;;  %v3596_v2 = vld [vmem:[%s4787_s3 + $0x108] sm:$0xff] (!%p307_p10)   ;;  %v3779_v4 = vmov (!%p307_p10), 0   ;;  %v3598_v5 = vld [vmem:[%s4787_s3 + $0x110] sm:$0xff] (!%p307_p10)   ;;  %s367_s11 = sand.u32 (!%p307_p10), 1, %s3761_s22  }
   0xf   : > { %310 = sbr.rel (%p307_p10) target bundleno = 440 (0x1b8), region = 44  ;;  %3337 = vmatprep.subr.bf16.mxu0 (!%p307_p10), %v3595_v0  ;;  %v3597_v3 = vld [vmem:[%s4787_s3] sm:$0xff] (!%p307_p10)   ;;  %519 = vst [vmem:[#allocation2] sm:$0xff] (!%p307_p10), %v3779_v4  ;;  %520 = vst [vmem:[#allocation2 + $0x28] sm:$0xff] (!%p307_p10), %v3779_v4  ;;  %v3599_v7 = vld [vmem:[%s4787_s3 + $0x8] sm:$0xff] (!%p307_p10)   ;;  %s2863_s15 = sshll.u32 (!%p307_p10), %s367_s11, 6 }
  0x10   : > { %3338 = vmatpush3.bf16.msra.mxu0 (!%p307_p10), %v3595_v0  ;;  %v3888_v6 = vshrl.u32 (!%p307_p10), %v537_v1, 7  ;;  %3241 = vmatprep.subr.bf16.mxu1 (!%p307_p10), %v3597_v3  ;;  %v3601_v8 = vld [vmem:[%s4787_s3 + $0x10] sm:$0xff] (!%p307_p10)   ;;  %v3600_v11 = vld [vmem:[%s4787_s3 + $0x118] sm:$0xff] (!%p307_p10)   ;;  %v3602_v17 = vld [vmem:[%s4787_s3 + $0x120] sm:$0xff] (!%p307_p10)   ;;  %vm707_vm9 = vsmask.f32 (!%p307_p10), 3328 }
  0x11   : > { %3339 = vmatprep.subr.bf16.mxu0 (!%p307_p10), %v3596_v2  ;;  %3242 = vmatpush3.bf16.msra.mxu1 (!%p307_p10), %v3597_v3  ;;  %v3603_v13 = vld [vmem:[%s4787_s3 + $0x18] sm:$0xff] (!%p307_p10)   ;;  %v3604_v18 = vld [vmem:[%s4787_s3 + $0x128] sm:$0xff] (!%p307_p10)   ;;  %v3605_v19 = vld [vmem:[%s4787_s3 + $0x20] sm:$0xff] (!%p307_p10)  }
  0x12   : > { %3243 = vmatprep.subr.bf16.mxu1 (!%p307_p10), %v3599_v7  ;;  %v3902_v9 = vadd.s32 (!%p307_p10), 8, %v3888_v6  ;;  %v3905_v10 = vadd.s32 (!%p307_p10), 16, %v3888_v6  ;;  %v3912_v12 = vadd.s32 (!%p307_p10), 24, %v3888_v6  ;;  %v550_v14 = vand.u32 (!%p307_p10), 7, %v3888_v6  ;;  %v3607_v31 = vld [vmem:[%s4787_s3 + $0x28] sm:$0xff] (!%p307_p10)   ;;  %v3606_v36 = vld [vmem:[%s4787_s3 + $0x130] sm:$0xff] (!%p307_p10)  }
  0x13   : > { %v3970_v30 = vadd.s32 (!%p307_p10), 32, %v3888_v6  ;;  %v3990_v38 = vadd.s32 (!%p307_p10), 40, %v3888_v6  ;;  %v3609_v43 = vld [vmem:[%s4787_s3 + $0x30] sm:$0xff] (!%p307_p10)   ;;  %v3608_v47 = vld [vmem:[%s4787_s3 + $0x138] sm:$0xff] (!%p307_p10)  }
  0x14   : > { %3340 = vmatpush3.bf16.msra.mxu0 (!%p307_p10), %v3596_v2  ;;  %v557_v15 = vand.u32 (!%p307_p10), 7, %v3902_v9  ;;  %v564_v16 = vand.u32 (!%p307_p10), 7, %v3905_v10  ;;  %v571_v20 = vand.u32 (!%p307_p10), 7, %v3912_v12  ;;  %vm3950_vm0 = vcmp.ne.s32.totalorder (!%p307_p10), %v550_v14, 0  ;;  %v3611_v60 = vld [vmem:[%s4787_s3 + $0x38] sm:$0xff] (!%p307_p10)  }
  0x15   : > { %3341 = vmatprep.subr.bf16.mxu0 (!%p307_p10), %v3598_v5  ;;  %3244 = vmatpush3.bf16.msra.mxu1 (!%p307_p10), %v3599_v7  ;;  %vm679_vm4 = vmpackc.low (!%p307_p10), %vm3950_vm0, %vm3950_vm0  ;;  %v578_v46 = vand.u32 (!%p307_p10), 7, %v3970_v30  ;;  %v585_v56 = vand.u32 (!%p307_p10), 7, %v3990_v38  ;;  %vm4116_vm14 = vcmp.ne.s32.totalorder (!%p307_p10), %v550_v14, 7 }
  0x16   : > { %s3896_s27 = scalar_select %p370_p11, %s3769_s24, 1  ;;  %3245 = vmatprep.subr.bf16.mxu1 %v3601_v8  ;;  %vm3956_vm1 = vcmp.ne.s32.totalorder %v557_v15, 0  ;;  %vm3962_vm2 = vcmp.ne.s32.totalorder %v564_v16, 0  ;;  %vm3982_vm3 = vcmp.ne.s32.totalorder %v571_v20, 0  ;;  %v687_v44 = vsel %vm679_vm4, 65537, %v3779_v4 }
  0x17   : > { %vm680_vm5 = vmpackc.low %vm3956_vm1, %vm3956_vm1  ;;  %v658_v3 = vld [vmem:[#allocation2] sm:$0xf8]  ;;  %vm646_vm8 = vcmp.ne.s32.totalorder %v578_v46, 0  ;;  %vm647_vm10 = vcmp.ne.s32.totalorder %v585_v56, 0  ;;  %vm4144_vm4 = vcmp.ne.s32.totalorder %v557_v15, 7 }
  0x18   : > { %s3092_s12 = sshll.u32 %s3896_s27, 5  ;;  %3342 = vmatpush3.bf16.msra.mxu0 %v3598_v5  ;;  %s383_s30 = scalar_lea.vmem %s4785_s1, %s3896_s27  ;;  %vm681_vm6 = vmpackc.low %vm3962_vm2, %vm3962_vm2  ;;  %v688_v45 = vsel %vm680_vm5, 65537, %v3779_v4  ;;  %vm4150_vm5 = vcmp.ne.s32.totalorder %v564_v16, 7 }
  0x19   : > { %3343 = vmatprep.subr.bf16.mxu0 %v3600_v11  ;;  %s3928_s19 = scalar_lea.vmem %s4784_s0, %s3092_s12  ;;  %3246 = vmatpush3.bf16.msra.mxu1 %v3601_v8  ;;  %s389_s13 = scalar_lea.vmem %s4786_s2, %s3896_s27  ;;  %v3946_v22 = vld [vmem:[%s383_s30] ss:$0 sm:$0xff]  ;;  %vm682_vm7 = vmpackc.low %vm3982_vm3, %vm3982_vm3  ;;  %v689_v52 = vsel %vm681_vm6, 65537, %v3779_v4  ;;  %v4028_v54 = vcombine.low %v687_v44, %v688_v45 }
  0x1a   : > { %3247 = vmatprep.subr.bf16.mxu1 %v3603_v13  ;;  %v3096_v21 = vld [vmem:[%s3928_s19] sm:$0xff]   ;;  %v3127_v29 = vld [vmem:[%s3928_s19 + $0x8] sm:$0xff]   ;;  %v690_v53 = vsel %vm682_vm7, 65537, %v3779_v4  ;;  %v3128_v55 = vld [vmem:[%s3928_s19 + $0x10] sm:$0xff]   ;;  %vm4161_vm7 = vcmp.ne.s32.totalorder %v571_v20, 7  ;;  %s4705_s8 = scalar_lea.vmem %s4789_s5, %s3092_s12  ;;  %s4715_s27 = scalar_lea.vmem [#allocation4], %s2863_s15 }
  0x1b   : > { %v3097_v26 = vunpack.c.l.bf16 %v3096_v21  ;;  %v3098_v27 = vunpack.c.h.bf16 %v3096_v21  ;;  %v3966_v28 = vld [vmem:[%s389_s13] ss:$0 sm:$0xff]  ;;  %v3101_v34 = vunpack.c.l.bf16 %v3127_v29  ;;  %v3102_v35 = vunpack.c.h.bf16 %v3127_v29  ;;  %vm683_vm11 = vmpackc.low %vm646_vm8, %vm646_vm8  ;;  %v3129_v45 = vld [vmem:[%s3928_s19 + $0x18] sm:$0xff]   ;;  %s3094_s12 = sshll.u32 %s3769_s24, 10  ;;  %s2703_s16 = sshll.u32 %s4715_s27, 4  ;;  %s4731_s16 = int_to_ptr.vmem [resolvable:$true] %s2703_s16 }
  0x1c   : > { %3344 = vmatpush3.bf16.msra.mxu0 %v3600_v11  ;;  %v4034_v59 = vcombine.low %v689_v52, %v690_v53  ;;  %v709_v61 = vshrl.u32 %v4028_v54, 16  ;;  %v712_v62 = vshll.u32 %v4028_v54, 16  ;;  %v3105_v63 = vunpack.c.l.bf16 %v3128_v55  ;;  %v4051_v11 = vld [vmem:[%s4787_s3 + $0x140] sm:$0xff]   ;;  %vm684_vm12 = vmpackc.low %vm647_vm10, %vm647_vm10  ;;  %s4729_s20 = scalar_lea.hbm %s4790_s6, %s3094_s12  ;;  %s4738_s24 = scalar_lea.sflag [#allocation5], %s367_s11 }
  0x1d   : > { %3345 = vmatprep.subr.bf16.mxu0 %v3602_v17  ;;  %3248 = vmatpush3.bf16.msra.mxu1 %v3603_v13  ;;  %v436_v32 = vmul.f32 %v3097_v26, %v3946_v22  ;;  %v437_v33 = vmul.f32 %v3098_v27, %v3946_v22  ;;  %v438_v41 = vmul.f32 %v3101_v34, %v3946_v22  ;;  %v3106_v2 = vunpack.c.h.bf16 %v3128_v55  ;;  %v4065_v21 = vld [vmem:[%s4787_s3 + $0x40] sm:$0xff]   ;;  %vm1154_vm1 = vmpackc.low %vm4116_vm14, %vm4116_vm14  ;;  %s3699_s28 = scalar_lea.vmem %s4731_s16, 1024  ;;  %s3780_s19 = smov [#allocation4]  }
  0x1e   : > { %3249 = vmatprep.subr.bf16.mxu1 %v3605_v19  ;;  %v439_v42 = vmul.f32 %v3102_v35, %v3946_v22  ;;  %v717_v0 = vshrl.u32 %v4034_v59, 16  ;;  %v720_v1 = vshll.u32 %v4034_v59, 16  ;;  %v711_v5 = vrot.slane %v709_v61, 4  ;;  %vm1155_vm10 = vmpackc.low %vm4144_vm4, %vm4144_vm4  ;;  %p3700_p12 = scmp.ne.s32.totalorder %s4731_s16, %s3699_s28  ;;  %s3703_s30 = sshll.u32 %s3780_s19, 4  ;;  %s3704_s30 = int_to_ptr.vmem [resolvable:$false] %s3703_s30 }
  0x1f   : > { %v3993_v39 = vadd.f32 %v3966_v28, %v436_v32  ;;  %v3996_v40 = vadd.f32 %v3966_v28, %v437_v33  ;;  %v4018_v50 = vadd.f32 %v3966_v28, %v438_v41  ;;  %v714_v7 = vrot.slane %v712_v62, 5  ;;  %p3706_p1 = scmp.lt.s32.totalorder %s4731_s16, %s3704_s30 }
  0x20   : > { %3346 = vmatpush3.bf16.msra.mxu0 %v3602_v17  ;;  %v4021_v51 = vadd.f32 %v3966_v28, %v439_v42  ;;  %v440_v8 = vmul.f32 %v3105_v63, %v3946_v22  ;;  %v719_v13 = vrot.slane %v717_v0, 4  ;;  %v722_v17 = vrot.slane %v720_v1, 5  ;;  %p3701_p13 = pnand %p3700_p12, %p3858_p4 }
  0x21   : > { %3347 = vmatprep.subr.bf16.mxu0 %v3604_v18  ;;  %3250 = vmatpush3.bf16.msra.mxu1 %v3605_v19  ;;  %v2870_v48 = vmul.f32 -1.442695, %v3993_v39  ;;  %v2871_v49 = vmul.f32 -1.442695, %v3996_v40  ;;  %v2872_v57 = vmul.f32 -1.442695, %v4018_v50  ;;  %v4060_v19 = vor.u32 %v714_v7, %v711_v5 }
  0x22   : > { %3251 = vmatprep.subr.bf16.mxu1 %v3607_v31  ;;  %v2873_v58 = vmul.f32 -1.442695, %v4021_v51  ;;  %v4068_v23 = vadd.f32 %v3966_v28, %v440_v8  ;;  %v691_v25 = vsel %vm683_vm11, 65537, %v3779_v4  ;;  %v723_v26 = vor.u32 %v722_v17, %v719_v13  ;;  %vm1156_vm11 = vmpackc.low %vm4150_vm5, %vm4150_vm5  ;;  %p3702_p0 = pneg %p3701_p13 }
  0x23   : > { %3667 = vpow2.f32 %v2870_v48  ;;  %vm743_vm13 = vcmp.ne.s16.totalorder %v4060_v19, 0  ;;  %v692_v29 = vsel %vm684_vm12, 65537, %v3779_v4  ;;  %v4086_v34 = vadd.s32 48, %v3888_v6  ;;  %vm1157_vm12 = vmpackc.low %vm4161_vm7, %vm4161_vm7 }
  0x24   : > { %3348 = vmatpush3.bf16.msra.mxu0 %v3604_v18  ;;  %3669 = vpow2.f32 %v2871_v49  ;;  %v441_v18 = vmul.f32 %v3106_v2, %v3946_v22  ;;  %v2874_v27 = vmul.f32 -1.442695, %v4068_v23  ;;  %v4083_v33 = vcombine.low %v691_v25, %v692_v29 }
  0x25   : > { %3349 = vmatprep.subr.bf16.mxu0 %v3606_v36  ;;  %3252 = vmatpush3.bf16.msra.mxu1 %v3607_v31  ;;  %3671 = vpow2.f32 %v2872_v57  ;;  %v748_v31 = vsel %vm743_vm13, %v658_v3, 0  ;;  %v3109_v55 = vunpack.c.l.bf16 %v3129_v45  ;;  %v3110_v63 = vunpack.c.h.bf16 %v3129_v45 }
  0x26   : > { %3253 = vmatprep.subr.bf16.mxu1 %v3609_v43  ;;  %3673 = vpow2.f32 %v2873_v58  ;;  %v4073_v24 = vadd.f32 %v3966_v28, %v441_v18  ;;  %v729_v37 = vshll.u32 %v4083_v33, 16  ;;  %v779_v44 = vshrl.u32 %v748_v31, 16 }
  0x27   : > { %3675 = vpow2.f32 %v2874_v27  ;;  %v442_v5 = vmul.f32 %v3109_v55, %v3946_v22  ;;  %v443_v7 = vmul.f32 %v3110_v63, %v3946_v22  ;;  %v592_v8 = vand.u32 7, %v4086_v34 }
  0x28   : > { %3350 = vmatpush3.bf16.msra.mxu0 %v3606_v36  ;;  %v2875_v32 = vmul.f32 -1.442695, %v4073_v24  ;;  %v726_v36 = vshrl.u32 %v4083_v33, 16  ;;  %v731_v53 = vrot.slane %v729_v37, 5  ;;  %v4109_v17 = vrot.slane %v779_v44, 3 }
  0x29   : > { %3351 = vmatprep.subr.bf16.mxu0 %v3608_v47  ;;  %3254 = vmatpush3.bf16.msra.mxu1 %v3609_v43  ;;  %v4093_v43 = vsel %vm707_vm9, %v4060_v19, %v723_v26  ;;  %v4112_v18 = vadd.f32 %v3966_v28, %v442_v5  ;;  %v4125_v22 = vadd.f32 %v3966_v28, %v443_v7  ;;  %vm648_vm15 = vcmp.ne.s32.totalorder %v592_v8, 0  ;;  %v3623_v19 = vld [vmem:[%s4787_s3 + $0x68] sm:$0xff]  }
  0x2a   : > { %3255 = vmatprep.subr.bf16.mxu1 %v3611_v60  ;;  %3677 = vpow2.f32 %v2875_v32  ;;  %v728_v52 = vrot.slane %v726_v36, 4  ;;  %vm744_vm2 = vcmp.ne.s16.totalorder %v4093_v43, 0  ;;  %vm685_vm3 = vmpackc.low %vm648_vm15, %vm648_vm15  ;;  %v1162_v10 = vsel %vm1154_vm1, 65537, %v3779_v4 }
  0x2b   : > { %v2876_v14 = vmul.f32 -1.442695, %v4112_v18  ;;  %v2877_v32 = vmul.f32 -1.442695, %v4125_v22  ;;  %v1163_v20 = vsel %vm1155_vm10, 65537, %v3779_v4  ;;  %v1164_v44 = vsel %vm1156_vm11, 65537, %v3779_v4 }
  0x2c   : > { %3352 = vmatpush3.bf16.msra.mxu0 %v3608_v47  ;;  %v4097_v47 = vadd.s32 56, %v3888_v6  ;;  %v4103_v3 = vor.u32 %v731_v53, %v728_v52  ;;  %v4181_v45 = vcombine.low %v1162_v10, %v1163_v20  ;;  %vm4185_vm14 = vcmp.ne.s32.totalorder %v578_v46, 7 }
  0x2d   : > { %3361 = vmatprep.subr.bf16.mxu0 %v4051_v11  ;;  %3256 = vmatpush3.bf16.msra.mxu1 %v3611_v60  ;;  %v3668_v35 = vpop.eup %3667  ;;  %v782_v60 = vshll.u32 %v748_v31, 16  ;;  %v1165_v55 = vsel %vm1157_vm12, 65537, %v3779_v4  ;;  %vm777_vm15 = vsmask.f32 4352  ;;  %vm1158_vm1 = vmpackc.low %vm4185_vm14, %vm4185_vm14  ;;  %vm1481_vm4 = vsmask.f32 256 }
  0x2e   : > { %3265 = vmatprep.subr.bf16.mxu1 %v4065_v21  ;;  %v3670_v41 = vpop.eup %3669  ;;  %v483_v42 = vadd.f32 1.0, %v3668_v35  ;;  %v599_v13 = vand.u32 7, %v4097_v47  ;;  %v4122_v27 = vsel %vm707_vm9, %v723_v26, %v4103_v3  ;;  %v693_v35 = vsel %vm685_vm3, 65537, %v3779_v4 }
  0x2f   : > { %v3672_v48 = vpop.eup %3671  ;;  %v484_v49 = vadd.f32 1.0, %v3670_v41  ;;  %v4139_v6 = vrot.slane %v782_v60, 4  ;;  %vm745_vm8 = vcmp.ne.s16.totalorder %v4122_v27, 0  ;;  %v4193_v60 = vcombine.low %v1164_v44, %v1165_v55 }
  0x30   : > { %v3674_v57 = vpop.eup %3673  ;;  %3679 = vrcp.f32 %v483_v42  ;;  %v485_v58 = vadd.f32 1.0, %v3672_v48  ;;  %vm4131_vm0 = vcmp.ne.s32.totalorder %v599_v13, 0  ;;  %v1183_v63 = vshrl.u32 %v4181_v45, 16 }
  0x31   : > { %3681 = vrcp.f32 %v484_v49  ;;  %v486_v2 = vadd.f32 1.0, %v3674_v57  ;;  %v3676_v31 = vpop.eup %3675  ;;  %vm686_vm6 = vmpackc.low %vm4131_vm0, %vm4131_vm0  ;;  %v1186_v30 = vshll.u32 %v4181_v45, 16  ;;  %vm4204_vm0 = vcmp.ne.s32.totalorder %v585_v56, 7 }
  0x32   : > { %3683 = vrcp.f32 %v485_v58  ;;  %v487_v16 = vadd.f32 1.0, %v3676_v31  ;;  %v694_v41 = vsel %vm686_vm6, 65537, %v3779_v4  ;;  %v1191_v29 = vshrl.u32 %v4193_v60, 16  ;;  %vm1159_vm3 = vmpackc.low %vm4204_vm0, %vm4204_vm0 }
  0x33   : > { %3685 = vrcp.f32 %v486_v2  ;;  %v4171_v12 = vcombine.low %v693_v35, %v694_v41  ;;  %v1814_v28 = vrot.slane %v1183_v63, 7  ;;  %v1167_v35 = vsel %vm1159_vm3, 65537, %v3779_v4 }
  0x34   : > { %v3678_v15 = vpop.eup %3677  ;;  %3687 = vpow2.f32 %v2876_v14  ;;  %v1194_v14 = vshll.u32 %v4193_v60, 16  ;;  %v4228_v31 = vrot.slane %v1191_v29, 7  ;;  %vm656_vm10 = vcmp.ne.s32.totalorder %v592_v8, 7  ;;  %v3626_v60 = vld [vmem:[%s4787_s3 + $0x180] sm:$0xff]  }
  0x35   : > { %v488_v42 = vadd.f32 1.0, %v3678_v15  ;;  %3689 = vpow2.f32 %v2877_v32  ;;  %v735_v52 = vshrl.u32 %v4171_v12, 16  ;;  %v738_v53 = vshll.u32 %v4171_v12, 16  ;;  %vm1160_vm12 = vmpackc.low %vm656_vm10, %vm656_vm10  ;;  %v3639_v12 = vld [vmem:[%s4787_s3 + $0xa8] sm:$0xff]  }
  0x36   : > { %3691 = vrcp.f32 %v487_v16  ;;  %v1166_v32 = vsel %vm1158_vm1, 65537, %v3779_v4  ;;  %v785_v15 = vor.u32 %v4139_v6, %v4109_v17  ;;  %v1817_v44 = vor.u32 %v4228_v31, %v1194_v14 }
  0x37   : > { %3693 = vrcp.f32 %v488_v42  ;;  %v737_v5 = vrot.slane %v735_v52, 4  ;;  %v740_v7 = vrot.slane %v738_v53, 5  ;;  %v4258_v6 = vcombine.low %v1166_v32, %v1167_v35 }
  0x38   : > { %vm4318_vm11 = vcmp.ne.s32.totalorder %v599_v13, 7  ;;  %vm1434_vm0 = vsmask.f32 7424 }
  0x39   : > { %v4222_v26 = vor.u32 %v740_v7, %v737_v5  ;;  %v3614_v5 = vld [vmem:[%s4787_s3 + $0x150] sm:$0xff]   ;;  %vm1161_vm14 = vmpackc.low %vm4318_vm11, %vm4318_vm11 }
  0x3a   : > { %v3680_v49 = vpop.eup %3679 }
  0x3b   : > { %v3682_v57 = vpop.eup %3681  ;;  %v507_v58 = vmul.f32 %v3680_v49, %v3993_v39  ;;  %v4247_v16 = vsel %vm707_vm9, %v4103_v3, %v4222_v26  ;;  %vm747_vm3 = vcmp.ne.s16.totalorder %v4222_v26, 0 }
  0x3c   : > { %v3684_v46 = vpop.eup %3683  ;;  %v508_v2 = vmul.f32 %v3682_v57, %v3996_v40  ;;  %vm746_vm5 = vcmp.ne.s16.totalorder %v4247_v16, 0 }
  0x3d   : > { %v3686_v25 = vpop.eup %3685  ;;  %v509_v40 = vmul.f32 %v3684_v46, %v4018_v50  ;;  %v1815_v50 = vor.u32 %v1814_v28, %v1186_v30 }
  0x3e   : > { %v4219_v38 = vpack.c.bf16 %v508_v2, %v507_v58  ;;  %v510_v56 = vmul.f32 %v3686_v25, %v4021_v51  ;;  %v3612_v51 = vld [vmem:[%s4787_s3 + $0x148] sm:$0xff]   ;;  %v3688_v41 = vpop.eup %3687  ;;  %v1818_v25 = vsel %vm1481_vm4, %v1814_v28, %v1817_v44  ;;  %v1203_v44 = vshll.u32 %v4258_v6, 16 }
  0x3f   : > { %v3690_v48 = vpop.eup %3689  ;;  %v489_v3 = vadd.f32 1.0, %v3688_v41  ;;  %vm1825_vm6 = vcmp.ne.s16.totalorder %v1815_v50, 0  ;;  %vm1826_vm7 = vcmp.ne.s16.totalorder %v1818_v25, 0  ;;  %v3616_v50 = vld [vmem:[%s4787_s3 + $0x158] sm:$0xff]   ;;  %v3620_v25 = vld [vmem:[%s4787_s3 + $0x168] sm:$0xff]  }
  0x40   : > { %521 = vst [vmem:[#allocation2 + $0x8] sm:$0xff] %v4219_v38  ;;  %3353 = vmatprep.mubr.bf16.mxu0 %v4219_v38  ;;  %v4234_v9 = vpack.c.bf16 %v510_v56, %v509_v40  ;;  %v749_v10 = vsel %vm744_vm2, %v4219_v38, 0  ;;  %v3692_v49 = vpop.eup %3691  ;;  %v490_v39 = vadd.f32 1.0, %v3690_v48  ;;  %v1830_v35 = vsel %vm1825_vm6, %v4219_v38, 0 }
  0x41   : > { %v787_v42 = vshrl.u32 %v749_v10, 16  ;;  %v790_v20 = vshll.u32 %v749_v10, 16  ;;  %v3694_v2 = vpop.eup %3693  ;;  %v511_v7 = vmul.f32 %v3692_v49, %v4068_v23  ;;  %3695 = vrcp.f32 %v489_v3 }
  0x42   : > { %522 = vst [vmem:[#allocation2 + $0x10] sm:$0xff] %v4234_v9  ;;  %3354 = vmatmul.mubr.bf16.vlgmr.msra.gmra.mrb[0].mxu0 %v4234_v9  ;;  %v750_v17 = vsel %vm745_vm8, %v4234_v9, 0  ;;  %v512_v56 = vmul.f32 %v3694_v2, %v4073_v24  ;;  %3697 = vrcp.f32 %v490_v39  ;;  %v1200_v10 = vshrl.u32 %v4258_v6, 16  ;;  %v3615_v24 = vld [vmem:[%s4787_s3 + $0x48] sm:$0xff]   ;;  %v3619_v39 = vld [vmem:[%s4787_s3 + $0x58] sm:$0xff]  }
  0x43   : > { %3362 = vmatpush3.bf16.msra.mxu0 %v4051_v11  ;;  %v789_v55 = vrot.slane %v787_v42, 3  ;;  %v792_v57 = vrot.slane %v790_v20, 4  ;;  %v796_v58 = vshrl.u32 %v750_v17, 16  ;;  %v799_v46 = vshll.u32 %v750_v17, 16 }
  0x44   : > { %3363 = vmatprep.subr.bf16.mxu0 %v3612_v51  ;;  %v4271_v23 = vpack.c.bf16 %v512_v56, %v511_v7  ;;  %v4274_v28 = vsel %vm1826_vm7, %v4234_v9, 0  ;;  %v1863_v20 = vshll.u32 %v1830_v35, 16  ;;  %v1861_v49 = vshrl.u32 %v1830_v35, 16 }
  0x45   : > { %v793_v40 = vor.u32 %v792_v57, %v789_v55  ;;  %v798_v11 = vrot.slane %v796_v58, 3  ;;  %v801_v32 = vrot.slane %v799_v46, 4  ;;  %v1868_v3 = vshll.u32 %v4274_v28, 16  ;;  %v3617_v58 = vld [vmem:[%s4787_s3 + $0x50] sm:$0xff]   ;;  %v3618_v46 = vld [vmem:[%s4787_s3 + $0x160] sm:$0xff]  }
  0x46   : > { %523 = vst [vmem:[#allocation2 + $0x18] sm:$0xff] %v4271_v23  ;;  %3357 = vmatprep.mubr.bf16.mxu0 %v4271_v23  ;;  %v1865_v55 = vrot.slane %v1863_v20, 1  ;;  %v4293_v57 = vrot.slane %v1200_v10, 7  ;;  %v1168_v35 = vsel %vm1160_vm12, 65537, %v3779_v4  ;;  %v4336_v20 = vld [vmem:[#allocation2] sm:$0xf0] }
  0x47   : > { %3364 = vmatpush3.bf16.msra.mxu0 %v3612_v51  ;;  %v794_v41 = vsel %vm777_vm15, %v785_v15, %v793_v40  ;;  %v802_v42 = vor.u32 %v801_v32, %v798_v11  ;;  %v751_v15 = vsel %vm746_vm5, %v4271_v23, 0  ;;  %v4314_v56 = vrot.slane %v1868_v3, 1 }
  0x48   : > { %3257 = vmatprep.mubr.bf16.mxu1 %v794_v41  ;;  %3365 = vmatprep.subr.bf16.mxu0 %v3614_v5  ;;  %v805_v48 = vshrl.u32 %v751_v15, 16  ;;  %v808_v17 = vshll.u32 %v751_v15, 16  ;;  %v1866_v8 = vor.u32 %v1865_v55, %v1861_v49  ;;  %v1872_v49 = vshrl.u32 %v4274_v28, 16  ;;  %v3624_v28 = vld [vmem:[%s4787_s3 + $0x178] sm:$0xff]  }
  0x49   : > { %v803_v51 = vsel %vm777_vm15, %v793_v40, %v802_v42  ;;  %v991_v55 = vrot.slane %v4336_v20, 4  ;;  %v3629_v20 = vld [vmem:[%s4787_s3 + $0x80] sm:$0xff]   ;;  %v994_v27 = vrot.slane %v4234_v9, 4  ;;  %v4533_v26 = vld [vmem:[#allocation2 + $0x10] sm:$0xff] }
  0x4a   : > { %3258 = vmatmul.mubr.bf16.vlgmr.msra.gmra.mrb[0].mxu1 %v803_v51  ;;  %v807_v2 = vrot.slane %v805_v48, 3  ;;  %v810_v7 = vrot.slane %v808_v17, 4  ;;  %v3622_v48 = vld [vmem:[%s4787_s3 + $0x170] sm:$0xff]  }
  0x4b   : > { %3266 = vmatpush3.bf16.msra.mxu1 %v4065_v21  ;;  %3366 = vmatpush3.bf16.msra.mxu0 %v3614_v5  ;;  %v1820_v21 = vor.u32 %v4293_v57, %v1203_v44  ;;  %v3696_v5 = vpop.eup %3695 }
  0x4c   : > { %3267 = vmatprep.subr.bf16.mxu1 %v3615_v24  ;;  %3367 = vmatprep.subr.bf16.mxu0 %v3616_v50  ;;  %v4312_v40 = vor.u32 %v810_v7, %v807_v2  ;;  %v513_v34 = vmul.f32 %v3696_v5, %v4112_v18  ;;  %v3698_v47 = vpop.eup %3697  ;;  %v1169_v18 = vsel %vm1161_vm14, 65537, %v3779_v4  ;;  %v1871_v4 = vsel %vm1434_vm0, %v1866_v8, %v4314_v56 }
  0x4d   : > { %v1821_v32 = vsel %vm1481_vm4, %v4228_v31, %v1820_v21  ;;  %v514_v41 = vmul.f32 %v3698_v47, %v4125_v22  ;;  %v2035_v2 = vsel %vm744_vm2, %v4234_v9, 0  ;;  %v992_v7 = vrot.slane %v4219_v38, 4 }
  0x4e   : > { %v812_v13 = vsel %vm777_vm15, %v802_v42, %v4312_v40  ;;  %vm1827_vm1 = vcmp.ne.s16.totalorder %v1821_v32, 0  ;;  %v3621_v42 = vld [vmem:[%s4787_s3 + $0x60] sm:$0xff]   ;;  %vm990_vm2 = vcmask 1043456   ;;  %v2073_v8 = vshrl.u32 %v2035_v2, 16 }
  0x4f   : > { %3268 = vmatpush3.bf16.msra.mxu1 %v3615_v24  ;;  %3368 = vmatpush3.bf16.msra.mxu0 %v3616_v50  ;;  %v1832_v31 = vsel %vm1827_vm1, %v4271_v23, 0  ;;  %v4334_v24 = vcombine.low %v1168_v35, %v1169_v18  ;;  %v2029_v50 = vld [vmem:[#allocation2 + $0x8] sm:$0xf8]  ;;  %v4341_v51 = vpack.c.bf16 %v514_v41, %v513_v34  ;;  %v1185_v32 = vrot.slane %v1183_v63, 3 }
  0x50   : > { %3269 = vmatprep.subr.bf16.mxu1 %v3617_v58  ;;  %3369 = vmatprep.subr.bf16.mxu0 %v3618_v46  ;;  %v1876_v17 = vshll.u32 %v1832_v31, 16  ;;  %v2034_v3 = vsel %vm743_vm13, %v2029_v50, 0  ;;  %v1880_v21 = vshrl.u32 %v1832_v31, 16  ;;  %v2076_v35 = vshll.u32 %v2035_v2, 16  ;;  %v3627_v2 = vld [vmem:[%s4787_s3 + $0x78] sm:$0xff]  }
  0x51   : > { %3261 = vmatprep.mubr.bf16.mxu1 %v812_v13  ;;  %v1209_v22 = vshrl.u32 %v4334_v24, 16  ;;  %v1212_v15 = vshll.u32 %v4334_v24, 16  ;;  %524 = vst [vmem:[#allocation2 + $0x20] sm:$0xff] %v4341_v51  ;;  %3358 = vmatmul.mubr.bf16.gmra.mrb[4].mxu0 %v4341_v51  ;;  %v2065_v43 = vshrl.u32 %v2034_v3, 16  ;;  %v2068_v11 = vshll.u32 %v2034_v3, 16  ;;  %v3633_v24 = vld [vmem:[%s4787_s3 + $0x90] sm:$0xff]  }
  0x52   : > { %3377 = vmatprep.mubr.bf16.mxu0 %v1871_v4  ;;  %v1878_v34 = vrot.slane %v1876_v17, 1  ;;  %v1193_v47 = vrot.slane %v1191_v29, 3  ;;  %v1196_v41 = vrot.slane %v1194_v14, 4  ;;  %v1874_v63 = vor.u32 %v1872_v49, %v4314_v56  ;;  %v3625_v29 = vld [vmem:[%s4787_s3 + $0x70] sm:$0xff]   ;;  %v1133_v49 = vld [vmem:[#allocation2] sm:$0xf0] }
  0x53   : > { %3270 = vmatpush3.bf16.msra.mxu1 %v3617_v58  ;;  %3370 = vmatpush3.bf16.msra.mxu0 %v3618_v46  ;;  %v1822_v58 = vrot.slane %v1209_v22, 7  ;;  %v1813_v46 = vld [vmem:[#allocation2 + $0x28] sm:$0x1]  ;;  %v2075_v56 = vrot.slane %v2073_v8, 3  ;;  %v2078_v3 = vrot.slane %v2076_v35, 4 }
  0x54   : > { %3271 = vmatprep.subr.bf16.mxu1 %v3619_v39  ;;  %3371 = vmatprep.subr.bf16.mxu0 %v3620_v25  ;;  %v1882_v31 = vor.u32 %v1880_v21, %v1878_v34  ;;  %v3628_v21 = vld [vmem:[%s4787_s3 + $0x188] sm:$0xff]  }
  0x55   : > { %v1823_v5 = vor.u32 %v1822_v58, %v1212_v15  ;;  %vm1829_vm13 = vcmp.ne.s16.totalorder %v1822_v58, 0 }
  0x56   : > { %v1834_v13 = vsel %vm1829_vm13, %v1813_v46, 0 }
  0x57   : > { %3272 = vmatpush3.bf16.msra.mxu1 %v3619_v39  ;;  %3372 = vmatpush3.bf16.msra.mxu0 %v3620_v25  ;;  %v1188_v39 = vrot.slane %v1186_v30, 4  ;;  %v1824_v25 = vsel %vm1481_vm4, %v4293_v57, %v1823_v5  ;;  %v4385_v30 = vrot.slane %v2065_v43, 3  ;;  %v4387_v57 = vrot.slane %v2068_v11, 4 }
  0x58   : > { %3273 = vmatprep.subr.bf16.mxu1 %v3621_v42  ;;  %3373 = vmatprep.subr.bf16.mxu0 %v3622_v48  ;;  %vm1828_vm6 = vcmp.ne.s16.totalorder %v1824_v25, 0  ;;  %v662_v14 = vld [vmem:[#allocation2 + $0x20] sm:$0xf]  ;;  %v1892_v17 = vshll.u32 %v1834_v13, 16  ;;  %v1879_v11 = vsel %vm1434_vm0, %v1874_v63, %v1878_v34  ;;  %v2036_v13 = vsel %vm745_vm8, %v4271_v23, 0 }
  0x59   : > { %v4379_v18 = vor.u32 %v1188_v39, %v1185_v32  ;;  %v1833_v45 = vsel %vm1828_vm6, %v4341_v51, 0  ;;  %v752_v4 = vsel %vm747_vm3, %v662_v14, 0  ;;  %v2071_v63 = vor.u32 %v4387_v57, %v4385_v30 }
  0x5a   : > { %v1884_v50 = vshll.u32 %v1833_v45, 16  ;;  %v814_v58 = vshrl.u32 %v752_v4, 16  ;;  %v817_v46 = vshll.u32 %v752_v4, 16  ;;  %v1894_v34 = vrot.slane %v1892_v17, 1 }
  0x5b   : > { %3274 = vmatpush3.bf16.msra.mxu1 %v3621_v42  ;;  %3374 = vmatpush3.bf16.msra.mxu0 %v3622_v48  ;;  %v4395_v42 = vor.u32 %v1196_v41, %v1193_v47  ;;  %v1888_v48 = vshrl.u32 %v1833_v45, 16  ;;  %vm1217_vm7 = vcmp.ne.s16.totalorder %v4379_v18, 0  ;;  %v4437_v45 = vor.u32 %v2078_v3, %v2075_v56  ;;  %v3632_v56 = vld [vmem:[%s4787_s3 + $0x198] sm:$0xff]  }
  0x5c   : > { %3275 = vmatprep.subr.bf16.mxu1 %v3623_v19  ;;  %3375 = vmatprep.subr.bf16.mxu0 %v3624_v28  ;;  %v1886_v5 = vrot.slane %v1884_v50, 1  ;;  %v816_v8 = vrot.slane %v814_v58, 3  ;;  %v819_v32 = vrot.slane %v817_v46, 4  ;;  %v1222_v35 = vsel %vm1217_vm7, %v1133_v49, 0  ;;  %v3634_v49 = vld [vmem:[%s4787_s3 + $0x1a0] sm:$0xff]  }
  0x5d   : > { %v4408_v43 = vsel %vm777_vm15, %v4379_v18, %v4395_v42  ;;  %v1256_v14 = vshll.u32 %v1222_v35, 16  ;;  %v996_v57 = vrot.slane %v4271_v23, 4  ;;  %v2080_v6 = vsel %vm777_vm15, %v2071_v63, %v4437_v45 }
  0x5e   : > { %vm1218_vm10 = vcmp.ne.s16.totalorder %v4408_v43, 0  ;;  %v820_v39 = vor.u32 %v819_v32, %v816_v8  ;;  %v1887_v25 = vsel %vm1434_vm0, %v1882_v31, %v1886_v5  ;;  %v2082_v4 = vshrl.u32 %v2036_v13, 16  ;;  %v3657_v43 = vld [vmem:[%s4787_s3 + $0xf0] sm:$0xff]  }
  0x5f   : > { %3276 = vmatpush3.bf16.msra.mxu1 %v3623_v19  ;;  %3376 = vmatpush3.bf16.msra.mxu0 %v3624_v28  ;;  %v993_v19 = vsel %vm990_vm2, %v991_v55, %v992_v7  ;;  %v1890_v28 = vor.u32 %v1888_v48, %v1886_v5  ;;  %v1223_v47 = vsel %vm1218_vm10, %v4219_v38, 0  ;;  %v3630_v55 = vld [vmem:[%s4787_s3 + $0x190] sm:$0xff]   ;;  %v2085_v48 = vshll.u32 %v2036_v13, 16  ;;  %v2245_v13 = vld [vmem:[#allocation2 + $0x28] sm:$0xf] }
  0x60   : > { %3277 = vmatprep.subr.bf16.mxu1 %v3625_v29  ;;  %3385 = vmatprep.subr.bf16.mxu0 %v3626_v60  ;;  %v821_v41 = vsel %vm777_vm15, %v4312_v40, %v820_v39  ;;  %v1253_v40 = vshrl.u32 %v1222_v35, 16  ;;  %v1261_v31 = vshrl.u32 %v1223_v47, 16  ;;  %v1264_v50 = vshll.u32 %v1223_v47, 16  ;;  %v2033_v35 = vld [vmem:[#allocation2 + $0x28] sm:$0xf] }
  0x61   : > { %3262 = vmatmul.mubr.bf16.gmra.mrb[4].mxu1 %v821_v41  ;;  %v1895_v30 = vsel %vm1434_vm0, %v1890_v28, %v1894_v34  ;;  %v995_v3 = vsel %vm990_vm2, %v992_v7, %v994_v27  ;;  %v1258_v58 = vrot.slane %v1256_v14, 5  ;;  %v1214_v38 = vrot.slane %v1212_v15, 4 }
  0x62   : > { %3378 = vmatmul.mubr.bf16.vlgmr.msra.gmra.mrb[0].mxu0 %v1879_v11  ;;  %3281 = vmatprep.mubr.bf16.mxu1 %v993_v19  ;;  %v1255_v17 = vrot.slane %v1253_v40, 4  ;;  %v1263_v46 = vrot.slane %v1261_v31, 4  ;;  %v1266_v5 = vrot.slane %v1264_v50, 5  ;;  %v1211_v11 = vrot.slane %v1209_v22, 3 }
  0x63   : > { %3278 = vmatpush3.bf16.msra.mxu1 %v3625_v29  ;;  %3386 = vmatpush3.bf16.msra.mxu0 %v3626_v60  ;;  %v1202_v29 = vrot.slane %v1200_v10, 3  ;;  %v1205_v60 = vrot.slane %v1203_v44, 4  ;;  %v3631_v10 = vld [vmem:[%s4787_s3 + $0x88] sm:$0xff]   ;;  %v959_v44 = vld [vmem:[#allocation2 + $0x20] sm:$0xf]  ;;  %v4467_v7 = vrot.slane %v712_v62, 1 }
  0x64   : > { %3279 = vmatprep.subr.bf16.mxu1 %v3627_v2  ;;  %3387 = vmatprep.subr.bf16.mxu0 %v3628_v21  ;;  %v998_v8 = vrot.slane %v959_v44, 4  ;;  %v2037_v22 = vsel %vm746_vm5, %v4341_v51, 0  ;;  %v3636_v62 = vld [vmem:[%s4787_s3 + $0x1a8] sm:$0xff]   ;;  %v2084_v15 = vrot.slane %v2082_v4, 3  ;;  %v1259_v39 = vor.u32 %v1258_v58, %v1255_v17  ;;  %v4546_v4 = vld [vmem:[#allocation2 + $0x20] sm:$0xff] }
  0x65   : > { %3381 = vmatprep.mubr.bf16.mxu0 %v1887_v25  ;;  %v4482_v25 = vor.u32 %v1266_v5, %v1263_v46  ;;  %v2087_v16 = vrot.slane %v2085_v48, 4  ;;  %v4487_v19 = vor.u32 %v1214_v38, %v1211_v11  ;;  %v1437_v28 = vrot.slane %v720_v1, 1  ;;  %v4552_v46 = vld [vmem:[#allocation2 + $0x18] sm:$0xff]  ;;  %v3642_v5 = vld [vmem:[%s4787_s3 + $0x1c0] sm:$0xff]  }
  0x66   : > { %v999_v34 = vsel %vm990_vm2, %v996_v57, %v998_v8  ;;  %v2091_v47 = vshrl.u32 %v2037_v22, 16  ;;  %v2094_v41 = vshll.u32 %v2037_v22, 16  ;;  %v2281_v63 = vrot.slane %v4341_v51, 4  ;;  %v3661_v51 = vld [vmem:[%s4787_s3 + $0x210] sm:$0xff]  }
  0x67   : > { %3280 = vmatpush3.bf16.msra.mxu1 %v3627_v2  ;;  %3388 = vmatpush3.bf16.msra.mxu0 %v3628_v21  ;;  %v1206_v2 = vor.u32 %v1205_v60, %v1202_v29  ;;  %v997_v21 = vsel %vm990_vm2, %v994_v27, %v996_v57  ;;  %v1268_v1 = vsel %vm707_vm9, %v1259_v39, %v4482_v25  ;;  %v3638_v27 = vld [vmem:[%s4787_s3 + $0x1b0] sm:$0xff]   ;;  %v1440_v40 = vrot.slane %v729_v37, 1  ;;  %v3637_v60 = vld [vmem:[%s4787_s3 + $0xa0] sm:$0xff]  }
  0x68   : > { %3289 = vmatprep.subr.bf16.mxu1 %v3629_v20  ;;  %3389 = vmatprep.subr.bf16.mxu0 %v3630_v55  ;;  %v4505_v59 = vor.u32 %v2087_v16, %v2084_v15  ;;  %v2283_v29 = vrot.slane %v2245_v13, 4  ;;  %v2093_v31 = vrot.slane %v2091_v47, 3  ;;  %v1443_v57 = vrot.slane %v738_v53, 1 }
  0x69   : > { %v4471_v32 = vsel %vm777_vm15, %v4395_v42, %v1206_v2  ;;  %v1436_v42 = vor.u32 %v4467_v7, %v709_v61  ;;  %v1439_v61 = vor.u32 %v1437_v28, %v717_v0  ;;  %v4509_v0 = vsel %vm777_vm15, %v1206_v2, %v4487_v19 }
  0x6a   : > { %3382 = vmatmul.mubr.bf16.gmra.mrb[4].mxu0 %v1895_v30  ;;  %3282 = vmatmul.mubr.bf16.vlgmr.msra.gmra.mrb[0].mxu1 %v995_v3  ;;  %vm1219_vm8 = vcmp.ne.s16.totalorder %v4471_v32, 0  ;;  %v2038_v30 = vsel %vm747_vm3, %v2033_v35, 0  ;;  %v2096_v37 = vrot.slane %v2094_v41, 4  ;;  %vm1220_vm11 = vcmp.ne.s16.totalorder %v4509_v0, 0 }
  0x6b   : > { %3390 = vmatpush3.bf16.msra.mxu0 %v3630_v55  ;;  %3401 = vmatprep.mubr.bf16.mxu0 %v2080_v6  ;;  %v1438_v54 = vsel %vm1434_vm0, %v1436_v42, %v1437_v28  ;;  %v1430_v55 = vld [vmem:[#allocation2 + $0x8] sm:$0xff]  ;;  %v4519_v14 = vsel %vm1219_vm8, %v4234_v9, 0  ;;  %v3640_v9 = vld [vmem:[%s4787_s3 + $0x1b8] sm:$0xff]   ;;  %v4538_v53 = vsel %vm990_vm2, %v2281_v63, %v2283_v29  ;;  %v1442_v6 = vor.u32 %v1440_v40, %v726_v36  ;;  %v3641_v28 = vld [vmem:[%s4787_s3 + $0xb0] sm:$0xff]  }
  0x6c   : > { %3391 = vmatprep.subr.bf16.mxu0 %v3632_v56  ;;  %3290 = vmatpush3.bf16.msra.mxu1 %v3629_v20  ;;  %v3635_v20 = vld [vmem:[%s4787_s3 + $0x98] sm:$0xff]   ;;  %vm1447_vm5 = vcmp.ne.s16.totalorder %v1438_v54, 0  ;;  %v1445_v48 = vor.u32 %v1443_v57, %v735_v52  ;;  %v2100_v33 = vshrl.u32 %v2038_v30, 16  ;;  %v2103_v36 = vshll.u32 %v2038_v30, 16  ;;  %v3644_v54 = vld [vmem:[%s4787_s3 + $0x1c8] sm:$0xff]  }
  0x6d   : > { %3285 = vmatprep.mubr.bf16.mxu1 %v997_v21  ;;  %3291 = vmatprep.subr.bf16.mxu1 %v3631_v10  ;;  %v4526_v50 = vsel %vm1447_vm5, %v1430_v55, 0  ;;  %v1444_v58 = vsel %vm1434_vm0, %v1442_v6, %v1443_v57  ;;  %v1225_v52 = vsel %vm1220_vm11, %v4271_v23, 0  ;;  %v1273_v39 = vshll.u32 %v4519_v14, 16  ;;  %v2241_v29 = vld [vmem:[#allocation2 + $0x8] sm:$0xf0] }
  0x6e   : > { %v1487_v17 = vshrl.u32 %v4526_v50, 16  ;;  %vm1449_vm14 = vcmp.ne.s16.totalorder %v1444_v58, 0  ;;  %vm1450_vm1 = vcmp.ne.s16.totalorder %v1445_v48, 0  ;;  %v2102_v42 = vrot.slane %v2100_v33, 3  ;;  %v3648_v33 = vld [vmem:[%s4787_s3 + $0x1d8] sm:$0xff]  }
  0x6f   : > { %3392 = vmatpush3.bf16.msra.mxu0 %v3632_v56  ;;  %v1441_v56 = vsel %vm1434_vm0, %v1439_v61, %v1440_v40  ;;  %v1454_v2 = vsel %vm1449_vm14, %v4552_v46, 0  ;;  %v1455_v21 = vsel %vm1450_vm1, %v4546_v4, 0  ;;  %v1279_v47 = vshrl.u32 %v1225_v52, 16  ;;  %v1137_v61 = vld [vmem:[#allocation2 + $0x20] sm:$0x1f] }
  0x70   : > { %3393 = vmatprep.subr.bf16.mxu0 %v3634_v49  ;;  %3292 = vmatpush3.bf16.msra.mxu1 %v3631_v10  ;;  %vm1448_vm12 = vcmp.ne.s16.totalorder %v1441_v56, 0  ;;  %v2089_v10 = vsel %vm777_vm15, %v4437_v45, %v4505_v59  ;;  %v1503_v11 = vshrl.u32 %v1454_v2, 16  ;;  %v1506_v38 = vshll.u32 %v1454_v2, 16  ;;  %v3646_v56 = vld [vmem:[%s4787_s3 + $0x1d0] sm:$0xff]   ;;  %v3647_v2 = vld [vmem:[%s4787_s3 + $0xc8] sm:$0xff]  }
  0x71   : > { %3293 = vmatprep.subr.bf16.mxu1 %v3633_v24  ;;  %v1453_v44 = vsel %vm1448_vm12, %v4533_v26, 0  ;;  %v1511_v8 = vshrl.u32 %v1455_v21, 16  ;;  %v1514_v22 = vshll.u32 %v1455_v21, 16  ;;  %v4566_v15 = vrot.slane %v1487_v17, 7 }
  0x72   : > { %3286 = vmatmul.mubr.bf16.gmra.mrb[4].mxu1 %v999_v34  ;;  %v1495_v3 = vshrl.u32 %v1453_v44, 16  ;;  %v1505_v16 = vrot.slane %v1503_v11, 7  ;;  %v2105_v34 = vrot.slane %v2103_v36, 4  ;;  %v1282_v13 = vshll.u32 %v1225_v52, 16 }
  0x73   : > { %3394 = vmatpush3.bf16.msra.mxu0 %v3634_v49  ;;  %3305 = vmatprep.mubr.bf16.mxu1 %v1268_v1  ;;  %v1498_v49 = vshll.u32 %v1453_v44, 16  ;;  %v1513_v35 = vrot.slane %v1511_v8, 7  ;;  %vm1221_vm0 = vcmp.ne.s16.totalorder %v4487_v19, 0  ;;  %v1275_v40 = vrot.slane %v1273_v39, 5  ;;  %v3649_v8 = vld [vmem:[%s4787_s3 + $0xd0] sm:$0xff]  }
  0x74   : > { %3395 = vmatprep.subr.bf16.mxu0 %v3636_v62  ;;  %3294 = vmatpush3.bf16.msra.mxu1 %v3633_v24  ;;  %v1497_v45 = vrot.slane %v1495_v3, 7  ;;  %v1270_v24 = vshrl.u32 %v4519_v14, 16  ;;  %v2106_v30 = vor.u32 %v2105_v34, %v2102_v42  ;;  %v1281_v57 = vrot.slane %v1279_v47, 4  ;;  %v3645_v3 = vld [vmem:[%s4787_s3 + $0xc0] sm:$0xff]   ;;  %v3655_v47 = vld [vmem:[%s4787_s3 + $0xe8] sm:$0xff]  }
  0x75   : > { %3295 = vmatprep.subr.bf16.mxu1 %v3635_v20  ;;  %v1516_v1 = vor.u32 %v1514_v22, %v1513_v35  ;;  %v2277_v6 = vrot.slane %v4533_v26, 4  ;;  %vm1446_vm3 = vcmp.ne.s16.totalorder %v4467_v7, 0  ;;  %v1490_v11 = vshll.u32 %v4526_v50, 16  ;;  %v3652_v50 = vld [vmem:[%s4787_s3 + $0x1e8] sm:$0xff]   ;;  %v3653_v42 = vld [vmem:[%s4787_s3 + $0xe0] sm:$0xff]   ;;  %v3656_v35 = vld [vmem:[%s4787_s3 + $0x1f8] sm:$0xff]  }
  0x76   : > { %v1500_v23 = vor.u32 %v1498_v49, %v1497_v45  ;;  %v2424_v34 = vsel %vm1218_vm10, %v4533_v26, 0  ;;  %v3659_v26 = vld [vmem:[%s4787_s3 + $0xf8] sm:$0xff]  }
  0x77   : > { %3396 = vmatpush3.bf16.msra.mxu0 %v3636_v62  ;;  %v2097_v62 = vor.u32 %v2096_v37, %v2093_v31  ;;  %v4586_v14 = vsel %vm1481_vm4, %v1505_v16, %v1516_v1  ;;  %v3643_v31 = vld [vmem:[%s4787_s3 + $0xb8] sm:$0xff]   ;;  %v1226_v37 = vsel %vm1221_vm0, %v1137_v61, 0  ;;  %v2465_v1 = vshll.u32 %v2424_v34, 16 }
  0x78   : > { %3397 = vmatprep.subr.bf16.mxu0 %v3638_v27  ;;  %3296 = vmatpush3.bf16.msra.mxu1 %v3635_v20  ;;  %v4574_v41 = vsel %vm1481_vm4, %v4566_v15, %v1500_v23  ;;  %v1508_v20 = vor.u32 %v1506_v38, %v1505_v16  ;;  %v1288_v48 = vshrl.u32 %v1226_v37, 16  ;;  %v1291_v17 = vshll.u32 %v1226_v37, 16  ;;  %v3650_v38 = vld [vmem:[%s4787_s3 + $0x1e0] sm:$0xff]   ;;  %v3651_v23 = vld [vmem:[%s4787_s3 + $0xd8] sm:$0xff]   ;;  %v2418_v16 = vld [vmem:[#allocation2 + $0x8] sm:$0xf0] }
  0x79   : > { %3297 = vmatprep.subr.bf16.mxu1 %v3637_v60  ;;  %v2098_v55 = vsel %vm777_vm15, %v4505_v59, %v2097_v62  ;;  %v1284_v59 = vrot.slane %v1282_v13, 5  ;;  %v2107_v49 = vsel %vm777_vm15, %v2097_v62, %v2106_v30  ;;  %v2279_v13 = vrot.slane %v4552_v46, 4 }
  0x7a   : > { %v1290_v52 = vrot.slane %v1288_v48, 4  ;;  %v3663_v48 = vld [vmem:[%s4787_s3 + $0x220] sm:$0xff]  }
  0x7b   : > { %3398 = vmatpush3.bf16.msra.mxu0 %v3638_v27  ;;  %v1272_v27 = vrot.slane %v1270_v24, 4  ;;  %v1285_v58 = vor.u32 %v1284_v59, %v1281_v57  ;;  %v1492_v24 = vor.u32 %v1490_v11, %v4566_v15  ;;  %v3654_v15 = vld [vmem:[%s4787_s3 + $0x1f0] sm:$0xff]   ;;  %v2467_v57 = vrot.slane %v2465_v1, 5 }
  0x7c   : > { %3399 = vmatprep.subr.bf16.mxu0 %v3640_v9  ;;  %3298 = vmatpush3.bf16.msra.mxu1 %v3637_v60  ;;  %v4583_v60 = vsel %vm1481_vm4, %v1497_v45, %v1508_v20  ;;  %v1293_v45 = vrot.slane %v1291_v17, 5  ;;  %v2462_v20 = vshrl.u32 %v2424_v34, 16  ;;  %v3130_v34 = vld [vmem:[%s4705_s8 + $0x8] sm:$0xff]  }
  0x7d   : > { %3299 = vmatprep.subr.bf16.mxu1 %v3639_v12  ;;  %v1276_v44 = vor.u32 %v1275_v40, %v1272_v27  ;;  %v3660_v27 = vld [vmem:[%s4787_s3 + $0x208] sm:$0xff]   ;;  %v2282_v40 = vsel %vm990_vm2, %v2279_v13, %v2281_v63  ;;  %v2426_v63 = vsel %vm1220_vm11, %v4546_v4, 0 }
  0x7e   : > { %v2464_v30 = vrot.slane %v2462_v20, 4 }
  0x7f   : > { %3400 = vmatpush3.bf16.msra.mxu0 %v3640_v9  ;;  %v2276_v9 = vrot.slane %v2241_v29, 4  ;;  %v1286_v21 = vsel %vm707_vm9, %v1276_v44, %v1285_v58 }
  0x80   : > { %3409 = vmatprep.subr.bf16.mxu0 %v3642_v5  ;;  %3300 = vmatpush3.bf16.msra.mxu1 %v3639_v12  ;;  %v1277_v12 = vsel %vm707_vm9, %v4482_v25, %v1276_v44  ;;  %v1294_v25 = vor.u32 %v1293_v45, %v1290_v52  ;;  %v2468_v37 = vor.u32 %v2467_v57, %v2464_v30 }
  0x81   : > { %3301 = vmatprep.subr.bf16.mxu1 %v3641_v28  ;;  %v2278_v7 = vsel %vm990_vm2, %v2276_v9, %v2277_v6  ;;  %v2480_v9 = vshrl.u32 %v2426_v63, 16 }
  0x82   : > { %3402 = vmatmul.mubr.bf16.vlgmr.msra.gmra.mrb[0].mxu0 %v2089_v10  ;;  %v1429_v10 = vld [vmem:[#allocation2] sm:$0x80]  ;;  %v1295_v62 = vsel %vm707_vm9, %v1285_v58, %v1294_v25 }
  0x83   : > { %3410 = vmatpush3.bf16.msra.mxu0 %v3642_v5  ;;  %3405 = vmatprep.mubr.bf16.mxu0 %v2098_v55  ;;  %v1451_v36 = vsel %vm1446_vm3, %v1429_v10, 0  ;;  %v2280_v55 = vsel %vm990_vm2, %v2277_v6, %v2279_v13  ;;  %v2483_v6 = vshll.u32 %v2426_v63, 16  ;;  %v3662_v10 = vld [vmem:[%s4787_s3 + $0x218] sm:$0xff]   ;;  %v2482_v32 = vrot.slane %v2480_v9, 4 }
  0x84   : > { %3411 = vmatprep.subr.bf16.mxu0 %v3644_v54  ;;  %3302 = vmatpush3.bf16.msra.mxu1 %v3641_v28  ;;  %v1483_v5 = vshrl.u32 %v1451_v36, 16  ;;  %v2423_v28 = vsel %vm1217_vm7, %v2418_v16, 0  ;;  %v3666_v36 = vld [vmem:[%s4787_s3 + $0x238] sm:$0xff]  }
  0x85   : > { %3303 = vmatprep.subr.bf16.mxu1 %v3643_v31  ;;  %v2454_v61 = vshrl.u32 %v2423_v28, 16  ;;  %v2457_v18 = vshll.u32 %v2423_v28, 16 }
  0x86   : > { %v1485_v22 = vrot.slane %v1483_v5, 7 }
  0x87   : > { %3412 = vmatpush3.bf16.msra.mxu0 %v3644_v54  ;;  %v3658_v54 = vld [vmem:[%s4787_s3 + $0x200] sm:$0xff]   ;;  %v2456_v29 = vrot.slane %v2454_v61, 4 }
  0x88   : > { %3413 = vmatprep.subr.bf16.mxu0 %v3646_v56  ;;  %3304 = vmatpush3.bf16.msra.mxu1 %v3643_v31  ;;  %v1493_v39 = vsel %vm1481_vm4, %v1485_v22, %v1492_v24  ;;  %v2459_v31 = vrot.slane %v2457_v18, 5  ;;  %v3117_v18 = vunpack.c.l.bf16 %v3130_v34 }
  0x89   : > { %3313 = vmatprep.subr.bf16.mxu1 %v3645_v3 }
  0x8a   : > { %3406 = vmatmul.mubr.bf16.gmra.mrb[4].mxu0 %v2107_v49  ;;  %v2460_v59 = vor.u32 %v2459_v31, %v2456_v29  ;;  %v3664_v49 = vld [vmem:[%s4787_s3 + $0x228] sm:$0xff]   ;;  %v3118_v29 = vunpack.c.h.bf16 %v3130_v34 }
  0x8b   : > { %3414 = vmatpush3.bf16.msra.mxu0 %v3646_v56  ;;  %3425 = vmatprep.mubr.bf16.mxu0 %v2278_v7  ;;  %v2425_v56 = vsel %vm1219_vm8, %v4552_v46, 0  ;;  %v2485_v46 = vrot.slane %v2483_v6, 5  ;;  %v3132_v6 = vld [vmem:[%s4705_s8 + $0x18] sm:$0xff]  }
  0x8c   : > { %3415 = vmatprep.subr.bf16.mxu0 %v3648_v33  ;;  %3306 = vmatmul.mubr.bf16.vlgmr.msra.gmra.mrb[0].mxu1 %v1277_v12  ;;  %v2469_v44 = vsel %vm707_vm9, %v2460_v59, %v2468_v37  ;;  %v2471_v0 = vshrl.u32 %v2425_v56, 16  ;;  %v2474_v4 = vshll.u32 %v2425_v56, 16 }
  0x8d   : > { %3314 = vmatpush3.bf16.msra.mxu1 %v3645_v3  ;;  %3309 = vmatprep.mubr.bf16.mxu1 %v1286_v21 }
  0x8e   : > { %3315 = vmatprep.subr.bf16.mxu1 %v3647_v2  ;;  %v2473_v17 = vrot.slane %v2471_v0, 4  ;;  %v2476_v3 = vrot.slane %v2474_v4, 5  ;;  %v3125_v4 = vunpack.c.l.bf16 %v3132_v6 }
  0x8f   : > { %3416 = vmatpush3.bf16.msra.mxu0 %v3648_v33 }
  0x90   : > { %3417 = vmatprep.subr.bf16.mxu0 %v3650_v38  ;;  %v2477_v58 = vor.u32 %v2476_v3, %v2473_v17 }
  0x91   : > { %3316 = vmatpush3.bf16.msra.mxu1 %v3647_v2 }
  0x92   : > { %3317 = vmatprep.subr.bf16.mxu1 %v3649_v8  ;;  %v2478_v52 = vsel %vm707_vm9, %v2468_v37, %v2477_v58 }
  0x93   : > { %3418 = vmatpush3.bf16.msra.mxu0 %v3650_v38 }
  0x94   : > { %3419 = vmatprep.subr.bf16.mxu0 %v3652_v50  ;;  %3310 = vmatmul.mubr.bf16.gmra.mrb[4].mxu1 %v1295_v62 }
  0x95   : > { %3318 = vmatpush3.bf16.msra.mxu1 %v3649_v8  ;;  %3329 = vmatprep.mubr.bf16.mxu1 %v1493_v39 }
  0x96   : > { %3319 = vmatprep.subr.bf16.mxu1 %v3651_v23 }
  0x97   : > { %3420 = vmatpush3.bf16.msra.mxu0 %v3652_v50 }
  0x98   : > { %3421 = vmatprep.subr.bf16.mxu0 %v3654_v15 }
  0x99   : > { %3320 = vmatpush3.bf16.msra.mxu1 %v3651_v23 }
  0x9a   : > { %3321 = vmatprep.subr.bf16.mxu1 %v3653_v42 }
  0x9b   : > { %3422 = vmatpush3.bf16.msra.mxu0 %v3654_v15 }
  0x9c   : > { %3423 = vmatprep.subr.bf16.mxu0 %v3656_v35 }
  0x9d   : > { %3322 = vmatpush3.bf16.msra.mxu1 %v3653_v42 }
  0x9e   : > { %3323 = vmatprep.subr.bf16.mxu1 %v3655_v47 }
  0x9f   : > { %3424 = vmatpush3.bf16.msra.mxu0 %v3656_v35 }
  0xa0   : > { %3433 = vmatprep.subr.bf16.mxu0 %v3658_v54 }
  0xa1   : > { %3324 = vmatpush3.bf16.msra.mxu1 %v3655_v47  ;;  %v3112_v47 = vld [vmem:[%s4705_s8] sm:$0xff]  }
  0xa2   : > { %3426 = vmatmul.mubr.bf16.vlgmr.msra.gmra.mrb[0].mxu0 %v2280_v55  ;;  %3325 = vmatprep.subr.bf16.mxu1 %v3657_v43 }
  0xa3   : > { %3434 = vmatpush3.bf16.msra.mxu0 %v3658_v54  ;;  %3429 = vmatprep.mubr.bf16.mxu0 %v2282_v40 }
  0xa4   : > { %3435 = vmatprep.subr.bf16.mxu0 %v3660_v27 }
  0xa5   : > { %3326 = vmatpush3.bf16.msra.mxu1 %v3657_v43  ;;  %v3113_v43 = vunpack.c.l.bf16 %v3112_v47 }
  0xa6   : > { %3327 = vmatprep.subr.bf16.mxu1 %v3659_v26 }
  0xa7   : > { %3436 = vmatpush3.bf16.msra.mxu0 %v3660_v27 }
  0xa8   : > { %3437 = vmatprep.subr.bf16.mxu0 %v3661_v51 }
  0xa9   : > { %3328 = vmatpush3.bf16.msra.mxu1 %v3659_v26  ;;  %v3114_v26 = vunpack.c.h.bf16 %v3112_v47 }
  0xaa   : > { %3430 = vmatmul.mubr.bf16.gmra.mrb[4].mxu0 %v4538_v53  ;;  %3457 = vmatprep.subr.bf16.mxu1 %v3658_v54  ;;  %v2486_v53 = vor.u32 %v2485_v46, %v2482_v32 }
  0xab   : > { %3438 = vmatpush3.bf16.msra.mxu0 %v3661_v51  ;;  %3449 = vmatprep.mubr.bf16.mxu0 %v2469_v44 }
  0xac   : > { %3439 = vmatprep.subr.bf16.mxu0 %v3662_v10  ;;  %3330 = vmatmul.mubr.bf16.vlgmr.msra.gmra.mrb[0].mxu1 %v4574_v41  ;;  %v2487_v33 = vsel %vm707_vm9, %v2477_v58, %v2486_v53  ;;  %v3665_v41 = vld [vmem:[%s4787_s3 + $0x230] sm:$0xff]  }
  0xad   : > { %3465 = vmatpush3.bf16.msra.mxu1 %v3658_v54  ;;  %3333 = vmatprep.mubr.bf16.mxu1 %v4583_v60  ;;  %v2422_v60 = vld [vmem:[#allocation2 + $0x28] sm:$0x1f]  ;;  %v3086_v54 = vld [vmem:[%s4788_s4] ss:$0 sm:$0xff] }
  0xae   : > { %3458 = vmatprep.subr.bf16.mxu1 %v3660_v27  ;;  %v2427_v7 = vsel %vm1221_vm0, %v2422_v60, 0 }
  0xaf   : > { %3440 = vmatpush3.bf16.msra.mxu0 %v3662_v10  ;;  %v2489_v12 = vshrl.u32 %v2427_v7, 16 }
  0xb0   : > { %3441 = vmatprep.subr.bf16.mxu0 %v3663_v48 }
  0xb1   : > { %3466 = vmatpush3.bf16.msra.mxu1 %v3660_v27  ;;  %v2491_v45 = vrot.slane %v2489_v12, 4 }
  0xb2   : > { %3459 = vmatprep.subr.bf16.mxu1 %v3661_v51 }
  0xb3   : > { %3442 = vmatpush3.bf16.msra.mxu0 %v3663_v48 }
  0xb4   : > { %3443 = vmatprep.subr.bf16.mxu0 %v3664_v49  ;;  %3334 = vmatmul.mubr.bf16.gmra.mrb[4].mxu1 %v4586_v14  ;;  %v2492_v14 = vshll.u32 %v2427_v7, 16 }
  0xb5   : > { %3467 = vmatpush3.bf16.msra.mxu1 %v3661_v51  ;;  %3453 = vmatprep.mubr.bf16.mxu1 %v2487_v33 }
  0xb6   : > { %3460 = vmatprep.subr.bf16.mxu1 %v3662_v10  ;;  %v2494_v2 = vrot.slane %v2492_v14, 5 }
  0xb7   : > { %3444 = vmatpush3.bf16.msra.mxu0 %v3664_v49 }
  0xb8   : > { %3445 = vmatprep.subr.bf16.mxu0 %v3665_v41  ;;  %v2495_v21 = vor.u32 %v2494_v2, %v2491_v45 }
  0xb9   : > { %3468 = vmatpush3.bf16.msra.mxu1 %v3662_v10  ;;  %v3131_v10 = vld [vmem:[%s4705_s8 + $0x10] sm:$0xff]   ;;  %s3705_s8 = scalar_lea.vmem %s3704_s30, 2048 }
  0xba   : > { %3461 = vmatprep.subr.bf16.mxu1 %v3663_v48  ;;  %v2496_v19 = vsel %vm707_vm9, %v2486_v53, %v2495_v21  ;;  %v3122_v60 = vunpack.c.h.bf16 %v3131_v10  ;;  %p3707_p2 = scmp.lt.s32.totalorder %s3705_s8, %s3699_s28 }
  0xbb   : > { %3446 = vmatpush3.bf16.msra.mxu0 %v3665_v41 }
  0xbc   : > { %3447 = vmatprep.subr.bf16.mxu0 %v3666_v36  ;;  %p3708_p3 = por %p3707_p2, %p3706_p1 }
  0xbd   : > { %3469 = vmatpush3.bf16.msra.mxu1 %v3663_v48  ;;  %v3121_v48 = vunpack.c.l.bf16 %v3131_v10 }
  0xbe   : > { %3462 = vmatprep.subr.bf16.mxu1 %v3664_v49  ;;  %p3709_p5 = pnand %p3708_p3, %p3702_p0 }
  0xbf   : > { %3448 = vmatpush3.bf16.msra.mxu0 %v3666_v36 }
  0xc1   : > { %3470 = vmatpush3.bf16.msra.mxu1 %v3664_v49  ;;  %v3126_v49 = vunpack.c.h.bf16 %v3132_v6 }
  0xc2   : > { %3450 = vmatmul.mubr.bf16.vlgmr.msra.gmra.mrb[0].mxu0 %v2478_v52  ;;  %3463 = vmatprep.subr.bf16.mxu1 %v3665_v41 }
  0xc5   : > { %3471 = vmatpush3.bf16.msra.mxu1 %v3665_v41 }
  0xc6   : > { %3464 = vmatprep.subr.bf16.mxu1 %v3666_v36 }
  0xc9   : > { %3472 = vmatpush3.bf16.msra.mxu1 %v3666_v36 }
  0xcc   : > { %3454 = vmatmul.mubr.bf16.vlgmr.msra.gmra.mrb[8].mxu1 %v2496_v19 }
 0x17d   : > { %v3431_v5 = vpop.f32.mrb[4].mxu0 }
 0x17e   : > { %v2387_v11 = vpop.f32.mrb[5].mxu0 }
 0x17f   : > { %v3432_v38 = vpop.f32.mrb[6].mxu0  ;;  %v3331_v25 = vpop.f32.mrb[0].mxu1 }
 0x180   : > { %v2390_v8 = vpop.f32.mrb[7].mxu0  ;;  %v1604_v22 = vpop.f32.mrb[1].mxu1 }
 0x181   : > { %v3332_v24 = vpop.f32.mrb[2].mxu1 }
 0x182   : > { %v1607_v50 = vpop.f32.mrb[3].mxu1 }
 0x187   : > { %v3335_v62 = vpop.f32.mrb[4].mxu1 }
 0x188   : > { %v3477_v23 = vadd.f32 %v3431_v5, %v3335_v62  ;;  %v1620_v39 = vpop.f32.mrb[5].mxu1 }
 0x189   : > { %v3479_v15 = vadd.f32 %v2387_v11, %v1620_v39  ;;  %v3336_v42 = vpop.f32.mrb[6].mxu1 }
 0x18a   : > { %v3481_v16 = vadd.f32 %v3432_v38, %v3336_v42  ;;  %v1623_v35 = vpop.f32.mrb[7].mxu1 }
 0x18b   : > { %v3483_v28 = vadd.f32 %v2390_v8, %v1623_v35 }
 0x195   : > { %v3451_v13 = vpop.f32.mrb[0].mxu0 }
 0x196   : > { %v3473_v61 = vadd.f32 %v3451_v13, %v3331_v25  ;;  %v2583_v20 = vpop.f32.mrb[1].mxu0 }
 0x197   : > { %v3474_v1 = vadd.f32 %v2583_v20, %v1604_v22  ;;  %v3452_v55 = vpop.f32.mrb[2].mxu0 }
 0x198   : > { %v2650_v27 = vadd.f32 %v3473_v61, %v3086_v54  ;;  %v3475_v40 = vadd.f32 %v3452_v55, %v3332_v24  ;;  %v2586_v31 = vpop.f32.mrb[3].mxu0 }
 0x199   : > { %v2648_v30 = vadd.f32 %v3474_v1, %v3086_v54  ;;  %v3476_v57 = vadd.f32 %v2586_v31, %v1607_v50 }
 0x19a   : > { %v2674_v51 = vadd.f32 %v3117_v18, %v2650_v27  ;;  %v2651_v63 = vadd.f32 %v3475_v40, %v3086_v54 }
 0x19b   : > { %v2672_v59 = vadd.f32 %v3113_v43, %v2648_v30  ;;  %v2649_v37 = vadd.f32 %v3476_v57, %v3086_v54 }
 0x19c   : > { %2682 = vst [vmem:[%s4715_s27 + $0x10] sm:$0xff] %v2674_v51  ;;  %v2675_v56 = vadd.f32 %v3118_v29, %v2651_v63 }
 0x19d   : > { %2680 = vst [vmem:[%s4715_s27] sm:$0xff] %v2672_v59  ;;  %v2673_v9 = vadd.f32 %v3114_v26, %v2649_v37 }
 0x19e   : > { %2683 = vst [vmem:[%s4715_s27 + $0x18] sm:$0xff] %v2675_v56 }
 0x19f   : > { %2681 = vst [vmem:[%s4715_s27 + $0x8] sm:$0xff] %v2673_v9  ;;  %v3455_v44 = vpop.f32.mrb[8].mxu1 }
 0x1a0   : > { %v3478_v0 = vadd.f32 %v3477_v23, %v3455_v44  ;;  %v2599_v32 = vpop.f32.mrb[9].mxu1 }
 0x1a1   : > { %v3480_v46 = vadd.f32 %v3479_v15, %v2599_v32  ;;  %v3456_v17 = vpop.f32.mrb[10].mxu1 }
 0x1a2   : > { %v2654_v3 = vadd.f32 %v3478_v0, %v3086_v54  ;;  %v3482_v53 = vadd.f32 %v3481_v16, %v3456_v17  ;;  %v2602_v58 = vpop.f32.mrb[11].mxu1 }
 0x1a3   : > { %v2652_v33 = vadd.f32 %v3480_v46, %v3086_v54  ;;  %v3484_v41 = vadd.f32 %v3483_v28, %v2602_v58 }
 0x1a4   : > { %v2678_v36 = vadd.f32 %v3125_v4, %v2654_v3  ;;  %v2655_v7 = vadd.f32 %v3482_v53, %v3086_v54 }
 0x1a5   : > { %v2676_v12 = vadd.f32 %v3121_v48, %v2652_v33  ;;  %v2653_v14 = vadd.f32 %v3484_v41, %v3086_v54 }
 0x1a6   : > { %2686 = vst [vmem:[%s4715_s27 + $0x30] sm:$0xff] %v2678_v36  ;;  %v2679_v52 = vadd.f32 %v3126_v49, %v2655_v7 }
 0x1a7   : > { %2684 = vst [vmem:[%s4715_s27 + $0x20] sm:$0xff] %v2676_v12  ;;  %v2677_v45 = vadd.f32 %v3122_v60, %v2653_v14 }
 0x1a8   : > { %2687 = vst [vmem:[%s4715_s27 + $0x38] sm:$0xff] %v2679_v52 }
 0x1a9   : > { %2685 = vst [vmem:[%s4715_s27 + $0x28] sm:$0xff] %v2677_v45 }
 0x1aa   : > { %3712 = shalt.err (!%p3709_p5)
}
 0x1ab   : > { %s3713_s11 = scalar_lea.hbm %s4729_s20, 1024  ;;  %s3717_s15 = scalar_lea.hbm %s4790_s6, 2048 }
 0x1ac   : > { %p3714_p6 = scmp.ne.s32.totalorder %s4729_s20, %s3713_s11  ;;  %p3718_p10 = scmp.lt.u32.totalorder %s4729_s20, %s4790_s6 }
 0x1ad   : > { %p3719_p11 = scmp.lt.u32.totalorder %s3717_s15, %s3713_s11  ;;  %p3721_p13 = scmp.lt.u32.totalorder %s3713_s11, %s4729_s20 }
 0x1ae   : > { %p3715_p7 = pnand %p3714_p6, %p3858_p4 }
 0x1af   : > { %p3720_p12 = por %p3719_p11, %p3718_p10 }
 0x1b0   : > { %p3716_p9 = pneg %p3715_p7 }
 0x1b1   : > { %p3722_p0 = por %p3721_p13, %p3720_p12 }
 0x1b3   : > { %p3723_p1 = pnand %p3722_p0, %p3716_p9 }
 0x1b5   : > { %3726 = shalt.err (!%p3723_p1)
}
 0x1b6   : > { %s3781_s17 = smov 128   ;;  %s3782_s18 = smov 8  }
 0x1b7   : > { %3537 = dma.vmem_to_hbm [thread:$0]  (%p3858_p4), %s4731_s16, 1024, %s4729_s20, %s4738_s24, %s3781_s17, %s3781_s17, %s3782_s18  }
 0x1b8 PF: > { %p3543_p2 = scmp.ge.s32.totalorder %s3777_s26, 2  ;;  %s2718_s28 = sand.u32 1, %s3757_s21  }
 0x1b9   : > { %s2719_s19 = scalar_lea.sflag [#allocation5], %s2718_s28 }
 0x1ba   : > { %p3540_p3 = pnand %p3543_p2, %p3865_p8 }
 0x1bc   : > { %3752 = dma.done.wait (!%p3540_p3), %s2719_s19, 1024  }
 0x1bd   : > { %3754 = vsyncadd (!%p3540_p3), %s2719_s19, 4294966272  ;;  %s19_s26 = sadd.s32 1, %s3777_s26   ;;  %s4817_s21 = smov %s3761_s22 }
 0x1be   : > { %p16_p5 = scmp.ge.s32.totalorder %s19_s26, 4   ;;  %s4818_s22 = smov %s3765_s23 }
 0x1bf   : > { %s4819_s23 = smov %s3871_s10  ;;  %s4820_s24 = smov %s3773_s25 }
 0x1c0   : > { %s4821_s25 = smov %s4823_s29  ;;  %18 = sbr.rel (!%p16_p5) target bundleno = 4 (0x4), region = 110 }
 0x1c7   :  { %2724 = vsyncpa [#allocation5], 1 }
 0x1c8   :  { %2726 = vsyncpa [#allocation5 + $0x1], 1 }

</bundles_post_ra>
